<compile_context>
chip_gen: v5e
topology: v5e:2x2
jax: 0.10.0
libtpu: 0.0.40
codegen_flags: <defaults>
</compile_context>

<pallas_src>
import math

import jax
import jax.numpy as jnp
from jax.experimental import pallas as pl
from jax.experimental.pallas import tpu as pltpu


# ---------------------------------------------------------------------------
# Fused Pallas kernel: conv-as-matmul + bias + LayerNorm([C,H,W]) + ReLU
# ---------------------------------------------------------------------------

def _fused_conv_ln_relu_kernel(p_ref, w_ref, b_ref, g_ref, bt_ref, o_ref):
    # p:  (M, Kp)  bf16 im2col patches for one sample (M = Ho*Wo, Kp = padded kh*kw*Cin)
    # w:  (Kp, C)  bf16 reshaped conv weights  (resident block)
    # b:  (1, C)   f32 conv bias               (resident block)
    # g:  (M, C)   f32 LayerNorm gamma, (H*W, C) layout (resident block)
    # bt: (M, C)   f32 LayerNorm beta                   (resident block)
    # o:  (M, C)   f32 normalized + activated feature map for one sample
    acc = jnp.dot(p_ref[...], w_ref[...], preferred_element_type=jnp.float32)  # MXU, f32 acc
    acc = acc + b_ref[...]                                                      # (M, C)

    # LayerNorm over the whole per-sample feature map (== over [C,H,W]),
    # biased variance, eps = 1e-5 (PyTorch defaults). Stats kept in f32.
    n_inv = 1.0 / float(acc.shape[0] * acc.shape[1])
    s_lane = jnp.sum(acc, axis=1, keepdims=True)              # lane reduce   -> (M, 1)
    mean = jnp.sum(s_lane, axis=0, keepdims=True) * n_inv     # sublane reduce-> (1, 1)
    cen = acc - mean
    sq_lane = jnp.sum(cen * cen, axis=1, keepdims=True)
    var = jnp.sum(sq_lane, axis=0, keepdims=True) * n_inv
    y = cen * jax.lax.rsqrt(var + 1e-5)
    y = y * g_ref[...] + bt_ref[...]
    o_ref[...] = jnp.maximum(y, 0.0)


# ---------------------------------------------------------------------------
# Wrappers (glue: replicate padding / im2col / reshapes in plain XLA)
# ---------------------------------------------------------------------------

def _im2col_nhwc(x_nhwc, k, stride, pad):
    """Replicate-padded im2col. Returns patches (B, Ho*Wo, k*k*Cin), Ho, Wo."""
    B, H, W, Cin = x_nhwc.shape
    xp = jnp.pad(x_nhwc, ((0, 0), (pad, pad), (pad, pad), (0, 0)), mode="edge")
    Hp, Wp = H + 2 * pad, W + 2 * pad
    Ho = (Hp - k) // stride + 1
    Wo = (Wp - k) // stride + 1
    slabs = []
    for di in range(k):
        for dj in range(k):
            slabs.append(
                xp[:, di:di + (Ho - 1) * stride + 1:stride,
                      dj:dj + (Wo - 1) * stride + 1:stride, :])
    # (B, Ho, Wo, k*k, Cin): patch order (kh, kw, Cin) matches the weight reshape.
    patches = jnp.stack(slabs, axis=3).reshape(B, Ho * Wo, k * k * Cin)
    return patches, Ho, Wo


def conv_ln_relu_pallas(x_nhwc, w, b, gamma_hwc, beta_hwc, stride, pad):
    """One encoder layer: Conv2d(replicate pad) + LayerNorm([C,H,W]) + ReLU, fused."""
    B = x_nhwc.shape[0]
    kh, kw, Cin, Cout = w.shape
    patches, Ho, Wo = _im2col_nhwc(x_nhwc, kh, stride, pad)
    M = Ho * Wo
    K = kh * kw * Cin
    Kp = ((K + 127) // 128) * 128              # align contraction dim to 128 lanes

    p_bf = patches.astype(jnp.bfloat16)        # bf16 matmul inputs, f32 accumulation
    w2 = w.reshape(K, Cout).astype(jnp.bfloat16)
    if Kp != K:
        p_bf = jnp.pad(p_bf, ((0, 0), (0, 0), (0, Kp - K)))
        w2 = jnp.pad(w2, ((0, Kp - K), (0, 0)))
    b2 = b.reshape(1, Cout).astype(jnp.float32)
    g2 = gamma_hwc.reshape(M, Cout).astype(jnp.float32)
    bt2 = beta_hwc.reshape(M, Cout).astype(jnp.float32)

    out = pl.pallas_call(
        _fused_conv_ln_relu_kernel,
        out_shape=jax.ShapeDtypeStruct((B, M, Cout), jnp.float32),
        grid=(B,),
        in_specs=[
            pl.BlockSpec((None, M, Kp), lambda bi: (bi, 0, 0)),   # patches: per-sample block
            pl.BlockSpec((Kp, Cout), lambda bi: (0, 0)),          # weights: resident
            pl.BlockSpec((1, Cout), lambda bi: (0, 0)),           # bias: resident
            pl.BlockSpec((M, Cout), lambda bi: (0, 0)),           # gamma: resident
            pl.BlockSpec((M, Cout), lambda bi: (0, 0)),           # beta: resident
        ],
        out_specs=pl.BlockSpec((None, M, Cout), lambda bi: (bi, 0, 0)),
        compiler_params=pltpu.CompilerParams(
            dimension_semantics=("parallel",)),
    )(p_bf, w2, b2, g2, bt2)
    return out.reshape(B, Ho, Wo, Cout)


# ---------------------------------------------------------------------------
# Parameter construction (deterministic, synthetic — mirrors ImageEncoder.__init__)
# ---------------------------------------------------------------------------

def build_encoder_params(key, img_size, input_nc, ngf):
    n_down = int(round(math.log2(img_size)))
    ks_list = [5] * (n_down - n_down // 3) + [3] * (n_down // 3)

    layer_cfg = [(7, 1, input_nc, ngf)]  # stem conv: k=7, stride=1
    for i in range(n_down):
        cin = ngf if i == 0 else ngf * (2 ** i)
        cout = ngf * (2 ** (i + 1))
        layer_cfg.append((ks_list[i], 2, cin, cout))

    params = []
    h = img_size
    for (k, s, cin, cout) in layer_cfg:
        key, k1, k2, k3, k4 = jax.random.split(key, 5)
        fan_in = k * k * cin
        w = jax.random.normal(k1, (k, k, cin, cout), jnp.float32) / math.sqrt(fan_in)
        b = 0.01 * jax.random.normal(k2, (cout,), jnp.float32)
        h = h // s  # padding = k // 2 keeps size / stride
        # LayerNorm affine params, stored as (H, W, C) to match the NHWC layout
        gamma = 1.0 + 0.01 * jax.random.normal(k3, (h, h, cout), jnp.float32)
        beta = 0.01 * jax.random.normal(k4, (h, h, cout), jnp.float32)
        params.append(dict(w=w, b=b, gamma=gamma, beta=beta, k=k, s=s))
    return params


def image_encoder_forward(params, x_nchw):
    """Matches ImageEncoder.forward: returns {'img_feat': (B, ngf * 2**n_down)}."""
    x = jnp.transpose(x_nchw, (0, 2, 3, 1))  # NCHW -> NHWC
    for p in params:
        x = conv_ln_relu_pallas(x, p["w"], p["b"], p["gamma"], p["beta"],
                                p["s"], p["k"] // 2)
    B = x.shape[0]
    # last feature map is 1x1 spatially, so this flatten equals PyTorch's NCHW flatten
    img_feat = x.reshape(B, -1)
    return {"img_feat": img_feat}


# ---------------------------------------------------------------------------

if __name__ == "__main__":
    IMG_SIZE = 16   # n_downsampling = 4
    INPUT_NC = 4
    NGF = 8
    BATCH = 2

    key = jax.random.PRNGKey(0)
    kp, kx = jax.random.split(key)
    params = build_encoder_params(kp, IMG_SIZE, INPUT_NC, NGF)
    x = jax.random.normal(kx, (BATCH, INPUT_NC, IMG_SIZE, IMG_SIZE), jnp.float32)

    fwd = jax.jit(lambda x: image_encoder_forward(params, x))
    out = fwd(x)
    jax.block_until_ready(out)

    expected_feat_dim = NGF * (2 ** int(round(math.log2(IMG_SIZE))))  # ngf * 2**n_down
    assert out["img_feat"].shape == (BATCH, expected_feat_dim), out["img_feat"].shape
    assert bool(jnp.all(jnp.isfinite(out["img_feat"])))

    print("KERNEL_OK")
</pallas_src>

<mosaic_0001>
module attributes {stable_mosaic.version = 11 : i64} {
  func.func @_fused_conv_ln_relu_kernel(%arg0: i32, %arg1: memref<1x256x256xbf16, #tpu.memory_space<vmem>>, %arg2: memref<256x8xbf16, #tpu.memory_space<vmem>>, %arg3: memref<1x8xf32, #tpu.memory_space<vmem>>, %arg4: memref<256x8xf32, #tpu.memory_space<vmem>>, %arg5: memref<256x8xf32, #tpu.memory_space<vmem>>, %arg6: memref<1x256x8xf32, #tpu.memory_space<vmem>>) attributes {dimension_semantics = [#tpu.dimension_semantics<parallel>], iteration_bounds = array<i64: 2>, scalar_prefetch = 0 : i64, scratch_operands = 0 : i64, tpu.core_type = #tpu.core_type<tc>, window_params = [{transform_indices = @transform_0, window_bounds = array<i64: 1, 256, 256>}, {pipeline_mode = #tpu.pipeline_mode<synchronous>, transform_indices = @transform_1, window_bounds = array<i64: 256, 8>}, {pipeline_mode = #tpu.pipeline_mode<synchronous>, transform_indices = @transform_2, window_bounds = array<i64: 1, 8>}, {pipeline_mode = #tpu.pipeline_mode<synchronous>, transform_indices = @transform_3, window_bounds = array<i64: 256, 8>}, {pipeline_mode = #tpu.pipeline_mode<synchronous>, transform_indices = @transform_4, window_bounds = array<i64: 256, 8>}, {transform_indices = @transform_5, window_bounds = array<i64: 1, 256, 8>}]} {
    %c0 = arith.constant 0 : index
    %c0_0 = arith.constant 0 : index
    %c0_1 = arith.constant 0 : index
    %0 = vector.load %arg1[%c0, %c0_0, %c0_1] : memref<1x256x256xbf16, #tpu.memory_space<vmem>>, vector<1x256x256xbf16>
    %1 = vector.shape_cast %0 : vector<1x256x256xbf16> to vector<256x256xbf16>
    %c0_2 = arith.constant 0 : index
    %c0_3 = arith.constant 0 : index
    %2 = vector.load %arg2[%c0_2, %c0_3] : memref<256x8xbf16, #tpu.memory_space<vmem>>, vector<256x8xbf16>
    %cst = arith.constant dense<0.000000e+00> : vector<256x8xf32>
    %3 = tpu.matmul %1, %2, %cst {dimension_numbers = #tpu.dot_dimension_numbers<[1], [0], [0], [1], [0, 0, 1, 1], [], []>} : vector<256x256xbf16>, vector<256x8xbf16>, vector<256x8xf32> -> vector<256x8xf32>
    %c0_4 = arith.constant 0 : index
    %c0_5 = arith.constant 0 : index
    %4 = vector.load %arg3[%c0_4, %c0_5] : memref<1x8xf32, #tpu.memory_space<vmem>>, vector<1x8xf32>
    %5 = vector.broadcast %4 : vector<1x8xf32> to vector<256x8xf32>
    %6 = arith.addf %3, %5 : vector<256x8xf32>
    %cst_6 = arith.constant dense<0.000000e+00> : vector<256xf32>
    %7 = vector.multi_reduction <add>, %6, %cst_6 [1] : vector<256x8xf32> to vector<256xf32>
    %8 = vector.shape_cast %7 : vector<256xf32> to vector<256x1xf32>
    %cst_7 = arith.constant dense<0.000000e+00> : vector<1xf32>
    %9 = vector.multi_reduction <add>, %8, %cst_7 [0] : vector<256x1xf32> to vector<1xf32>
    %10 = vector.shape_cast %9 : vector<1xf32> to vector<1x1xf32>
    %cst_8 = arith.constant 4.8828125E-4 : f32
    %11 = vector.broadcast %cst_8 : f32 to vector<1x1xf32>
    %12 = arith.mulf %10, %11 : vector<1x1xf32>
    %13 = vector.broadcast %12 : vector<1x1xf32> to vector<256x8xf32>
    %14 = arith.subf %6, %13 : vector<256x8xf32>
    %15 = arith.mulf %14, %14 : vector<256x8xf32>
    %cst_9 = arith.constant dense<0.000000e+00> : vector<256xf32>
    %16 = vector.multi_reduction <add>, %15, %cst_9 [1] : vector<256x8xf32> to vector<256xf32>
    %17 = vector.shape_cast %16 : vector<256xf32> to vector<256x1xf32>
    %cst_10 = arith.constant dense<0.000000e+00> : vector<1xf32>
    %18 = vector.multi_reduction <add>, %17, %cst_10 [0] : vector<256x1xf32> to vector<1xf32>
    %19 = vector.shape_cast %18 : vector<1xf32> to vector<1x1xf32>
    %cst_11 = arith.constant 4.8828125E-4 : f32
    %20 = vector.broadcast %cst_11 : f32 to vector<1x1xf32>
    %21 = arith.mulf %19, %20 : vector<1x1xf32>
    %cst_12 = arith.constant 9.99999974E-6 : f32
    %22 = vector.broadcast %cst_12 : f32 to vector<1x1xf32>
    %23 = arith.addf %21, %22 : vector<1x1xf32>
    %24 = math.rsqrt %23 : vector<1x1xf32>
    %25 = vector.broadcast %24 : vector<1x1xf32> to vector<256x8xf32>
    %26 = arith.mulf %14, %25 : vector<256x8xf32>
    %c0_13 = arith.constant 0 : index
    %c0_14 = arith.constant 0 : index
    %27 = vector.load %arg4[%c0_13, %c0_14] : memref<256x8xf32, #tpu.memory_space<vmem>>, vector<256x8xf32>
    %28 = arith.mulf %26, %27 : vector<256x8xf32>
    %c0_15 = arith.constant 0 : index
    %c0_16 = arith.constant 0 : index
    %29 = vector.load %arg5[%c0_15, %c0_16] : memref<256x8xf32, #tpu.memory_space<vmem>>, vector<256x8xf32>
    %30 = arith.addf %28, %29 : vector<256x8xf32>
    %cst_17 = arith.constant 0.000000e+00 : f32
    %31 = vector.broadcast %cst_17 : f32 to vector<256x8xf32>
    %32 = arith.maximumf %30, %31 : vector<256x8xf32>
    %c0_18 = arith.constant 0 : index
    %c0_19 = arith.constant 0 : index
    %c0_20 = arith.constant 0 : index
    %33 = vector.load %arg6[%c0_18, %c0_19, %c0_20] : memref<1x256x8xf32, #tpu.memory_space<vmem>>, vector<1x256x8xf32>
    %34 = vector.shape_cast %33 : vector<1x256x8xf32> to vector<256x8xf32>
    %35 = vector.shape_cast %32 : vector<256x8xf32> to vector<1x256x8xf32>
    tpu.vector_store %arg6[%c0_18, %c0_19, %c0_20], %35 {strides = array<i32>} : memref<1x256x8xf32, #tpu.memory_space<vmem>>, vector<1x256x8xf32>,
    return
  }
  func.func @transform_0(%arg0: i32) -> (i32, i32, i32) {
    %c0_i32 = arith.constant 0 : i32
    %c0_i32_0 = arith.constant 0 : i32
    %c0_i32_1 = arith.constant 0 : i32
    return %arg0, %c0_i32, %c0_i32_0 : i32, i32, i32
  }
  func.func @transform_1(%arg0: i32) -> (i32, i32) {
    %c0_i32 = arith.constant 0 : i32
    %c0_i32_0 = arith.constant 0 : i32
    %c0_i32_1 = arith.constant 0 : i32
    return %c0_i32, %c0_i32_0 : i32, i32
  }
  func.func @transform_2(%arg0: i32) -> (i32, i32) {
    %c0_i32 = arith.constant 0 : i32
    %c0_i32_0 = arith.constant 0 : i32
    %c0_i32_1 = arith.constant 0 : i32
    return %c0_i32, %c0_i32_0 : i32, i32
  }
  func.func @transform_3(%arg0: i32) -> (i32, i32) {
    %c0_i32 = arith.constant 0 : i32
    %c0_i32_0 = arith.constant 0 : i32
    %c0_i32_1 = arith.constant 0 : i32
    return %c0_i32, %c0_i32_0 : i32, i32
  }
  func.func @transform_4(%arg0: i32) -> (i32, i32) {
    %c0_i32 = arith.constant 0 : i32
    %c0_i32_0 = arith.constant 0 : i32
    %c0_i32_1 = arith.constant 0 : i32
    return %c0_i32, %c0_i32_0 : i32, i32
  }
  func.func @transform_5(%arg0: i32) -> (i32, i32, i32) {
    %c0_i32 = arith.constant 0 : i32
    %c0_i32_0 = arith.constant 0 : i32
    %c0_i32_1 = arith.constant 0 : i32
    return %arg0, %c0_i32, %c0_i32_0 : i32, i32, i32
  }
}

module attributes {stable_mosaic.version = 11 : i64} {
  func.func @_fused_conv_ln_relu_kernel(%arg0: i32, %arg1: memref<1x64x256xbf16, #tpu.memory_space<vmem>>, %arg2: memref<256x16xbf16, #tpu.memory_space<vmem>>, %arg3: memref<1x16xf32, #tpu.memory_space<vmem>>, %arg4: memref<64x16xf32, #tpu.memory_space<vmem>>, %arg5: memref<64x16xf32, #tpu.memory_space<vmem>>, %arg6: memref<1x64x16xf32, #tpu.memory_space<vmem>>) attributes {dimension_semantics = [#tpu.dimension_semantics<parallel>], iteration_bounds = array<i64: 2>, scalar_prefetch = 0 : i64, scratch_operands = 0 : i64, tpu.core_type = #tpu.core_type<tc>, window_params = [{transform_indices = @transform_0, window_bounds = array<i64: 1, 64, 256>}, {pipeline_mode = #tpu.pipeline_mode<synchronous>, transform_indices = @transform_1, window_bounds = array<i64: 256, 16>}, {pipeline_mode = #tpu.pipeline_mode<synchronous>, transform_indices = @transform_2, window_bounds = array<i64: 1, 16>}, {pipeline_mode = #tpu.pipeline_mode<synchronous>, transform_indices = @transform_3, window_bounds = array<i64: 64, 16>}, {pipeline_mode = #tpu.pipeline_mode<synchronous>, transform_indices = @transform_4, window_bounds = array<i64: 64, 16>}, {transform_indices = @transform_5, window_bounds = array<i64: 1, 64, 16>}]} {
    %c0 = arith.constant 0 : index
    %c0_0 = arith.constant 0 : index
    %c0_1 = arith.constant 0 : index
    %0 = vector.load %arg1[%c0, %c0_0, %c0_1] : memref<1x64x256xbf16, #tpu.memory_space<vmem>>, vector<1x64x256xbf16>
    %1 = vector.shape_cast %0 : vector<1x64x256xbf16> to vector<64x256xbf16>
    %c0_2 = arith.constant 0 : index
    %c0_3 = arith.constant 0 : index
    %2 = vector.load %arg2[%c0_2, %c0_3] : memref<256x16xbf16, #tpu.memory_space<vmem>>, vector<256x16xbf16>
    %cst = arith.constant dense<0.000000e+00> : vector<64x16xf32>
    %3 = tpu.matmul %1, %2, %cst {dimension_numbers = #tpu.dot_dimension_numbers<[1], [0], [0], [1], [0, 0, 1, 1], [], []>} : vector<64x256xbf16>, vector<256x16xbf16>, vector<64x16xf32> -> vector<64x16xf32>
    %c0_4 = arith.constant 0 : index
    %c0_5 = arith.constant 0 : index
    %4 = vector.load %arg3[%c0_4, %c0_5] : memref<1x16xf32, #tpu.memory_space<vmem>>, vector<1x16xf32>
    %5 = vector.broadcast %4 : vector<1x16xf32> to vector<64x16xf32>
    %6 = arith.addf %3, %5 : vector<64x16xf32>
    %cst_6 = arith.constant dense<0.000000e+00> : vector<64xf32>
    %7 = vector.multi_reduction <add>, %6, %cst_6 [1] : vector<64x16xf32> to vector<64xf32>
    %8 = vector.shape_cast %7 : vector<64xf32> to vector<64x1xf32>
    %cst_7 = arith.constant dense<0.000000e+00> : vector<1xf32>
    %9 = vector.multi_reduction <add>, %8, %cst_7 [0] : vector<64x1xf32> to vector<1xf32>
    %10 = vector.shape_cast %9 : vector<1xf32> to vector<1x1xf32>
    %cst_8 = arith.constant 9.765625E-4 : f32
    %11 = vector.broadcast %cst_8 : f32 to vector<1x1xf32>
    %12 = arith.mulf %10, %11 : vector<1x1xf32>
    %13 = vector.broadcast %12 : vector<1x1xf32> to vector<64x16xf32>
    %14 = arith.subf %6, %13 : vector<64x16xf32>
    %15 = arith.mulf %14, %14 : vector<64x16xf32>
    %cst_9 = arith.constant dense<0.000000e+00> : vector<64xf32>
    %16 = vector.multi_reduction <add>, %15, %cst_9 [1] : vector<64x16xf32> to vector<64xf32>
    %17 = vector.shape_cast %16 : vector<64xf32> to vector<64x1xf32>
    %cst_10 = arith.constant dense<0.000000e+00> : vector<1xf32>
    %18 = vector.multi_reduction <add>, %17, %cst_10 [0] : vector<64x1xf32> to vector<1xf32>
    %19 = vector.shape_cast %18 : vector<1xf32> to vector<1x1xf32>
    %cst_11 = arith.constant 9.765625E-4 : f32
    %20 = vector.broadcast %cst_11 : f32 to vector<1x1xf32>
    %21 = arith.mulf %19, %20 : vector<1x1xf32>
    %cst_12 = arith.constant 9.99999974E-6 : f32
    %22 = vector.broadcast %cst_12 : f32 to vector<1x1xf32>
    %23 = arith.addf %21, %22 : vector<1x1xf32>
    %24 = math.rsqrt %23 : vector<1x1xf32>
    %25 = vector.broadcast %24 : vector<1x1xf32> to vector<64x16xf32>
    %26 = arith.mulf %14, %25 : vector<64x16xf32>
    %c0_13 = arith.constant 0 : index
    %c0_14 = arith.constant 0 : index
    %27 = vector.load %arg4[%c0_13, %c0_14] : memref<64x16xf32, #tpu.memory_space<vmem>>, vector<64x16xf32>
    %28 = arith.mulf %26, %27 : vector<64x16xf32>
    %c0_15 = arith.constant 0 : index
    %c0_16 = arith.constant 0 : index
    %29 = vector.load %arg5[%c0_15, %c0_16] : memref<64x16xf32, #tpu.memory_space<vmem>>, vector<64x16xf32>
    %30 = arith.addf %28, %29 : vector<64x16xf32>
    %cst_17 = arith.constant 0.000000e+00 : f32
    %31 = vector.broadcast %cst_17 : f32 to vector<64x16xf32>
    %32 = arith.maximumf %30, %31 : vector<64x16xf32>
    %c0_18 = arith.constant 0 : index
    %c0_19 = arith.constant 0 : index
    %c0_20 = arith.constant 0 : index
    %33 = vector.load %arg6[%c0_18, %c0_19, %c0_20] : memref<1x64x16xf32, #tpu.memory_space<vmem>>, vector<1x64x16xf32>
    %34 = vector.shape_cast %33 : vector<1x64x16xf32> to vector<64x16xf32>
    %35 = vector.shape_cast %32 : vector<64x16xf32> to vector<1x64x16xf32>
    tpu.vector_store %arg6[%c0_18, %c0_19, %c0_20], %35 {strides = array<i32>} : memref<1x64x16xf32, #tpu.memory_space<vmem>>, vector<1x64x16xf32>,
    return
  }
  func.func @transform_0(%arg0: i32) -> (i32, i32, i32) {
    %c0_i32 = arith.constant 0 : i32
    %c0_i32_0 = arith.constant 0 : i32
    %c0_i32_1 = arith.constant 0 : i32
    return %arg0, %c0_i32, %c0_i32_0 : i32, i32, i32
  }
  func.func @transform_1(%arg0: i32) -> (i32, i32) {
    %c0_i32 = arith.constant 0 : i32
    %c0_i32_0 = arith.constant 0 : i32
    %c0_i32_1 = arith.constant 0 : i32
    return %c0_i32, %c0_i32_0 : i32, i32
  }
  func.func @transform_2(%arg0: i32) -> (i32, i32) {
    %c0_i32 = arith.constant 0 : i32
    %c0_i32_0 = arith.constant 0 : i32
    %c0_i32_1 = arith.constant 0 : i32
    return %c0_i32, %c0_i32_0 : i32, i32
  }
  func.func @transform_3(%arg0: i32) -> (i32, i32) {
    %c0_i32 = arith.constant 0 : i32
    %c0_i32_0 = arith.constant 0 : i32
    %c0_i32_1 = arith.constant 0 : i32
    return %c0_i32, %c0_i32_0 : i32, i32
  }
  func.func @transform_4(%arg0: i32) -> (i32, i32) {
    %c0_i32 = arith.constant 0 : i32
    %c0_i32_0 = arith.constant 0 : i32
    %c0_i32_1 = arith.constant 0 : i32
    return %c0_i32, %c0_i32_0 : i32, i32
  }
  func.func @transform_5(%arg0: i32) -> (i32, i32, i32) {
    %c0_i32 = arith.constant 0 : i32
    %c0_i32_0 = arith.constant 0 : i32
    %c0_i32_1 = arith.constant 0 : i32
    return %arg0, %c0_i32, %c0_i32_0 : i32, i32, i32
  }
}

module attributes {stable_mosaic.version = 11 : i64} {
  func.func @_fused_conv_ln_relu_kernel(%arg0: i32, %arg1: memref<1x16x512xbf16, #tpu.memory_space<vmem>>, %arg2: memref<512x32xbf16, #tpu.memory_space<vmem>>, %arg3: memref<1x32xf32, #tpu.memory_space<vmem>>, %arg4: memref<16x32xf32, #tpu.memory_space<vmem>>, %arg5: memref<16x32xf32, #tpu.memory_space<vmem>>, %arg6: memref<1x16x32xf32, #tpu.memory_space<vmem>>) attributes {dimension_semantics = [#tpu.dimension_semantics<parallel>], iteration_bounds = array<i64: 2>, scalar_prefetch = 0 : i64, scratch_operands = 0 : i64, tpu.core_type = #tpu.core_type<tc>, window_params = [{transform_indices = @transform_0, window_bounds = array<i64: 1, 16, 512>}, {pipeline_mode = #tpu.pipeline_mode<synchronous>, transform_indices = @transform_1, window_bounds = array<i64: 512, 32>}, {pipeline_mode = #tpu.pipeline_mode<synchronous>, transform_indices = @transform_2, window_bounds = array<i64: 1, 32>}, {pipeline_mode = #tpu.pipeline_mode<synchronous>, transform_indices = @transform_3, window_bounds = array<i64: 16, 32>}, {pipeline_mode = #tpu.pipeline_mode<synchronous>, transform_indices = @transform_4, window_bounds = array<i64: 16, 32>}, {transform_indices = @transform_5, window_bounds = array<i64: 1, 16, 32>}]} {
    %c0 = arith.constant 0 : index
    %c0_0 = arith.constant 0 : index
    %c0_1 = arith.constant 0 : index
    %0 = vector.load %arg1[%c0, %c0_0, %c0_1] : memref<1x16x512xbf16, #tpu.memory_space<vmem>>, vector<1x16x512xbf16>
    %1 = vector.shape_cast %0 : vector<1x16x512xbf16> to vector<16x512xbf16>
    %c0_2 = arith.constant 0 : index
    %c0_3 = arith.constant 0 : index
    %2 = vector.load %arg2[%c0_2, %c0_3] : memref<512x32xbf16, #tpu.memory_space<vmem>>, vector<512x32xbf16>
    %cst = arith.constant dense<0.000000e+00> : vector<16x32xf32>
    %3 = tpu.matmul %1, %2, %cst {dimension_numbers = #tpu.dot_dimension_numbers<[1], [0], [0], [1], [0, 0, 1, 1], [], []>} : vector<16x512xbf16>, vector<512x32xbf16>, vector<16x32xf32> -> vector<16x32xf32>
    %c0_4 = arith.constant 0 : index
    %c0_5 = arith.constant 0 : index
    %4 = vector.load %arg3[%c0_4, %c0_5] : memref<1x32xf32, #tpu.memory_space<vmem>>, vector<1x32xf32>
    %5 = vector.broadcast %4 : vector<1x32xf32> to vector<16x32xf32>
    %6 = arith.addf %3, %5 : vector<16x32xf32>
    %cst_6 = arith.constant dense<0.000000e+00> : vector<16xf32>
    %7 = vector.multi_reduction <add>, %6, %cst_6 [1] : vector<16x32xf32> to vector<16xf32>
    %8 = vector.shape_cast %7 : vector<16xf32> to vector<16x1xf32>
    %cst_7 = arith.constant dense<0.000000e+00> : vector<1xf32>
    %9 = vector.multi_reduction <add>, %8, %cst_7 [0] : vector<16x1xf32> to vector<1xf32>
    %10 = vector.shape_cast %9 : vector<1xf32> to vector<1x1xf32>
    %cst_8 = arith.constant 0.001953125 : f32
    %11 = vector.broadcast %cst_8 : f32 to vector<1x1xf32>
    %12 = arith.mulf %10, %11 : vector<1x1xf32>
    %13 = vector.broadcast %12 : vector<1x1xf32> to vector<16x32xf32>
    %14 = arith.subf %6, %13 : vector<16x32xf32>
    %15 = arith.mulf %14, %14 : vector<16x32xf32>
    %cst_9 = arith.constant dense<0.000000e+00> : vector<16xf32>
    %16 = vector.multi_reduction <add>, %15, %cst_9 [1] : vector<16x32xf32> to vector<16xf32>
    %17 = vector.shape_cast %16 : vector<16xf32> to vector<16x1xf32>
    %cst_10 = arith.constant dense<0.000000e+00> : vector<1xf32>
    %18 = vector.multi_reduction <add>, %17, %cst_10 [0] : vector<16x1xf32> to vector<1xf32>
    %19 = vector.shape_cast %18 : vector<1xf32> to vector<1x1xf32>
    %cst_11 = arith.constant 0.001953125 : f32
    %20 = vector.broadcast %cst_11 : f32 to vector<1x1xf32>
    %21 = arith.mulf %19, %20 : vector<1x1xf32>
    %cst_12 = arith.constant 9.99999974E-6 : f32
    %22 = vector.broadcast %cst_12 : f32 to vector<1x1xf32>
    %23 = arith.addf %21, %22 : vector<1x1xf32>
    %24 = math.rsqrt %23 : vector<1x1xf32>
    %25 = vector.broadcast %24 : vector<1x1xf32> to vector<16x32xf32>
    %26 = arith.mulf %14, %25 : vector<16x32xf32>
    %c0_13 = arith.constant 0 : index
    %c0_14 = arith.constant 0 : index
    %27 = vector.load %arg4[%c0_13, %c0_14] : memref<16x32xf32, #tpu.memory_space<vmem>>, vector<16x32xf32>
    %28 = arith.mulf %26, %27 : vector<16x32xf32>
    %c0_15 = arith.constant 0 : index
    %c0_16 = arith.constant 0 : index
    %29 = vector.load %arg5[%c0_15, %c0_16] : memref<16x32xf32, #tpu.memory_space<vmem>>, vector<16x32xf32>
    %30 = arith.addf %28, %29 : vector<16x32xf32>
    %cst_17 = arith.constant 0.000000e+00 : f32
    %31 = vector.broadcast %cst_17 : f32 to vector<16x32xf32>
    %32 = arith.maximumf %30, %31 : vector<16x32xf32>
    %c0_18 = arith.constant 0 : index
    %c0_19 = arith.constant 0 : index
    %c0_20 = arith.constant 0 : index
    %33 = vector.load %arg6[%c0_18, %c0_19, %c0_20] : memref<1x16x32xf32, #tpu.memory_space<vmem>>, vector<1x16x32xf32>
    %34 = vector.shape_cast %33 : vector<1x16x32xf32> to vector<16x32xf32>
    %35 = vector.shape_cast %32 : vector<16x32xf32> to vector<1x16x32xf32>
    tpu.vector_store %arg6[%c0_18, %c0_19, %c0_20], %35 {strides = array<i32>} : memref<1x16x32xf32, #tpu.memory_space<vmem>>, vector<1x16x32xf32>,
    return
  }
  func.func @transform_0(%arg0: i32) -> (i32, i32, i32) {
    %c0_i32 = arith.constant 0 : i32
    %c0_i32_0 = arith.constant 0 : i32
    %c0_i32_1 = arith.constant 0 : i32
    return %arg0, %c0_i32, %c0_i32_0 : i32, i32, i32
  }
  func.func @transform_1(%arg0: i32) -> (i32, i32) {
    %c0_i32 = arith.constant 0 : i32
    %c0_i32_0 = arith.constant 0 : i32
    %c0_i32_1 = arith.constant 0 : i32
    return %c0_i32, %c0_i32_0 : i32, i32
  }
  func.func @transform_2(%arg0: i32) -> (i32, i32) {
    %c0_i32 = arith.constant 0 : i32
    %c0_i32_0 = arith.constant 0 : i32
    %c0_i32_1 = arith.constant 0 : i32
    return %c0_i32, %c0_i32_0 : i32, i32
  }
  func.func @transform_3(%arg0: i32) -> (i32, i32) {
    %c0_i32 = arith.constant 0 : i32
    %c0_i32_0 = arith.constant 0 : i32
    %c0_i32_1 = arith.constant 0 : i32
    return %c0_i32, %c0_i32_0 : i32, i32
  }
  func.func @transform_4(%arg0: i32) -> (i32, i32) {
    %c0_i32 = arith.constant 0 : i32
    %c0_i32_0 = arith.constant 0 : i32
    %c0_i32_1 = arith.constant 0 : i32
    return %c0_i32, %c0_i32_0 : i32, i32
  }
  func.func @transform_5(%arg0: i32) -> (i32, i32, i32) {
    %c0_i32 = arith.constant 0 : i32
    %c0_i32_0 = arith.constant 0 : i32
    %c0_i32_1 = arith.constant 0 : i32
    return %arg0, %c0_i32, %c0_i32_0 : i32, i32, i32
  }
}

module attributes {stable_mosaic.version = 11 : i64} {
  func.func @_fused_conv_ln_relu_kernel(%arg0: i32, %arg1: memref<1x4x896xbf16, #tpu.memory_space<vmem>>, %arg2: memref<896x64xbf16, #tpu.memory_space<vmem>>, %arg3: memref<1x64xf32, #tpu.memory_space<vmem>>, %arg4: memref<4x64xf32, #tpu.memory_space<vmem>>, %arg5: memref<4x64xf32, #tpu.memory_space<vmem>>, %arg6: memref<1x4x64xf32, #tpu.memory_space<vmem>>) attributes {dimension_semantics = [#tpu.dimension_semantics<parallel>], iteration_bounds = array<i64: 2>, scalar_prefetch = 0 : i64, scratch_operands = 0 : i64, tpu.core_type = #tpu.core_type<tc>, window_params = [{transform_indices = @transform_0, window_bounds = array<i64: 1, 4, 896>}, {pipeline_mode = #tpu.pipeline_mode<synchronous>, transform_indices = @transform_1, window_bounds = array<i64: 896, 64>}, {pipeline_mode = #tpu.pipeline_mode<synchronous>, transform_indices = @transform_2, window_bounds = array<i64: 1, 64>}, {pipeline_mode = #tpu.pipeline_mode<synchronous>, transform_indices = @transform_3, window_bounds = array<i64: 4, 64>}, {pipeline_mode = #tpu.pipeline_mode<synchronous>, transform_indices = @transform_4, window_bounds = array<i64: 4, 64>}, {transform_indices = @transform_5, window_bounds = array<i64: 1, 4, 64>}]} {
    %c0 = arith.constant 0 : index
    %c0_0 = arith.constant 0 : index
    %c0_1 = arith.constant 0 : index
    %0 = vector.load %arg1[%c0, %c0_0, %c0_1] : memref<1x4x896xbf16, #tpu.memory_space<vmem>>, vector<1x4x896xbf16>
    %1 = vector.shape_cast %0 : vector<1x4x896xbf16> to vector<4x896xbf16>
    %c0_2 = arith.constant 0 : index
    %c0_3 = arith.constant 0 : index
    %2 = vector.load %arg2[%c0_2, %c0_3] : memref<896x64xbf16, #tpu.memory_space<vmem>>, vector<896x64xbf16>
    %cst = arith.constant dense<0.000000e+00> : vector<4x64xf32>
    %3 = tpu.matmul %1, %2, %cst {dimension_numbers = #tpu.dot_dimension_numbers<[1], [0], [0], [1], [0, 0, 1, 1], [], []>} : vector<4x896xbf16>, vector<896x64xbf16>, vector<4x64xf32> -> vector<4x64xf32>
    %c0_4 = arith.constant 0 : index
    %c0_5 = arith.constant 0 : index
    %4 = vector.load %arg3[%c0_4, %c0_5] : memref<1x64xf32, #tpu.memory_space<vmem>>, vector<1x64xf32>
    %5 = vector.broadcast %4 : vector<1x64xf32> to vector<4x64xf32>
    %6 = arith.addf %3, %5 : vector<4x64xf32>
    %cst_6 = arith.constant dense<0.000000e+00> : vector<4xf32>
    %7 = vector.multi_reduction <add>, %6, %cst_6 [1] : vector<4x64xf32> to vector<4xf32>
    %8 = vector.shape_cast %7 : vector<4xf32> to vector<4x1xf32>
    %cst_7 = arith.constant dense<0.000000e+00> : vector<1xf32>
    %9 = vector.multi_reduction <add>, %8, %cst_7 [0] : vector<4x1xf32> to vector<1xf32>
    %10 = vector.shape_cast %9 : vector<1xf32> to vector<1x1xf32>
    %cst_8 = arith.constant 3.906250e-03 : f32
    %11 = vector.broadcast %cst_8 : f32 to vector<1x1xf32>
    %12 = arith.mulf %10, %11 : vector<1x1xf32>
    %13 = vector.broadcast %12 : vector<1x1xf32> to vector<4x64xf32>
    %14 = arith.subf %6, %13 : vector<4x64xf32>
    %15 = arith.mulf %14, %14 : vector<4x64xf32>
    %cst_9 = arith.constant dense<0.000000e+00> : vector<4xf32>
    %16 = vector.multi_reduction <add>, %15, %cst_9 [1] : vector<4x64xf32> to vector<4xf32>
    %17 = vector.shape_cast %16 : vector<4xf32> to vector<4x1xf32>
    %cst_10 = arith.constant dense<0.000000e+00> : vector<1xf32>
    %18 = vector.multi_reduction <add>, %17, %cst_10 [0] : vector<4x1xf32> to vector<1xf32>
    %19 = vector.shape_cast %18 : vector<1xf32> to vector<1x1xf32>
    %cst_11 = arith.constant 3.906250e-03 : f32
    %20 = vector.broadcast %cst_11 : f32 to vector<1x1xf32>
    %21 = arith.mulf %19, %20 : vector<1x1xf32>
    %cst_12 = arith.constant 9.99999974E-6 : f32
    %22 = vector.broadcast %cst_12 : f32 to vector<1x1xf32>
    %23 = arith.addf %21, %22 : vector<1x1xf32>
    %24 = math.rsqrt %23 : vector<1x1xf32>
    %25 = vector.broadcast %24 : vector<1x1xf32> to vector<4x64xf32>
    %26 = arith.mulf %14, %25 : vector<4x64xf32>
    %c0_13 = arith.constant 0 : index
    %c0_14 = arith.constant 0 : index
    %27 = vector.load %arg4[%c0_13, %c0_14] : memref<4x64xf32, #tpu.memory_space<vmem>>, vector<4x64xf32>
    %28 = arith.mulf %26, %27 : vector<4x64xf32>
    %c0_15 = arith.constant 0 : index
    %c0_16 = arith.constant 0 : index
    %29 = vector.load %arg5[%c0_15, %c0_16] : memref<4x64xf32, #tpu.memory_space<vmem>>, vector<4x64xf32>
    %30 = arith.addf %28, %29 : vector<4x64xf32>
    %cst_17 = arith.constant 0.000000e+00 : f32
    %31 = vector.broadcast %cst_17 : f32 to vector<4x64xf32>
    %32 = arith.maximumf %30, %31 : vector<4x64xf32>
    %c0_18 = arith.constant 0 : index
    %c0_19 = arith.constant 0 : index
    %c0_20 = arith.constant 0 : index
    %33 = vector.load %arg6[%c0_18, %c0_19, %c0_20] : memref<1x4x64xf32, #tpu.memory_space<vmem>>, vector<1x4x64xf32>
    %34 = vector.shape_cast %33 : vector<1x4x64xf32> to vector<4x64xf32>
    %35 = vector.shape_cast %32 : vector<4x64xf32> to vector<1x4x64xf32>
    tpu.vector_store %arg6[%c0_18, %c0_19, %c0_20], %35 {strides = array<i32>} : memref<1x4x64xf32, #tpu.memory_space<vmem>>, vector<1x4x64xf32>,
    return
  }
  func.func @transform_0(%arg0: i32) -> (i32, i32, i32) {
    %c0_i32 = arith.constant 0 : i32
    %c0_i32_0 = arith.constant 0 : i32
    %c0_i32_1 = arith.constant 0 : i32
    return %arg0, %c0_i32, %c0_i32_0 : i32, i32, i32
  }
  func.func @transform_1(%arg0: i32) -> (i32, i32) {
    %c0_i32 = arith.constant 0 : i32
    %c0_i32_0 = arith.constant 0 : i32
    %c0_i32_1 = arith.constant 0 : i32
    return %c0_i32, %c0_i32_0 : i32, i32
  }
  func.func @transform_2(%arg0: i32) -> (i32, i32) {
    %c0_i32 = arith.constant 0 : i32
    %c0_i32_0 = arith.constant 0 : i32
    %c0_i32_1 = arith.constant 0 : i32
    return %c0_i32, %c0_i32_0 : i32, i32
  }
  func.func @transform_3(%arg0: i32) -> (i32, i32) {
    %c0_i32 = arith.constant 0 : i32
    %c0_i32_0 = arith.constant 0 : i32
    %c0_i32_1 = arith.constant 0 : i32
    return %c0_i32, %c0_i32_0 : i32, i32
  }
  func.func @transform_4(%arg0: i32) -> (i32, i32) {
    %c0_i32 = arith.constant 0 : i32
    %c0_i32_0 = arith.constant 0 : i32
    %c0_i32_1 = arith.constant 0 : i32
    return %c0_i32, %c0_i32_0 : i32, i32
  }
  func.func @transform_5(%arg0: i32) -> (i32, i32, i32) {
    %c0_i32 = arith.constant 0 : i32
    %c0_i32_0 = arith.constant 0 : i32
    %c0_i32_1 = arith.constant 0 : i32
    return %arg0, %c0_i32, %c0_i32_0 : i32, i32, i32
  }
}

module attributes {stable_mosaic.version = 11 : i64} {
  func.func @_fused_conv_ln_relu_kernel(%arg0: i32, %arg1: memref<1x1x640xbf16, #tpu.memory_space<vmem>>, %arg2: memref<640x128xbf16, #tpu.memory_space<vmem>>, %arg3: memref<1x128xf32, #tpu.memory_space<vmem>>, %arg4: memref<1x128xf32, #tpu.memory_space<vmem>>, %arg5: memref<1x128xf32, #tpu.memory_space<vmem>>, %arg6: memref<1x1x128xf32, #tpu.memory_space<vmem>>) attributes {dimension_semantics = [#tpu.dimension_semantics<parallel>], iteration_bounds = array<i64: 2>, scalar_prefetch = 0 : i64, scratch_operands = 0 : i64, tpu.core_type = #tpu.core_type<tc>, window_params = [{transform_indices = @transform_0, window_bounds = array<i64: 1, 1, 640>}, {pipeline_mode = #tpu.pipeline_mode<synchronous>, transform_indices = @transform_1, window_bounds = array<i64: 640, 128>}, {pipeline_mode = #tpu.pipeline_mode<synchronous>, transform_indices = @transform_2, window_bounds = array<i64: 1, 128>}, {pipeline_mode = #tpu.pipeline_mode<synchronous>, transform_indices = @transform_3, window_bounds = array<i64: 1, 128>}, {pipeline_mode = #tpu.pipeline_mode<synchronous>, transform_indices = @transform_4, window_bounds = array<i64: 1, 128>}, {transform_indices = @transform_5, window_bounds = array<i64: 1, 1, 128>}]} {
    %c0 = arith.constant 0 : index
    %c0_0 = arith.constant 0 : index
    %c0_1 = arith.constant 0 : index
    %0 = vector.load %arg1[%c0, %c0_0, %c0_1] : memref<1x1x640xbf16, #tpu.memory_space<vmem>>, vector<1x1x640xbf16>
    %1 = vector.shape_cast %0 : vector<1x1x640xbf16> to vector<1x640xbf16>
    %c0_2 = arith.constant 0 : index
    %c0_3 = arith.constant 0 : index
    %2 = vector.load %arg2[%c0_2, %c0_3] : memref<640x128xbf16, #tpu.memory_space<vmem>>, vector<640x128xbf16>
    %cst = arith.constant dense<0.000000e+00> : vector<1x128xf32>
    %3 = tpu.matmul %1, %2, %cst {dimension_numbers = #tpu.dot_dimension_numbers<[1], [0], [0], [1], [0, 0, 1, 1], [], []>} : vector<1x640xbf16>, vector<640x128xbf16>, vector<1x128xf32> -> vector<1x128xf32>
    %c0_4 = arith.constant 0 : index
    %c0_5 = arith.constant 0 : index
    %4 = vector.load %arg3[%c0_4, %c0_5] : memref<1x128xf32, #tpu.memory_space<vmem>>, vector<1x128xf32>
    %5 = arith.addf %3, %4 : vector<1x128xf32>
    %cst_6 = arith.constant dense<0.000000e+00> : vector<1xf32>
    %6 = vector.multi_reduction <add>, %5, %cst_6 [1] : vector<1x128xf32> to vector<1xf32>
    %7 = vector.shape_cast %6 : vector<1xf32> to vector<1x1xf32>
    %cst_7 = arith.constant dense<0.000000e+00> : vector<1xf32>
    %8 = vector.multi_reduction <add>, %7, %cst_7 [0] : vector<1x1xf32> to vector<1xf32>
    %9 = vector.shape_cast %8 : vector<1xf32> to vector<1x1xf32>
    %cst_8 = arith.constant 7.812500e-03 : f32
    %10 = vector.broadcast %cst_8 : f32 to vector<1x1xf32>
    %11 = arith.mulf %9, %10 : vector<1x1xf32>
    %12 = vector.broadcast %11 : vector<1x1xf32> to vector<1x128xf32>
    %13 = arith.subf %5, %12 : vector<1x128xf32>
    %14 = arith.mulf %13, %13 : vector<1x128xf32>
    %cst_9 = arith.constant dense<0.000000e+00> : vector<1xf32>
    %15 = vector.multi_reduction <add>, %14, %cst_9 [1] : vector<1x128xf32> to vector<1xf32>
    %16 = vector.shape_cast %15 : vector<1xf32> to vector<1x1xf32>
    %cst_10 = arith.constant dense<0.000000e+00> : vector<1xf32>
    %17 = vector.multi_reduction <add>, %16, %cst_10 [0] : vector<1x1xf32> to vector<1xf32>
    %18 = vector.shape_cast %17 : vector<1xf32> to vector<1x1xf32>
    %cst_11 = arith.constant 7.812500e-03 : f32
    %19 = vector.broadcast %cst_11 : f32 to vector<1x1xf32>
    %20 = arith.mulf %18, %19 : vector<1x1xf32>
    %cst_12 = arith.constant 9.99999974E-6 : f32
    %21 = vector.broadcast %cst_12 : f32 to vector<1x1xf32>
    %22 = arith.addf %20, %21 : vector<1x1xf32>
    %23 = math.rsqrt %22 : vector<1x1xf32>
    %24 = vector.broadcast %23 : vector<1x1xf32> to vector<1x128xf32>
    %25 = arith.mulf %13, %24 : vector<1x128xf32>
    %c0_13 = arith.constant 0 : index
    %c0_14 = arith.constant 0 : index
    %26 = vector.load %arg4[%c0_13, %c0_14] : memref<1x128xf32, #tpu.memory_space<vmem>>, vector<1x128xf32>
    %27 = arith.mulf %25, %26 : vector<1x128xf32>
    %c0_15 = arith.constant 0 : index
    %c0_16 = arith.constant 0 : index
    %28 = vector.load %arg5[%c0_15, %c0_16] : memref<1x128xf32, #tpu.memory_space<vmem>>, vector<1x128xf32>
    %29 = arith.addf %27, %28 : vector<1x128xf32>
    %cst_17 = arith.constant 0.000000e+00 : f32
    %30 = vector.broadcast %cst_17 : f32 to vector<1x128xf32>
    %31 = arith.maximumf %29, %30 : vector<1x128xf32>
    %c0_18 = arith.constant 0 : index
    %c0_19 = arith.constant 0 : index
    %c0_20 = arith.constant 0 : index
    %32 = vector.load %arg6[%c0_18, %c0_19, %c0_20] : memref<1x1x128xf32, #tpu.memory_space<vmem>>, vector<1x1x128xf32>
    %33 = vector.shape_cast %32 : vector<1x1x128xf32> to vector<1x128xf32>
    %34 = vector.shape_cast %31 : vector<1x128xf32> to vector<1x1x128xf32>
    tpu.vector_store %arg6[%c0_18, %c0_19, %c0_20], %34 {strides = array<i32>} : memref<1x1x128xf32, #tpu.memory_space<vmem>>, vector<1x1x128xf32>,
    return
  }
  func.func @transform_0(%arg0: i32) -> (i32, i32, i32) {
    %c0_i32 = arith.constant 0 : i32
    %c0_i32_0 = arith.constant 0 : i32
    %c0_i32_1 = arith.constant 0 : i32
    return %arg0, %c0_i32, %c0_i32_0 : i32, i32, i32
  }
  func.func @transform_1(%arg0: i32) -> (i32, i32) {
    %c0_i32 = arith.constant 0 : i32
    %c0_i32_0 = arith.constant 0 : i32
    %c0_i32_1 = arith.constant 0 : i32
    return %c0_i32, %c0_i32_0 : i32, i32
  }
  func.func @transform_2(%arg0: i32) -> (i32, i32) {
    %c0_i32 = arith.constant 0 : i32
    %c0_i32_0 = arith.constant 0 : i32
    %c0_i32_1 = arith.constant 0 : i32
    return %c0_i32, %c0_i32_0 : i32, i32
  }
  func.func @transform_3(%arg0: i32) -> (i32, i32) {
    %c0_i32 = arith.constant 0 : i32
    %c0_i32_0 = arith.constant 0 : i32
    %c0_i32_1 = arith.constant 0 : i32
    return %c0_i32, %c0_i32_0 : i32, i32
  }
  func.func @transform_4(%arg0: i32) -> (i32, i32) {
    %c0_i32 = arith.constant 0 : i32
    %c0_i32_0 = arith.constant 0 : i32
    %c0_i32_1 = arith.constant 0 : i32
    return %c0_i32, %c0_i32_0 : i32, i32
  }
  func.func @transform_5(%arg0: i32) -> (i32, i32, i32) {
    %c0_i32 = arith.constant 0 : i32
    %c0_i32_0 = arith.constant 0 : i32
    %c0_i32_1 = arith.constant 0 : i32
    return %arg0, %c0_i32, %c0_i32_0 : i32, i32, i32
  }
}

</mosaic_0001>

<bundles_post_ra>
// kernel: _lambda_.5
= control target key start
LH: loop header
LB: loop body
LE: loop exit
PB: predicated region body
PF: predicated region fallthrough
CT: control target
= control target key end

     0   :  { %s1668_s18 = smov 0   ;;  %s2543_s0 = inlined_call_operand.vmem [shape: bf16[2,256,256], index: 0, kind: input, shape index: {}]   ;;  %s2544_s1 = inlined_call_operand.vmem [shape: bf16[256,8], index: 1, kind: input, shape index: {}]   ;;  %s2545_s2 = inlined_call_operand.vmem [shape: f32[1,8], index: 2, kind: input, shape index: {}]   ;;  %s2546_s3 = inlined_call_operand.vmem [shape: f32[256,8], index: 3, kind: input, shape index: {}]   ;;  %s2547_s4 = inlined_call_operand.vmem [shape: f32[256,8], index: 4, kind: input, shape index: {}]   ;;  %s2548_s5 = inlined_call_operand.vmem [shape: f32[2,256,8], index: 5, kind: output, shape index: {}]  }
   0x1 LB: > { %s1350_s19 = sadd.s32 4294967295, %s1636_s18   ;;  %p1354_p0 = scmp.ge.s32.totalorder %s1636_s18, 1  ;;  %s1636_s18 = sphi %s1668_s18, %s15_s18  }
   0x2   : > { %p187_p1 = scmp.lt.s32.totalorder %s1636_s18, 3 }
   0x4   : > { %p188_p2 = pnand %p1354_p0, %p187_p1 }
   0x5   : > { %p215_p3 = scmp.lt.s32.totalorder (!%p188_p2), %s1350_s19, 1 }
   0x6   : > { %191 = sbr.rel (%p188_p2) target bundleno = 743 (0x2e7), region = 40 }
   0xb   : > { %v1594_v0 = vld [vmem:[%s2544_s1 + $0x38] sm:$0xff]  ;;  %v1593_v2 = vld [vmem:[%s2544_s1 + $0x30] sm:$0xff]  ;;  %v1592_v4 = vld [vmem:[%s2544_s1 + $0x28] sm:$0xff]  ;;  %s2550_s19 = smov (!%p215_p3, %s1350_s19), 1  ;;  %vm727_vm0 = vcmask 64512  }
   0xc   : > { %v1602_v1 = vld [vmem:[%s2544_s1 + $0x78] sm:$0xff]  ;;  %549 = vmatpush.bf16.msra.mxu0 %v1594_v0  ;;  %v1601_v3 = vld [vmem:[%s2544_s1 + $0x70] sm:$0xff]  ;;  %1603 = vmatpush.bf16.msra.mxu2 %v1594_v0  ;;  %v1600_v5 = vld [vmem:[%s2544_s1 + $0x68] sm:$0xff]  ;;  %s1553_s21 = sshll.u32 %s2550_s19, 8 }
   0xd   : > { %638 = vmatpush.bf16.msra.mxu1 %v1602_v1  ;;  %1611 = vmatpush.bf16.msra.mxu3 %v1602_v1  ;;  %v1591_v6 = vld [vmem:[%s2544_s1 + $0x20] sm:$0xff]  ;;  %v1590_v8 = vld [vmem:[%s2544_s1 + $0x18] sm:$0xff]  ;;  %v1589_v10 = vld [vmem:[%s2544_s1 + $0x10] sm:$0xff]  ;;  %s1730_s28 = scalar_lea.vmem %s2543_s0, %s1553_s21  ;;  %s2306_s8 = scalar_lea.vmem %s2548_s5, %s1553_s21 }
   0xe   : > { %v1599_v7 = vld [vmem:[%s2544_s1 + $0x60] sm:$0xff]  ;;  %v1598_v9 = vld [vmem:[%s2544_s1 + $0x58] sm:$0xff]  ;;  %v1597_v11 = vld [vmem:[%s2544_s1 + $0x50] sm:$0xff] }
   0xf   : > { %v1588_v12 = vld [vmem:[%s2544_s1 + $0x8] sm:$0xff]  ;;  %v1587_v14 = vld [vmem:[%s2544_s1] sm:$0xff]  ;;  %v1369_v28 = vld [vmem:[%s1730_s28 + $0x10] sm:$0xf] }
  0x10   : > { %550 = vmatpush.bf16.msra.mxu0 %v1593_v2  ;;  %1604 = vmatpush.bf16.msra.mxu2 %v1593_v2  ;;  %v1596_v13 = vld [vmem:[%s2544_s1 + $0x48] sm:$0xff]  ;;  %v1595_v15 = vld [vmem:[%s2544_s1 + $0x40] sm:$0xff]  ;;  %v1558_v29 = vld [vmem:[%s1730_s28 + $0x14] sm:$0xf0] }
  0x11   : > { %639 = vmatpush.bf16.msra.mxu1 %v1601_v3  ;;  %1612 = vmatpush.bf16.msra.mxu3 %v1601_v3  ;;  %v1361_v16 = vld [vmem:[%s1730_s28] sm:$0xf]  ;;  %v1556_v17 = vld [vmem:[%s1730_s28 + $0x4] sm:$0xf0]  ;;  %v1555_v18 = vld [vmem:[%s1730_s28 + $0x4] sm:$0xf]  ;;  %v1370_v36 = vor.u32 %v1558_v29, %v1369_v28 }
  0x12   : > { %v1363_v19 = vld [vmem:[%s1730_s28 + $0x8] sm:$0xf0]  ;;  %v1425_v20 = vld [vmem:[%s1730_s28 + $0x80] sm:$0xf]  ;;  %v1572_v21 = vld [vmem:[%s1730_s28 + $0x84] sm:$0xf0]  ;;  %v1362_v24 = vor.u32 %v1556_v17, %v1361_v16 }
  0x13   : > { %v1571_v22 = vld [vmem:[%s1730_s28 + $0x84] sm:$0xf]  ;;  %v1427_v23 = vld [vmem:[%s1730_s28 + $0x88] sm:$0xf0]  ;;  %v1366_v25 = vor.u32 %v1555_v18, %v1363_v19  ;;  %v1426_v26 = vor.u32 %v1572_v21, %v1425_v20  ;;  %v1557_v30 = vld [vmem:[%s1730_s28 + $0x14] sm:$0xf] }
  0x14   : > { %551 = vmatpush.bf16.msra.mxu0 %v1592_v4  ;;  %1605 = vmatpush.bf16.msra.mxu2 %v1592_v4  ;;  %v1430_v27 = vor.u32 %v1571_v22, %v1427_v23  ;;  %v1371_v31 = vld [vmem:[%s1730_s28 + $0x18] sm:$0xf0]  ;;  %v1433_v32 = vld [vmem:[%s1730_s28 + $0x90] sm:$0xf]  ;;  %v1574_v33 = vld [vmem:[%s1730_s28 + $0x94] sm:$0xf0] }
  0x15   : > { %640 = vmatpush.bf16.msra.mxu1 %v1600_v5  ;;  %1613 = vmatpush.bf16.msra.mxu3 %v1600_v5  ;;  %v1573_v34 = vld [vmem:[%s1730_s28 + $0x94] sm:$0xf]  ;;  %v1435_v35 = vld [vmem:[%s1730_s28 + $0x98] sm:$0xf0]  ;;  %v1374_v37 = vor.u32 %v1557_v30, %v1371_v31  ;;  %v1434_v38 = vor.u32 %v1574_v33, %v1433_v32  ;;  %v1377_v40 = vld [vmem:[%s1730_s28 + $0x20] sm:$0xf] }
  0x16   : > { %v1438_v39 = vor.u32 %v1573_v34, %v1435_v35  ;;  %v1560_v41 = vld [vmem:[%s1730_s28 + $0x24] sm:$0xf0]  ;;  %v1559_v42 = vld [vmem:[%s1730_s28 + $0x24] sm:$0xf]  ;;  %v1379_v43 = vld [vmem:[%s1730_s28 + $0x28] sm:$0xf0] }
  0x17   : > { %v1441_v44 = vld [vmem:[%s1730_s28 + $0xa0] sm:$0xf]  ;;  %v1576_v45 = vld [vmem:[%s1730_s28 + $0xa4] sm:$0xf0]  ;;  %v1575_v46 = vld [vmem:[%s1730_s28 + $0xa4] sm:$0xf]  ;;  %v1378_v48 = vor.u32 %v1560_v41, %v1377_v40  ;;  %v1382_v49 = vor.u32 %v1559_v42, %v1379_v43 }
  0x18   : > { %552 = vmatpush.bf16.msra.mxu0 %v1591_v6  ;;  %1606 = vmatpush.bf16.msra.mxu2 %v1591_v6  ;;  %v1443_v47 = vld [vmem:[%s1730_s28 + $0xa8] sm:$0xf0]  ;;  %v1442_v50 = vor.u32 %v1576_v45, %v1441_v44  ;;  %v1385_v52 = vld [vmem:[%s1730_s28 + $0x30] sm:$0xf]  ;;  %v1562_v53 = vld [vmem:[%s1730_s28 + $0x34] sm:$0xf0] }
  0x19   : > { %641 = vmatpush.bf16.msra.mxu1 %v1599_v7  ;;  %1614 = vmatpush.bf16.msra.mxu3 %v1599_v7  ;;  %v1446_v51 = vor.u32 %v1575_v46, %v1443_v47  ;;  %v1561_v54 = vld [vmem:[%s1730_s28 + $0x34] sm:$0xf]  ;;  %v1387_v55 = vld [vmem:[%s1730_s28 + $0x38] sm:$0xf0]  ;;  %v1449_v56 = vld [vmem:[%s1730_s28 + $0xb0] sm:$0xf]  ;;  %v1386_v60 = vor.u32 %v1562_v53, %v1385_v52 }
  0x1a   : > { %v1578_v57 = vld [vmem:[%s1730_s28 + $0xb4] sm:$0xf0]  ;;  %v1577_v58 = vld [vmem:[%s1730_s28 + $0xb4] sm:$0xf]  ;;  %v1451_v59 = vld [vmem:[%s1730_s28 + $0xb8] sm:$0xf0]  ;;  %v1390_v61 = vor.u32 %v1561_v54, %v1387_v55 }
  0x1b   : > { %v1450_v62 = vor.u32 %v1578_v57, %v1449_v56  ;;  %v1454_v63 = vor.u32 %v1577_v58, %v1451_v59  ;;  %v1393_v0 = vld [vmem:[%s1730_s28 + $0x40] sm:$0xf]  ;;  %v1564_v1 = vld [vmem:[%s1730_s28 + $0x44] sm:$0xf0]  ;;  %v1563_v2 = vld [vmem:[%s1730_s28 + $0x44] sm:$0xf] }
  0x1c   : > { %553 = vmatpush.bf16.msra.mxu0 %v1590_v8  ;;  %1607 = vmatpush.bf16.msra.mxu2 %v1590_v8  ;;  %v1395_v3 = vld [vmem:[%s1730_s28 + $0x48] sm:$0xf0]  ;;  %v1457_v4 = vld [vmem:[%s1730_s28 + $0xc0] sm:$0xf]  ;;  %v1580_v5 = vld [vmem:[%s1730_s28 + $0xc4] sm:$0xf0]  ;;  %v1394_v8 = vor.u32 %v1564_v1, %v1393_v0 }
  0x1d   : > { %642 = vmatpush.bf16.msra.mxu1 %v1598_v9  ;;  %1615 = vmatpush.bf16.msra.mxu3 %v1598_v9  ;;  %v1579_v6 = vld [vmem:[%s1730_s28 + $0xc4] sm:$0xf]  ;;  %v1459_v7 = vld [vmem:[%s1730_s28 + $0xc8] sm:$0xf0]  ;;  %v1398_v9 = vor.u32 %v1563_v2, %v1395_v3  ;;  %v1465_v16 = vld [vmem:[%s1730_s28 + $0xd0] sm:$0xf] }
  0x1e   : > { %v1582_v17 = vld [vmem:[%s1730_s28 + $0xd4] sm:$0xf0]  ;;  %v1581_v18 = vld [vmem:[%s1730_s28 + $0xd4] sm:$0xf]  ;;  %v1467_v19 = vld [vmem:[%s1730_s28 + $0xd8] sm:$0xf0] }
  0x1f   : > { %v1466_v22 = vor.u32 %v1582_v17, %v1465_v16  ;;  %v1470_v23 = vor.u32 %v1581_v18, %v1467_v19  ;;  %v1473_v28 = vld [vmem:[%s1730_s28 + $0xe0] sm:$0xf]  ;;  %v1584_v29 = vld [vmem:[%s1730_s28 + $0xe4] sm:$0xf0]  ;;  %v1583_v30 = vld [vmem:[%s1730_s28 + $0xe4] sm:$0xf] }
  0x20   : > { %554 = vmatpush.bf16.msra.mxu0 %v1589_v10  ;;  %1608 = vmatpush.bf16.msra.mxu2 %v1589_v10  ;;  %v1458_v10 = vor.u32 %v1580_v5, %v1457_v4  ;;  %v1475_v31 = vld [vmem:[%s1730_s28 + $0xe8] sm:$0xf0]  ;;  %v1474_v34 = vor.u32 %v1584_v29, %v1473_v28  ;;  %v1481_v40 = vld [vmem:[%s1730_s28 + $0xf0] sm:$0xf]  ;;  %v1586_v41 = vld [vmem:[%s1730_s28 + $0xf4] sm:$0xf0] }
  0x21   : > { %643 = vmatpush.bf16.msra.mxu1 %v1597_v11  ;;  %1616 = vmatpush.bf16.msra.mxu3 %v1597_v11  ;;  %v1462_v11 = vor.u32 %v1579_v6, %v1459_v7  ;;  %v1478_v35 = vor.u32 %v1583_v30, %v1475_v31  ;;  %v1585_v42 = vld [vmem:[%s1730_s28 + $0xf4] sm:$0xf]  ;;  %v1483_v43 = vld [vmem:[%s1730_s28 + $0xf8] sm:$0xf0]  ;;  %v1482_v46 = vor.u32 %v1586_v41, %v1481_v40 }
  0x22   : > { %v1486_v47 = vor.u32 %v1585_v42, %v1483_v43 }
  0x24   : > { %555 = vmatpush.bf16.msra.mxu0 %v1588_v12  ;;  %1609 = vmatpush.bf16.msra.mxu2 %v1588_v12  ;;  %v1401_v12 = vld [vmem:[%s1730_s28 + $0x50] sm:$0xf] }
  0x25   : > { %644 = vmatpush.bf16.msra.mxu1 %v1596_v13  ;;  %1617 = vmatpush.bf16.msra.mxu3 %v1596_v13  ;;  %v1566_v13 = vld [vmem:[%s1730_s28 + $0x54] sm:$0xf0] }
  0x26   : > { %v1402_v20 = vor.u32 %v1566_v13, %v1401_v12 }
  0x28   : > { %556 = vmatpush.bf16.msra.mxu0 %v1587_v14  ;;  %1610 = vmatpush.bf16.msra.mxu2 %v1587_v14  ;;  %v1565_v14 = vld [vmem:[%s1730_s28 + $0x54] sm:$0xf] }
  0x29   : > { %645 = vmatpush.bf16.msra.mxu1 %v1595_v15  ;;  %1618 = vmatpush.bf16.msra.mxu3 %v1595_v15  ;;  %v1403_v15 = vld [vmem:[%s1730_s28 + $0x58] sm:$0xf0] }
  0x2a   : > { %v1406_v21 = vor.u32 %v1565_v14, %v1403_v15 }
  0x2b   : > { %557 = vmatmul.bf16.vlgmr.msra.gmra.mxu0 %v1362_v24  ;;  %597 = vmatmul.bf16.vlgmr.msra.gmra.mxu2 %v1426_v26  ;;  %v1409_v24 = vld [vmem:[%s1730_s28 + $0x60] sm:$0xf]  ;;  %v1567_v26 = vld [vmem:[%s1730_s28 + $0x64] sm:$0xf] }
  0x2c   : > { %646 = vmatmul.bf16.vlgmr.msra.gmra.mxu1 %v1366_v25  ;;  %686 = vmatmul.bf16.vlgmr.msra.gmra.mxu3 %v1430_v27  ;;  %v1568_v25 = vld [vmem:[%s1730_s28 + $0x64] sm:$0xf0]  ;;  %v1411_v27 = vld [vmem:[%s1730_s28 + $0x68] sm:$0xf0] }
  0x2d   : > { %v1410_v32 = vor.u32 %v1568_v25, %v1409_v24  ;;  %v1414_v33 = vor.u32 %v1567_v26, %v1411_v27 }
  0x3b   : > { %562 = vmatmul.bf16.gmra.mxu0 %v1370_v36  ;;  %602 = vmatmul.bf16.gmra.mxu2 %v1434_v38  ;;  %v1417_v36 = vld [vmem:[%s1730_s28 + $0x70] sm:$0xf]  ;;  %v1569_v38 = vld [vmem:[%s1730_s28 + $0x74] sm:$0xf] }
  0x3c   : > { %651 = vmatmul.bf16.gmra.mxu1 %v1374_v37  ;;  %691 = vmatmul.bf16.gmra.mxu3 %v1438_v39  ;;  %v1570_v37 = vld [vmem:[%s1730_s28 + $0x74] sm:$0xf0]  ;;  %v1419_v39 = vld [vmem:[%s1730_s28 + $0x78] sm:$0xf0] }
  0x3d   : > { %v1418_v44 = vor.u32 %v1570_v37, %v1417_v36  ;;  %v1422_v45 = vor.u32 %v1569_v38, %v1419_v39 }
  0x4b   : > { %567 = vmatmul.bf16.gmra.mxu0 %v1378_v48  ;;  %607 = vmatmul.bf16.gmra.mxu2 %v1442_v50  ;;  %v1805_v48 = vld [vmem:[%s2545_s2] ss:$0 sm:$0xff] }
  0x4c   : > { %656 = vmatmul.bf16.gmra.mxu1 %v1382_v49  ;;  %696 = vmatmul.bf16.gmra.mxu3 %v1446_v51 }
  0x5b   : > { %572 = vmatmul.bf16.gmra.mxu0 %v1386_v60  ;;  %612 = vmatmul.bf16.gmra.mxu2 %v1450_v62 }
  0x5c   : > { %661 = vmatmul.bf16.gmra.mxu1 %v1390_v61  ;;  %701 = vmatmul.bf16.gmra.mxu3 %v1454_v63 }
  0x6b   : > { %577 = vmatmul.bf16.gmra.mxu0 %v1394_v8  ;;  %617 = vmatmul.bf16.gmra.mxu2 %v1458_v10 }
  0x6c   : > { %666 = vmatmul.bf16.gmra.mxu1 %v1398_v9  ;;  %706 = vmatmul.bf16.gmra.mxu3 %v1462_v11 }
  0x7b   : > { %582 = vmatmul.bf16.gmra.mxu0 %v1402_v20  ;;  %622 = vmatmul.bf16.gmra.mxu2 %v1466_v22 }
  0x7c   : > { %671 = vmatmul.bf16.gmra.mxu1 %v1406_v21  ;;  %711 = vmatmul.bf16.gmra.mxu3 %v1470_v23 }
  0x8b   : > { %587 = vmatmul.bf16.gmra.mxu0 %v1410_v32  ;;  %627 = vmatmul.bf16.gmra.mxu2 %v1474_v34 }
  0x8c   : > { %676 = vmatmul.bf16.gmra.mxu1 %v1414_v33  ;;  %716 = vmatmul.bf16.gmra.mxu3 %v1478_v35 }
  0x9b   : > { %592 = vmatmul.bf16.gmra.mxu0 %v1418_v44  ;;  %632 = vmatmul.bf16.gmra.mxu2 %v1482_v46 }
  0x9c   : > { %681 = vmatmul.bf16.gmra.mxu1 %v1422_v45  ;;  %721 = vmatmul.bf16.gmra.mxu3 %v1486_v47 }
  0xa8   : > { %v558_v49 = vpop.f32.mrf.mxu0 }
  0xa9   : > { %v647_v50 = vpop.f32.mrf.mxu1  ;;  %v559_v51 = vadd.f32 %v1805_v48, %v558_v49 }
  0xab   : > { %v1808_v52 = vadd.f32 %v647_v50, %v559_v51 }
  0xad   : > { %v728_v53 = vsel %vm727_vm0, %v1808_v52, 0.0 }
  0xae   : > { %729 = vadd.xlane.f32.xlu0 %v728_v53  ;;  %v598_v54 = vpop.f32.mrf.mxu2 }
  0xaf   : > { %v687_v55 = vpop.f32.mrf.mxu3  ;;  %v599_v57 = vadd.f32 %v1805_v48, %v598_v54 }
  0xb0   : > { %v560_v56 = vpop.f32.mrf.mxu0 }
  0xb1   : > { %v649_v58 = vpop.f32.mrf.mxu1  ;;  %v561_v59 = vadd.f32 %v1805_v48, %v560_v56  ;;  %v1814_v60 = vadd.f32 %v687_v55, %v599_v57 }
  0xb3   : > { %v1816_v61 = vadd.f32 %v649_v58, %v561_v59  ;;  %v776_v62 = vsel %vm727_vm0, %v1814_v60, 0.0 }
  0xb4   : > { %777 = vadd.xlane.f32.xlu1 %v776_v62 }
  0xb5   : > { %v731_v63 = vsel %vm727_vm0, %v1816_v61, 0.0 }
  0xb6   : > { %732 = vadd.xlane.f32.xlu0 %v731_v63  ;;  %v600_v0 = vpop.f32.mrf.mxu2 }
  0xb7   : > { %v689_v1 = vpop.f32.mrf.mxu3  ;;  %v601_v4 = vadd.f32 %v1805_v48, %v600_v0 }
  0xb8   : > { %v563_v2 = vpop.f32.mrf.mxu0 }
  0xb9   : > { %v652_v3 = vpop.f32.mrf.mxu1  ;;  %v564_v5 = vadd.f32 %v1805_v48, %v563_v2  ;;  %v1824_v6 = vadd.f32 %v689_v1, %v601_v4 }
  0xbb   : > { %v1826_v7 = vadd.f32 %v652_v3, %v564_v5  ;;  %v779_v8 = vsel %vm727_vm0, %v1824_v6, 0.0 }
  0xbc   : > { %780 = vadd.xlane.f32.xlu2 %v779_v8 }
  0xbd   : > { %v734_v9 = vsel %vm727_vm0, %v1826_v7, 0.0 }
  0xbe   : > { %735 = vadd.xlane.f32.xlu1 %v734_v9  ;;  %v603_v10 = vpop.f32.mrf.mxu2 }
  0xbf   : > { %v692_v11 = vpop.f32.mrf.mxu3  ;;  %v604_v14 = vadd.f32 %v1805_v48, %v603_v10 }
  0xc0   : > { %v565_v12 = vpop.f32.mrf.mxu0 }
  0xc1   : > { %v654_v13 = vpop.f32.mrf.mxu1  ;;  %v566_v15 = vadd.f32 %v1805_v48, %v565_v12  ;;  %v1834_v16 = vadd.f32 %v692_v11, %v604_v14 }
  0xc3   : > { %v1836_v17 = vadd.f32 %v654_v13, %v566_v15  ;;  %v782_v18 = vsel %vm727_vm0, %v1834_v16, 0.0 }
  0xc4   : > { %783 = vadd.xlane.f32.xlu0 %v782_v18 }
  0xc5   : > { %v737_v19 = vsel %vm727_vm0, %v1836_v17, 0.0 }
  0xc6   : > { %738 = vadd.xlane.f32.xlu1 %v737_v19  ;;  %v605_v20 = vpop.f32.mrf.mxu2 }
  0xc7   : > { %v694_v21 = vpop.f32.mrf.mxu3  ;;  %v606_v24 = vadd.f32 %v1805_v48, %v605_v20 }
  0xc8   : > { %v568_v22 = vpop.f32.mrf.mxu0 }
  0xc9   : > { %v657_v23 = vpop.f32.mrf.mxu1  ;;  %v569_v25 = vadd.f32 %v1805_v48, %v568_v22  ;;  %v1844_v26 = vadd.f32 %v694_v21, %v606_v24 }
  0xcb   : > { %v1846_v27 = vadd.f32 %v657_v23, %v569_v25 }
  0xcd   : > { %v740_v28 = vsel %vm727_vm0, %v1846_v27, 0.0 }
  0xce   : > { %741 = vadd.xlane.f32.xlu2 %v740_v28  ;;  %v608_v29 = vpop.f32.mrf.mxu2 }
  0xcf   : > { %v697_v30 = vpop.f32.mrf.mxu3  ;;  %v609_v33 = vadd.f32 %v1805_v48, %v608_v29 }
  0xd0   : > { %v570_v31 = vpop.f32.mrf.mxu0 }
  0xd1   : > { %v659_v32 = vpop.f32.mrf.mxu1  ;;  %v571_v34 = vadd.f32 %v1805_v48, %v570_v31  ;;  %v1852_v35 = vadd.f32 %v697_v30, %v609_v33 }
  0xd3   : > { %v1854_v36 = vadd.f32 %v659_v32, %v571_v34 }
  0xd5   : > { %v743_v37 = vsel %vm727_vm0, %v1854_v36, 0.0 }
  0xd6   : > { %744 = vadd.xlane.f32.xlu2 %v743_v37  ;;  %v610_v38 = vpop.f32.mrf.mxu2 }
  0xd7   : > { %v699_v39 = vpop.f32.mrf.mxu3  ;;  %v611_v42 = vadd.f32 %v1805_v48, %v610_v38 }
  0xd8   : > { %v573_v40 = vpop.f32.mrf.mxu0 }
  0xd9   : > { %v662_v41 = vpop.f32.mrf.mxu1  ;;  %v574_v43 = vadd.f32 %v1805_v48, %v573_v40  ;;  %v1860_v44 = vadd.f32 %v699_v39, %v611_v42 }
  0xdb   : > { %v1862_v45 = vadd.f32 %v662_v41, %v574_v43 }
  0xdd   : > { %v746_v46 = vsel %vm727_vm0, %v1862_v45, 0.0 }
  0xde   : > { %747 = vadd.xlane.f32.xlu0 %v746_v46  ;;  %v613_v47 = vpop.f32.mrf.mxu2 }
  0xdf   : > { %v1866_v49 = vpop.f32.mrf.mxu3 }
  0xe0   : > { %v575_v50 = vpop.f32.mrf.mxu0 }
  0xe1   : > { %v664_v51 = vpop.f32.mrf.mxu1  ;;  %v576_v53 = vadd.f32 %v1805_v48, %v575_v50 }
  0xe3   : > { %v1869_v54 = vadd.f32 %v664_v51, %v576_v53 }
  0xe5   : > { %v749_v55 = vsel %vm727_vm0, %v1869_v54, 0.0 }
  0xe6   : > { %750 = vadd.xlane.f32.xlu1 %v749_v55  ;;  %v1873_v56 = vpop.f32.mrf.mxu2 }
  0xe7   : > { %v1875_v57 = vpop.f32.mrf.mxu3 }
  0xe8   : > { %v578_v58 = vpop.f32.mrf.mxu0 }
  0xe9   : > { %v667_v59 = vpop.f32.mrf.mxu1  ;;  %v579_v62 = vadd.f32 %v1805_v48, %v578_v58  ;;  %v614_v58 = vadd.f32 %v1805_v48, %v613_v47  ;;  %v788_v47 = vsel %vm727_vm0, %v1852_v35, 0.0 }
  0xeb   : > { %v1878_v63 = vadd.f32 %v667_v59, %v579_v62  ;;  %v785_v62 = vsel %vm727_vm0, %v1844_v26, 0.0 }
  0xed   : > { %v752_v0 = vsel %vm727_vm0, %v1878_v63, 0.0 }
  0xee   : > { %753 = vadd.xlane.f32.xlu2 %v752_v0  ;;  %v1882_v1 = vpop.f32.mrf.mxu2 }
  0xef   : > { %v1884_v2 = vpop.f32.mrf.mxu3 }
  0xf0   : > { %v580_v3 = vpop.f32.mrf.mxu0 }
  0xf1   : > { %v669_v4 = vpop.f32.mrf.mxu1  ;;  %v581_v5 = vadd.f32 %v1805_v48, %v580_v3 }
  0xf3   : > { %v1887_v8 = vadd.f32 %v669_v4, %v581_v5  ;;  %v1922_v4 = vadd.f32 %v1866_v49, %v614_v58 }
  0xf5   : > { %v755_v9 = vsel %vm727_vm0, %v1887_v8, 0.0 }
  0xf6   : > { %756 = vadd.xlane.f32.xlu0 %v755_v9  ;;  %v620_v10 = vpop.f32.mrf.mxu2 }
  0xf7   : > { %v709_v11 = vpop.f32.mrf.mxu3 }
  0xf8   : > { %v583_v12 = vpop.f32.mrf.mxu0 }
  0xf9   : > { %v672_v13 = vpop.f32.mrf.mxu1  ;;  %v584_v14 = vadd.f32 %v1805_v48, %v583_v12 }
  0xfb   : > { %v1892_v15 = vadd.f32 %v672_v13, %v584_v14  ;;  %v616_v13 = vadd.f32 %v1805_v48, %v1873_v56  ;;  %v621_v14 = vadd.f32 %v1805_v48, %v620_v10 }
  0xfd   : > { %v758_v18 = vsel %vm727_vm0, %v1892_v15, 0.0 }
  0xfe   : > { %759 = vadd.xlane.f32.xlu1 %v758_v18  ;;  %v623_v19 = vpop.f32.mrf.mxu2  ;;  %v794_v18 = vsel %vm727_vm0, %v1922_v4, 0.0 }
  0xff   : > { %v712_v23 = vpop.f32.mrf.mxu3  ;;  %v624_v56 = vadd.f32 %v1805_v48, %v623_v19 }
 0x100   : > { %v585_v20 = vpop.f32.mrf.mxu0 }
 0x101   : > { %v674_v21 = vpop.f32.mrf.mxu1  ;;  %v586_v22 = vadd.f32 %v1805_v48, %v585_v20 }
 0x103   : > { %v1897_v24 = vadd.f32 %v674_v21, %v586_v22  ;;  %v1937_v21 = vadd.f32 %v1875_v57, %v616_v13  ;;  %v1939_v22 = vadd.f32 %v709_v11, %v621_v14  ;;  %v791_v57 = vsel %vm727_vm0, %v1860_v44, 0.0 }
 0x105   : > { %v761_v25 = vsel %vm727_vm0, %v1897_v24, 0.0 }
 0x106   : > { %762 = vadd.xlane.f32.xlu2 %v761_v25  ;;  %v625_v28 = vpop.f32.mrf.mxu2 }
 0x107   : > { %v1904_v33 = vpop.f32.mrf.mxu3 }
 0x108   : > { %v588_v29 = vpop.f32.mrf.mxu0 }
 0x109   : > { %v677_v30 = vpop.f32.mrf.mxu1  ;;  %v589_v31 = vadd.f32 %v1805_v48, %v588_v29  ;;  %v797_v29 = vsel %vm727_vm0, %v1937_v21, 0.0 }
 0x10b   : > { %v1902_v32 = vadd.f32 %v677_v30, %v589_v31  ;;  %v803_v30 = vsel %vm727_vm0, %v1939_v22, 0.0  ;;  %v619_v31 = vadd.f32 %v1805_v48, %v1882_v1 }
 0x10d   : > { %v764_v34 = vsel %vm727_vm0, %v1902_v32, 0.0 }
 0x10e   : > { %765 = vadd.xlane.f32.xlu0 %v764_v34  ;;  %v628_v40 = vpop.f32.mrf.mxu2  ;;  %v1951_v34 = vadd.f32 %v712_v23, %v624_v56 }
 0x10f   : > { %v717_v43 = vpop.f32.mrf.mxu3  ;;  %v629_v10 = vadd.f32 %v1805_v48, %v628_v40 }
 0x110   : > { %v590_v37 = vpop.f32.mrf.mxu0  ;;  %v806_v1 = vsel %vm727_vm0, %v1951_v34, 0.0 }
 0x111   : > { %v679_v38 = vpop.f32.mrf.mxu1  ;;  %v591_v39 = vadd.f32 %v1805_v48, %v590_v37  ;;  %v1953_v19 = vadd.f32 %v717_v43, %v629_v10  ;;  %v1956_v37 = vadd.f32 %v1884_v2, %v619_v31 }
 0x113   : > { %v1909_v41 = vadd.f32 %v679_v38, %v591_v39  ;;  %v800_v23 = vsel %vm727_vm0, %v1956_v37, 0.0 }
 0x115   : > { %v767_v42 = vsel %vm727_vm0, %v1909_v41, 0.0 }
 0x116   : > { %768 = vadd.xlane.f32.xlu1 %v767_v42  ;;  %v630_v55 = vpop.f32.mrf.mxu2  ;;  %v812_v42 = vsel %vm727_vm0, %v1953_v19, 0.0 }
 0x117   : > { %v719_v3 = vpop.f32.mrf.mxu3  ;;  %v631_v40 = vadd.f32 %v1805_v48, %v630_v55 }
 0x118   : > { %v593_v46 = vpop.f32.mrf.mxu0 }
 0x119   : > { %v682_v50 = vpop.f32.mrf.mxu1  ;;  %v594_v51 = vadd.f32 %v1805_v48, %v593_v46  ;;  %v626_v46 = vadd.f32 %v1805_v48, %v625_v28  ;;  %v1969_v43 = vadd.f32 %v719_v3, %v631_v40 }
 0x11b   : > { %v1914_v53 = vadd.f32 %v682_v50, %v594_v51  ;;  %v1972_v50 = vadd.f32 %v1904_v33, %v626_v46  ;;  %v815_v55 = vsel %vm727_vm0, %v1969_v43, 0.0 }
 0x11d   : > { %v770_v59 = vsel %vm727_vm0, %v1914_v53, 0.0  ;;  %v809_v58 = vsel %vm727_vm0, %v1972_v50, 0.0 }
 0x11e   : > { %771 = vadd.xlane.f32.xlu2 %v770_v59  ;;  %786 = vadd.xlane.f32.xlu1 %v785_v62  ;;  %v633_v20 = vpop.f32.mrf.mxu2 }
 0x11f   : > { %v722_v25 = vpop.f32.mrf.mxu3  ;;  %v634_v28 = vadd.f32 %v1805_v48, %v633_v20 }
 0x120   : > { %v595_v0 = vpop.f32.mrf.mxu0 }
 0x121   : > { %v596_v5 = vadd.f32 %v1805_v48, %v595_v0  ;;  %v684_v9 = vpop.f32.mrf.mxu1  ;;  %v1981_v59 = vadd.f32 %v722_v25, %v634_v28  ;;  %v730_v3 = vpop.xlane.xlu0 %729 }
 0x123   : > { %v1925_v12 = vadd.f32 %v684_v9, %v596_v5  ;;  %v818_v33 = vsel %vm727_vm0, %v1981_v59, 0.0 }
 0x125   : > { %v773_v49 = vsel %vm727_vm0, %v1925_v12, 0.0 }
 0x126   : > { %789 = vadd.xlane.f32.xlu2 %v788_v47  ;;  %795 = vadd.xlane.f32.xlu1 %v794_v18  ;;  %v635_v11 = vpop.f32.mrf.mxu2 }
 0x127   : > { %774 = vadd.xlane.f32.xlu0 %v773_v49  ;;  %v636_v38 = vadd.f32 %v1805_v48, %v635_v11  ;;  %v724_v39 = vpop.f32.mrf.mxu3  ;;  %v778_v62 = vpop.xlane.xlu1 %777 }
 0x129   : > { %v1967_v2 = vadd.f32 %v724_v39, %v636_v38  ;;  %v733_v47 = vpop.xlane.xlu0 %732 }
 0x12a   : > { %v824_v49 = vadd.f32 %v733_v47, %v730_v3 }
 0x12b   : > { %v821_v51 = vsel %vm727_vm0, %v1967_v2, 0.0 }
 0x12e   : > { %798 = vadd.xlane.f32.xlu2 %v797_v29  ;;  %804 = vadd.xlane.f32.xlu1 %v803_v30 }
 0x12f   : > { %792 = vadd.xlane.f32.xlu0 %v791_v57  ;;  %v781_v0 = vpop.xlane.xlu2 %780 }
 0x131   : > { %v736_v5 = vpop.xlane.xlu1 %735 }
 0x132   : > { %v825_v20 = vadd.f32 %v824_v49, %v736_v5 }
 0x136   : > { %807 = vadd.xlane.f32.xlu2 %v806_v1  ;;  %813 = vadd.xlane.f32.xlu1 %v812_v42 }
 0x137   : > { %801 = vadd.xlane.f32.xlu0 %v800_v23  ;;  %v784_v48 = vpop.xlane.xlu0 %783 }
 0x139   : > { %v739_v13 = vpop.xlane.xlu1 %738 }
 0x13a   : > { %v826_v25 = vadd.f32 %v825_v20, %v739_v13 }
 0x13e   : > { %816 = vadd.xlane.f32.xlu2 %v815_v55  ;;  %822 = vadd.xlane.f32.xlu1 %v821_v51 }
 0x13f   : > { %810 = vadd.xlane.f32.xlu0 %v809_v58 }
 0x141   : > { %v742_v9 = vpop.xlane.xlu2 %741 }
 0x142   : > { %v827_v30 = vadd.f32 %v826_v25, %v742_v9 }
 0x147   : > { %819 = vadd.xlane.f32.xlu0 %v818_v33 }
 0x149   : > { %v745_v14 = vpop.xlane.xlu2 %744 }
 0x14a   : > { %v828_v31 = vadd.f32 %v827_v30, %v745_v14 }
 0x151   : > { %v748_v10 = vpop.xlane.xlu0 %747 }
 0x152   : > { %v829_v57 = vadd.f32 %v828_v31, %v748_v10 }
 0x159   : > { %v751_v18 = vpop.xlane.xlu1 %750 }
 0x15a   : > { %v830_v39 = vadd.f32 %v829_v57, %v751_v18 }
 0x161   : > { %v754_v56 = vpop.xlane.xlu2 %753 }
 0x162   : > { %v831_v1 = vadd.f32 %v830_v39, %v754_v56 }
 0x169   : > { %v757_v38 = vpop.xlane.xlu0 %756 }
 0x16a   : > { %v832_v42 = vadd.f32 %v831_v1, %v757_v38 }
 0x171   : > { %v760_v29 = vpop.xlane.xlu1 %759 }
 0x172   : > { %v833_v46 = vadd.f32 %v832_v42, %v760_v29 }
 0x179   : > { %v763_v11 = vpop.xlane.xlu2 %762 }
 0x17a   : > { %v834_v55 = vadd.f32 %v833_v46, %v763_v11 }
 0x181   : > { %v766_v51 = vpop.xlane.xlu0 %765 }
 0x182   : > { %v835_v28 = vadd.f32 %v834_v55, %v766_v51 }
 0x189   : > { %v769_v40 = vpop.xlane.xlu1 %768 }
 0x18a   : > { %v836_v33 = vadd.f32 %v835_v28, %v769_v40 }
 0x191   : > { %v772_v23 = vpop.xlane.xlu2 %771  ;;  %v787_v58 = vpop.xlane.xlu1 %786 }
 0x192   : > { %v837_v3 = vadd.f32 %v836_v33, %v772_v23 }
 0x199   : > { %v790_v5 = vpop.xlane.xlu2 %789  ;;  %v796_v49 = vpop.xlane.xlu1 %795 }
 0x19a   : > { %v775_v47 = vpop.xlane.xlu0 %774 }
 0x19b   : > { %v838_v13 = vadd.f32 %v837_v3, %v775_v47 }
 0x19d   : > { %v839_v9 = vadd.f32 %v838_v13, %v778_v62 }
 0x19f   : > { %v840_v14 = vadd.f32 %v839_v9, %v781_v0 }
 0x1a1   : > { %v841_v20 = vadd.f32 %v840_v14, %v784_v48  ;;  %v799_v25 = vpop.xlane.xlu2 %798  ;;  %v805_v31 = vpop.xlane.xlu1 %804 }
 0x1a2   : > { %v793_v10 = vpop.xlane.xlu0 %792 }
 0x1a3   : > { %v842_v18 = vadd.f32 %v841_v20, %v787_v58 }
 0x1a5   : > { %v843_v56 = vadd.f32 %v842_v18, %v790_v5 }
 0x1a7   : > { %v844_v30 = vadd.f32 %v843_v56, %v793_v10 }
 0x1a9   : > { %v845_v29 = vadd.f32 %v844_v30, %v796_v49  ;;  %v808_v39 = vpop.xlane.xlu2 %807  ;;  %v814_v23 = vpop.xlane.xlu1 %813 }
 0x1aa   : > { %v802_v57 = vpop.xlane.xlu0 %801 }
 0x1ab   : > { %v846_v11 = vadd.f32 %v845_v29, %v799_v25 }
 0x1ad   : > { %v847_v38 = vadd.f32 %v846_v11, %v802_v57 }
 0x1af   : > { %v848_v40 = vadd.f32 %v847_v38, %v805_v31 }
 0x1b1   : > { %v849_v1 = vadd.f32 %v848_v40, %v808_v39  ;;  %v817_v0 = vpop.xlane.xlu2 %816  ;;  %v823_v28 = vpop.xlane.xlu1 %822 }
 0x1b2   : > { %v811_v42 = vpop.xlane.xlu0 %810 }
 0x1b3   : > { %v850_v46 = vadd.f32 %v849_v1, %v811_v42 }
 0x1b5   : > { %v851_v62 = vadd.f32 %v850_v46, %v814_v23 }
 0x1b7   : > { %v852_v51 = vadd.f32 %v851_v62, %v817_v0 }
 0x1ba   : > { %v820_v48 = vpop.xlane.xlu0 %819 }
 0x1bb   : > { %v853_v55 = vadd.f32 %v852_v51, %v820_v48 }
 0x1bd   : > { %v854_v58 = vadd.f32 %v853_v55, %v823_v28 }
 0x1bf   : > { %v855_v33 = vrot.slane %v854_v58, 4 }
 0x1c1   : > { %v856_v3 = vadd.f32 %v855_v33, %v854_v58 }
 0x1c3   : > { %v857_v5 = vrot.slane %v856_v3, 2 }
 0x1c5   : > { %v858_v47 = vadd.f32 %v857_v5, %v856_v3 }
 0x1c7   : > { %v859_v13 = vrot.slane %v858_v47, 1 }
 0x1c9   : > { %v860_v9 = vadd.f32 %v859_v13, %v858_v47 }
 0x1cb   : > { %v1985_v14 = vmul.f32 0.00048828125, %v860_v9 }
 0x1cd   : > { %v1989_v49 = vsub.f32 %v1808_v52, %v1985_v14  ;;  %v1993_v20 = vsub.f32 %v1816_v61, %v1985_v14  ;;  %v1997_v10 = vsub.f32 %v1826_v7, %v1985_v14  ;;  %v2007_v52 = vsub.f32 %v1846_v27, %v1985_v14 }
 0x1ce   : > { %v2011_v61 = vsub.f32 %v1854_v36, %v1985_v14  ;;  %v2018_v31 = vsub.f32 %v1836_v17, %v1985_v14  ;;  %v2028_v11 = vsub.f32 %v1869_v54, %v1985_v14  ;;  %v2032_v17 = vsub.f32 %v1878_v63, %v1985_v14 }
 0x1cf   : > { %v896_v18 = vmul.f32 %v1997_v10, %v1997_v10  ;;  %v895_v25 = vmul.f32 %v1993_v20, %v1993_v20  ;;  %v894_v56 = vmul.f32 %v1989_v49, %v1989_v49  ;;  %v898_v36 = vmul.f32 %v2007_v52, %v2007_v52 }
 0x1d0   : > { %v899_v27 = vmul.f32 %v2011_v61, %v2011_v61  ;;  %v897_v57 = vmul.f32 %v2018_v31, %v2018_v31  ;;  %v2038_v40 = vsub.f32 %v1862_v45, %v1985_v14  ;;  %v902_v54 = vmul.f32 %v2032_v17, %v2032_v17 }
 0x1d1   : > { %v932_v7 = vsel %vm727_vm0, %v896_v18, 0.0  ;;  %v929_v30 = vsel %vm727_vm0, %v895_v25, 0.0  ;;  %v926_v29 = vsel %vm727_vm0, %v894_v56, 0.0  ;;  %v938_v39 = vsel %vm727_vm0, %v898_v36, 0.0 }
 0x1d2   : > { %933 = vadd.xlane.f32.xlu1 %v932_v7  ;;  %930 = vadd.xlane.f32.xlu0 %v929_v30  ;;  %v941_v38 = vsel %vm727_vm0, %v899_v27, 0.0  ;;  %v935_v1 = vsel %vm727_vm0, %v897_v57, 0.0  ;;  %v901_v63 = vmul.f32 %v2028_v11, %v2028_v11  ;;  %v900_v42 = vmul.f32 %v2038_v40, %v2038_v40 }
 0x1d3   : > { %927 = vadd.xlane.f32.xlu2 %v926_v29  ;;  %v2049_v46 = vsub.f32 %v1892_v15, %v1985_v14  ;;  %v2053_v45 = vsub.f32 %v1897_v24, %v1985_v14  ;;  %v950_v23 = vsel %vm727_vm0, %v902_v54, 0.0  ;;  %v2059_v0 = vsub.f32 %v1887_v8, %v1985_v14 }
 0x1d4   : > { %v947_v62 = vsel %vm727_vm0, %v901_v63, 0.0  ;;  %v944_v51 = vsel %vm727_vm0, %v900_v42, 0.0  ;;  %v2070_v55 = vsub.f32 %v1909_v41, %v1985_v14  ;;  %v2074_v8 = vsub.f32 %v1914_v53, %v1985_v14 }
 0x1d5   : > { %v905_v15 = vmul.f32 %v2053_v45, %v2053_v45  ;;  %v904_v24 = vmul.f32 %v2049_v46, %v2049_v46  ;;  %v903_v48 = vmul.f32 %v2059_v0, %v2059_v0  ;;  %v2080_v33 = vsub.f32 %v1902_v32, %v1985_v14 }
 0x1d6   : > { %v908_v41 = vmul.f32 %v2074_v8, %v2074_v8  ;;  %v907_v53 = vmul.f32 %v2070_v55, %v2070_v55  ;;  %v2091_v47 = vsub.f32 %v1814_v60, %v1985_v14  ;;  %v2095_v32 = vsub.f32 %v1824_v6, %v1985_v14 }
 0x1d7   : > { %v959_v28 = vsel %vm727_vm0, %v905_v15, 0.0  ;;  %v956_v58 = vsel %vm727_vm0, %v904_v24, 0.0  ;;  %v953_v3 = vsel %vm727_vm0, %v903_v48, 0.0  ;;  %v906_v5 = vmul.f32 %v2080_v33, %v2080_v33 }
 0x1d8   : > { %v968_v13 = vsel %vm727_vm0, %v908_v41, 0.0  ;;  %v965_v9 = vsel %vm727_vm0, %v907_v53, 0.0  ;;  %v2101_v18 = vsub.f32 %v1925_v12, %v1985_v14  ;;  %v911_v60 = vmul.f32 %v2095_v32, %v2095_v32 }
 0x1d9   : > { %v962_v25 = vsel %vm727_vm0, %v906_v5, 0.0  ;;  %v910_v6 = vmul.f32 %v2091_v47, %v2091_v47  ;;  %v2112_v7 = vsub.f32 %v1844_v26, %v1985_v14  ;;  %v2116_v12 = vsub.f32 %v1852_v35, %v1985_v14 }
 0x1da   : > { %942 = vadd.xlane.f32.xlu1 %v941_v38  ;;  %939 = vadd.xlane.f32.xlu0 %v938_v39  ;;  %v909_v56 = vmul.f32 %v2101_v18, %v2101_v18  ;;  %v977_v30 = vsel %vm727_vm0, %v911_v60, 0.0  ;;  %v2122_v27 = vsub.f32 %v1834_v16, %v1985_v14  ;;  %v2133_v38 = vsub.f32 %v1922_v4, %v1985_v14 }
 0x1db   : > { %936 = vadd.xlane.f32.xlu2 %v935_v1  ;;  %v974_v29 = vsel %vm727_vm0, %v910_v6, 0.0  ;;  %v914_v26 = vmul.f32 %v2116_v12, %v2116_v12  ;;  %v913_v35 = vmul.f32 %v2112_v7, %v2112_v7  ;;  %v2137_v16 = vsub.f32 %v1937_v21, %v1985_v14 }
 0x1dc   : > { %v971_v36 = vsel %vm727_vm0, %v909_v56, 0.0  ;;  %v912_v57 = vmul.f32 %v2122_v27, %v2122_v27  ;;  %v2143_v54 = vsub.f32 %v1860_v44, %v1985_v14  ;;  %v916_v21 = vmul.f32 %v2133_v38, %v2133_v38 }
 0x1dd   : > { %v986_v39 = vsel %vm727_vm0, %v914_v26, 0.0  ;;  %v983_v1 = vsel %vm727_vm0, %v913_v35, 0.0  ;;  %v917_v4 = vmul.f32 %v2137_v16, %v2137_v16  ;;  %v2158_v44 = vsub.f32 %v1951_v34, %v1985_v14 }
 0x1de   : > { %v980_v63 = vsel %vm727_vm0, %v912_v57, 0.0  ;;  %v915_v42 = vmul.f32 %v2143_v54, %v2143_v54  ;;  %v2164_v15 = vsub.f32 %v1956_v37, %v1985_v14  ;;  %v2179_v37 = vsub.f32 %v1969_v43, %v1985_v14 }
 0x1df   : > { %v2185_v41 = vsub.f32 %v1972_v50, %v1985_v14 }
 0x1e0   : > { %v989_v24 = vsel %vm727_vm0, %v915_v42, 0.0  ;;  %v918_v48 = vmul.f32 %v2164_v15, %v2164_v15 }
 0x1e1   : > { %v921_v5 = vmul.f32 %v2185_v41, %v2185_v41 }
 0x1e2   : > { %951 = vadd.xlane.f32.xlu1 %v950_v23  ;;  %948 = vadd.xlane.f32.xlu0 %v947_v62  ;;  %v2154_v23 = vsub.f32 %v1939_v22, %v1985_v14  ;;  %v995_v62 = vsel %vm727_vm0, %v917_v4, 0.0  ;;  %v920_v22 = vmul.f32 %v2158_v44, %v2158_v44  ;;  %v998_v53 = vsel %vm727_vm0, %v918_v48, 0.0 }
 0x1e3   : > { %945 = vadd.xlane.f32.xlu2 %v944_v51  ;;  %v992_v51 = vsel %vm727_vm0, %v916_v21, 0.0  ;;  %v1007_v60 = vsel %vm727_vm0, %v921_v5, 0.0 }
 0x1e4   : > { %v919_v34 = vmul.f32 %v2154_v23, %v2154_v23 }
 0x1ea   : > { %960 = vadd.xlane.f32.xlu1 %v959_v28  ;;  %957 = vadd.xlane.f32.xlu0 %v956_v58  ;;  %v2175_v28 = vsub.f32 %v1953_v19, %v1985_v14  ;;  %v1004_v58 = vsel %vm727_vm0, %v920_v22, 0.0  ;;  %v923_v19 = vmul.f32 %v2179_v37, %v2179_v37 }
 0x1eb   : > { %954 = vadd.xlane.f32.xlu2 %v953_v3  ;;  %v1001_v3 = vsel %vm727_vm0, %v919_v34, 0.0 }
 0x1ec   : > { %v922_v43 = vmul.f32 %v2175_v28, %v2175_v28  ;;  %v1013_v50 = vsel %vm727_vm0, %v923_v19, 0.0 }
 0x1f2   : > { %969 = vadd.xlane.f32.xlu1 %v968_v13  ;;  %966 = vadd.xlane.f32.xlu0 %v965_v9  ;;  %v2196_v13 = vsub.f32 %v1967_v2, %v1985_v14  ;;  %v1010_v9 = vsel %vm727_vm0, %v922_v43, 0.0 }
 0x1f3   : > { %963 = vadd.xlane.f32.xlu2 %v962_v25  ;;  %v2202_v25 = vsub.f32 %v1981_v59, %v1985_v14 }
 0x1f4   : > { %v925_v6 = vmul.f32 %v2196_v13, %v2196_v13 }
 0x1f5   : > { %v924_v2 = vmul.f32 %v2202_v25, %v2202_v25 }
 0x1f6   : > { %v1019_v56 = vsel %vm727_vm0, %v925_v6, 0.0 }
 0x1fa   : > { %978 = vadd.xlane.f32.xlu1 %v977_v30  ;;  %975 = vadd.xlane.f32.xlu0 %v974_v29  ;;  %v1016_v30 = vsel %vm727_vm0, %v924_v2, 0.0 }
 0x1fb   : > { %972 = vadd.xlane.f32.xlu2 %v971_v36 }
 0x202   : > { %987 = vadd.xlane.f32.xlu1 %v986_v39  ;;  %984 = vadd.xlane.f32.xlu0 %v983_v1 }
 0x203   : > { %981 = vadd.xlane.f32.xlu2 %v980_v63 }
 0x20a   : > { %996 = vadd.xlane.f32.xlu1 %v995_v62  ;;  %993 = vadd.xlane.f32.xlu0 %v992_v51 }
 0x20b   : > { %990 = vadd.xlane.f32.xlu2 %v989_v24 }
 0x212   : > { %1005 = vadd.xlane.f32.xlu1 %v1004_v58  ;;  %1002 = vadd.xlane.f32.xlu0 %v1001_v3 }
 0x213   : > { %999 = vadd.xlane.f32.xlu2 %v998_v53 }
 0x21a   : > { %1014 = vadd.xlane.f32.xlu1 %v1013_v50  ;;  %1011 = vadd.xlane.f32.xlu0 %v1010_v9 }
 0x21b   : > { %1008 = vadd.xlane.f32.xlu2 %v1007_v60 }
 0x222   : > { %1020 = vadd.xlane.f32.xlu0 %v1019_v56 }
 0x223   : > { %1017 = vadd.xlane.f32.xlu2 %v1016_v30 }
 0x245   : > { %v934_v29 = vpop.xlane.xlu1 %933  ;;  %v931_v59 = vpop.xlane.xlu0 %930 }
 0x246   : > { %v928_v14 = vpop.xlane.xlu2 %927 }
 0x247   : > { %v1022_v36 = vadd.f32 %v931_v59, %v928_v14 }
 0x249   : > { %v1023_v57 = vadd.f32 %v1022_v36, %v934_v29 }
 0x24d   : > { %v943_v26 = vpop.xlane.xlu1 %942  ;;  %v940_v35 = vpop.xlane.xlu0 %939 }
 0x24e   : > { %v937_v39 = vpop.xlane.xlu2 %936 }
 0x24f   : > { %v1024_v1 = vadd.f32 %v1023_v57, %v937_v39 }
 0x251   : > { %v1025_v63 = vadd.f32 %v1024_v1, %v940_v35 }
 0x253   : > { %v1026_v42 = vadd.f32 %v1025_v63, %v943_v26 }
 0x255   : > { %v952_v4 = vpop.xlane.xlu1 %951  ;;  %v949_v21 = vpop.xlane.xlu0 %948 }
 0x256   : > { %v946_v62 = vpop.xlane.xlu2 %945 }
 0x257   : > { %v1027_v51 = vadd.f32 %v1026_v42, %v946_v62 }
 0x259   : > { %v1028_v24 = vadd.f32 %v1027_v51, %v949_v21 }
 0x25b   : > { %v1029_v48 = vadd.f32 %v1028_v24, %v952_v4 }
 0x25d   : > { %v961_v22 = vpop.xlane.xlu1 %960  ;;  %v958_v34 = vpop.xlane.xlu0 %957 }
 0x25e   : > { %v955_v58 = vpop.xlane.xlu2 %954 }
 0x25f   : > { %v1030_v3 = vadd.f32 %v1029_v48, %v955_v58 }
 0x261   : > { %v1031_v53 = vadd.f32 %v1030_v3, %v958_v34 }
 0x263   : > { %v1032_v5 = vadd.f32 %v1031_v53, %v961_v22 }
 0x265   : > { %v970_v19 = vpop.xlane.xlu1 %969  ;;  %v967_v43 = vpop.xlane.xlu0 %966 }
 0x266   : > { %v964_v50 = vpop.xlane.xlu2 %963 }
 0x267   : > { %v1033_v9 = vadd.f32 %v1032_v5, %v964_v50 }
 0x269   : > { %v1034_v60 = vadd.f32 %v1033_v9, %v967_v43 }
 0x26b   : > { %v1035_v56 = vadd.f32 %v1034_v60, %v970_v19 }
 0x26d   : > { %v979_v6 = vpop.xlane.xlu1 %978  ;;  %v976_v2 = vpop.xlane.xlu0 %975 }
 0x26e   : > { %v973_v30 = vpop.xlane.xlu2 %972 }
 0x26f   : > { %v1036_v29 = vadd.f32 %v1035_v56, %v973_v30 }
 0x271   : > { %v1037_v59 = vadd.f32 %v1036_v29, %v976_v2 }
 0x273   : > { %v1038_v36 = vadd.f32 %v1037_v59, %v979_v6 }
 0x275   : > { %v985_v14 = vpop.xlane.xlu0 %984  ;;  %v988_v26 = vpop.xlane.xlu1 %987 }
 0x276   : > { %v982_v35 = vpop.xlane.xlu2 %981 }
 0x277   : > { %v1039_v57 = vadd.f32 %v1038_v36, %v982_v35 }
 0x279   : > { %v1040_v39 = vadd.f32 %v1039_v57, %v985_v14 }
 0x27b   : > { %v1041_v63 = vadd.f32 %v1040_v39, %v988_v26 }
 0x27d   : > { %v994_v1 = vpop.xlane.xlu0 %993  ;;  %v997_v42 = vpop.xlane.xlu1 %996 }
 0x27e   : > { %v991_v4 = vpop.xlane.xlu2 %990 }
 0x27f   : > { %v1042_v21 = vadd.f32 %v1041_v63, %v991_v4 }
 0x281   : > { %v1043_v62 = vadd.f32 %v1042_v21, %v994_v1 }
 0x283   : > { %v1044_v24 = vadd.f32 %v1043_v62, %v997_v42 }
 0x285   : > { %v1003_v51 = vpop.xlane.xlu0 %1002  ;;  %v1006_v58 = vpop.xlane.xlu1 %1005 }
 0x286   : > { %v1000_v22 = vpop.xlane.xlu2 %999 }
 0x287   : > { %v1045_v34 = vadd.f32 %v1044_v24, %v1000_v22 }
 0x289   : > { %v1046_v48 = vadd.f32 %v1045_v34, %v1003_v51  ;;  %v1103_v34 = vld [vmem:[%s2546_s3] sm:$0xff] }
 0x28b   : > { %v1047_v3 = vadd.f32 %v1046_v48, %v1006_v58  ;;  %v1104_v48 = vld [vmem:[%s2546_s3 + $0x8] sm:$0xff]  ;;  %v1105_v58 = vld [vmem:[%s2546_s3 + $0x10] sm:$0xff] }
 0x28d   : > { %v1012_v53 = vpop.xlane.xlu0 %1011  ;;  %v1015_v50 = vpop.xlane.xlu1 %1014 }
 0x28e   : > { %v1009_v19 = vpop.xlane.xlu2 %1008 }
 0x28f   : > { %v1048_v43 = vadd.f32 %v1047_v3, %v1009_v19  ;;  %v1107_v3 = vld [vmem:[%s2546_s3 + $0x20] sm:$0xff]  ;;  %v1108_v19 = vld [vmem:[%s2546_s3 + $0x28] sm:$0xff] }
 0x291   : > { %v1049_v5 = vadd.f32 %v1048_v43, %v1012_v53 }
 0x293   : > { %v1050_v9 = vadd.f32 %v1049_v5, %v1015_v50 }
 0x295   : > { %v1021_v2 = vpop.xlane.xlu0 %1020 }
 0x296   : > { %v1018_v60 = vpop.xlane.xlu2 %1017 }
 0x297   : > { %v1051_v6 = vadd.f32 %v1050_v9, %v1018_v60  ;;  %v1167_v9 = vld [vmem:[%s2547_s4] sm:$0xff]  ;;  %v1169_v60 = vld [vmem:[%s2547_s4 + $0x10] sm:$0xff] }
 0x299   : > { %v1052_v56 = vadd.f32 %v1051_v6, %v1021_v2 }
 0x29b   : > { %v1053_v30 = vrot.slane %v1052_v56, 4 }
 0x29d   : > { %v1054_v29 = vadd.f32 %v1053_v30, %v1052_v56  ;;  %v1170_v56 = vld [vmem:[%s2547_s4 + $0x18] sm:$0xff] }
 0x29f   : > { %v1055_v59 = vrot.slane %v1054_v29, 2 }
 0x2a1   : > { %v1056_v14 = vadd.f32 %v1055_v59, %v1054_v29  ;;  %v1111_v59 = vld [vmem:[%s2546_s3 + $0x40] sm:$0xff] }
 0x2a3   : > { %v1057_v36 = vrot.slane %v1056_v14, 1 }
 0x2a5   : > { %v1058_v26 = vadd.f32 %v1057_v36, %v1056_v14 }
 0x2a7   : > { %v1059_v35 = vmul.f32 0.00048828125, %v1058_v26 }
 0x2a9   : > { %v1060_v57 = vadd.f32 1e-05, %v1059_v35  ;;  %v1113_v35 = vld [vmem:[%s2546_s3 + $0x50] sm:$0xff] }
 0x2ab   : > { %1628 = vrsqrt.f32 %v1060_v57  ;;  %vm1067_vm2 = vweird.f32 %v1060_v57 }
 0x2b1   : > { %v1629_v39 = vpop.eup %1628 }
 0x2b2   : > { %v1062_v1 = vmul.f32 %v1629_v39, %v1060_v57  ;;  %vm1068_vm1 = vweird.f32 %v1629_v39  ;;  %v1172_v57 = vld [vmem:[%s2547_s4 + $0x28] sm:$0xff] }
 0x2b3   : > { %vm1069_vm3 = vmor %vm1067_vm2, %vm1068_vm1 }
 0x2b4   : > { %v1063_v63 = vmul.f32 %v1629_v39, %v1062_v1 }
 0x2b6   : > { %v1064_v4 = vmul.f32 0.5, %v1063_v63 }
 0x2b8   : > { %v1065_v21 = vsub.f32 1.5, %v1064_v4 }
 0x2ba   : > { %v1066_v42 = vmul.f32 %v1629_v39, %v1065_v21 }
 0x2bc   : > { %v2211_v62 = vsel %vm1069_vm3, %v1629_v39, %v1066_v42 }
 0x2bd   : > { %v1071_v51 = vmul.f32 %v2211_v62, %v1989_v49  ;;  %v1072_v24 = vmul.f32 %v2211_v62, %v1993_v20  ;;  %v1073_v22 = vmul.f32 %v2211_v62, %v1997_v10  ;;  %v1074_v49 = vmul.f32 %v2211_v62, %v2018_v31  ;;  %v1106_v20 = vld [vmem:[%s2546_s3 + $0x18] sm:$0xff]  ;;  %v1109_v31 = vld [vmem:[%s2546_s3 + $0x30] sm:$0xff] }
 0x2be   : > { %v1075_v10 = vmul.f32 %v2211_v62, %v2007_v52  ;;  %v1076_v53 = vmul.f32 %v2211_v62, %v2011_v61  ;;  %v1077_v43 = vmul.f32 %v2211_v62, %v2038_v40  ;;  %v1168_v61 = vld [vmem:[%s2547_s4 + $0x8] sm:$0xff]  ;;  %v1078_v6 = vmul.f32 %v2211_v62, %v2028_v11  ;;  %v1110_v40 = vld [vmem:[%s2546_s3 + $0x38] sm:$0xff]  ;;  %v1171_v11 = vld [vmem:[%s2547_s4 + $0x20] sm:$0xff] }
 0x2bf   : > { %v1135_v5 = vmul.f32 %v1103_v34, %v1071_v51  ;;  %v1136_v52 = vmul.f32 %v1104_v48, %v1072_v24  ;;  %v1137_v50 = vmul.f32 %v1105_v58, %v1073_v22  ;;  %v1138_v2 = vmul.f32 %v1106_v20, %v1074_v49  ;;  %v1114_v51 = vld [vmem:[%s2546_s3 + $0x58] sm:$0xff]  ;;  %v1175_v49 = vld [vmem:[%s2547_s4 + $0x40] sm:$0xff] }
 0x2c0   : > { %v1079_v30 = vmul.f32 %v2211_v62, %v2032_v17  ;;  %v1139_v29 = vmul.f32 %v1107_v3, %v1075_v10  ;;  %v1080_v14 = vmul.f32 %v2211_v62, %v2059_v0  ;;  %v1081_v36 = vmul.f32 %v2211_v62, %v2049_v46  ;;  %v1112_v17 = vld [vmem:[%s2546_s3 + $0x48] sm:$0xff]  ;;  %v1173_v46 = vld [vmem:[%s2547_s4 + $0x30] sm:$0xff]  ;;  %v1174_v24 = vld [vmem:[%s2547_s4 + $0x38] sm:$0xff] }
 0x2c1   : > { %v1140_v26 = vmul.f32 %v1108_v19, %v1076_v53  ;;  %v1141_v39 = vmul.f32 %v1109_v31, %v1077_v43  ;;  %v1199_v1 = vadd.f32 %v1167_v9, %v1135_v5  ;;  %v1200_v0 = vadd.f32 %v1168_v61, %v1136_v52  ;;  %v1116_v3 = vld [vmem:[%s2546_s3 + $0x68] sm:$0xff]  ;;  %v1177_v52 = vld [vmem:[%s2547_s4 + $0x50] sm:$0xff] }
 0x2c2   : > { %v1201_v63 = vadd.f32 %v1169_v60, %v1137_v50  ;;  %v1082_v4 = vmul.f32 %v2211_v62, %v2053_v45  ;;  %v1142_v21 = vmul.f32 %v1110_v40, %v1078_v6  ;;  %v1202_v42 = vadd.f32 %v1170_v56, %v1138_v2  ;;  %v1115_v45 = vld [vmem:[%s2546_s3 + $0x60] sm:$0xff]  ;;  %v1176_v53 = vld [vmem:[%s2547_s4 + $0x48] sm:$0xff]  ;;  %v1118_v6 = vld [vmem:[%s2546_s3 + $0x78] sm:$0xff] }
 0x2c3   : > { %v1083_v22 = vmul.f32 %v2211_v62, %v2080_v33  ;;  %v1084_v34 = vmul.f32 %v2211_v62, %v2070_v55  ;;  %v1143_v48 = vmul.f32 %v1111_v59, %v1079_v30  ;;  %v1203_v58 = vadd.f32 %v1171_v11, %v1139_v29  ;;  %v1178_v2 = vld [vmem:[%s2547_s4 + $0x58] sm:$0xff]  ;;  %v1179_v59 = vld [vmem:[%s2547_s4 + $0x60] sm:$0xff] }
 0x2c4   : > { %v1085_v33 = vmul.f32 %v2211_v62, %v2074_v8  ;;  %v1144_v55 = vmul.f32 %v1112_v17, %v1080_v14  ;;  %v1145_v20 = vmul.f32 %v1113_v35, %v1081_v36  ;;  %v1204_v10 = vadd.f32 %v1172_v57, %v1140_v26  ;;  %v1117_v8 = vld [vmem:[%s2546_s3 + $0x70] sm:$0xff]  ;;  %v1120_v26 = vld [vmem:[%s2546_s3 + $0x88] sm:$0xff] }
 0x2c5   : > { %v1205_v19 = vadd.f32 %v1173_v46, %v1141_v39  ;;  %v1231_v31 = vmax.f32 %v1199_v1, 0.0  ;;  %v1232_v43 = vmax.f32 %v1200_v0, 0.0  ;;  %v1233_v5 = vmax.f32 %v1201_v63, 0.0  ;;  %v1180_v17 = vld [vmem:[%s2547_s4 + $0x68] sm:$0xff]  ;;  %v1121_v1 = vld [vmem:[%s2546_s3 + $0x90] sm:$0xff] }
 0x2c6   : > { %v1086_v50 = vmul.f32 %v2211_v62, %v2101_v18  ;;  %v1146_v9 = vmul.f32 %v1114_v51, %v1082_v4  ;;  %v1206_v61 = vadd.f32 %v1174_v24, %v1142_v21  ;;  %v1234_v60 = vmax.f32 %v1202_v42, 0.0  ;;  %v1119_v18 = vld [vmem:[%s2546_s3 + $0x80] sm:$0xff]  ;;  %v1181_v0 = vld [vmem:[%s2547_s4 + $0x70] sm:$0xff]  ;;  %v1122_v21 = vld [vmem:[%s2546_s3 + $0x98] sm:$0xff] }
 0x2c7   : > { %v1087_v40 = vmul.f32 %v2211_v62, %v2091_v47  ;;  %v1147_v56 = vmul.f32 %v1115_v45, %v1083_v22  ;;  %v1207_v30 = vadd.f32 %v1175_v49, %v1143_v48  ;;  %v1235_v29 = vmax.f32 %v1203_v58, 0.0  ;;  %1263 = vst.msk [vmem:[%s2306_s8] sm:$0xff] %vm727_vm0, %v1231_v31  ;;  %v1182_v42 = vld [vmem:[%s2547_s4 + $0x78] sm:$0xff]  ;;  %v1183_v48 = vld [vmem:[%s2547_s4 + $0x80] sm:$0xff] }
 0x2c8   : > { %v1088_v11 = vmul.f32 %v2211_v62, %v2095_v32  ;;  %v1148_v14 = vmul.f32 %v1116_v3, %v1084_v34  ;;  %v1208_v36 = vadd.f32 %v1176_v53, %v1144_v55  ;;  %v1236_v47 = vmax.f32 %v1204_v10, 0.0  ;;  %1264 = vst.msk [vmem:[%s2306_s8 + $0x8] sm:$0xff] %vm727_vm0, %v1232_v43  ;;  %v1123_v34 = vld [vmem:[%s2546_s3 + $0xa0] sm:$0xff]  ;;  %v1184_v55 = vld [vmem:[%s2547_s4 + $0x88] sm:$0xff]  ;;  %v1125_v53 = vld [vmem:[%s2546_s3 + $0xb0] sm:$0xff] }
 0x2c9   : > { %v1089_v35 = vmul.f32 %v2211_v62, %v2122_v27  ;;  %v1149_v57 = vmul.f32 %v1117_v8, %v1085_v33  ;;  %v1209_v39 = vadd.f32 %v1177_v52, %v1145_v20  ;;  %v1237_v32 = vmax.f32 %v1205_v19, 0.0  ;;  %1265 = vst.msk [vmem:[%s2306_s8 + $0x10] sm:$0xff] %vm727_vm0, %v1233_v5  ;;  %v1124_v33 = vld [vmem:[%s2546_s3 + $0xa8] sm:$0xff]  ;;  %v1185_v19 = vld [vmem:[%s2547_s4 + $0x90] sm:$0xff]  ;;  %v1126_v8 = vld [vmem:[%s2546_s3 + $0xb8] sm:$0xff] }
 0x2ca   : > { %v1090_v63 = vmul.f32 %v2211_v62, %v2112_v7  ;;  %v1150_v46 = vmul.f32 %v1118_v6, %v1086_v50  ;;  %v1210_v4 = vadd.f32 %v1178_v2, %v1146_v9  ;;  %v1238_v27 = vmax.f32 %v1206_v61, 0.0  ;;  %1266 = vst.msk [vmem:[%s2306_s8 + $0x18] sm:$0xff] %vm727_vm0, %v1234_v60  ;;  %v1186_v52 = vld [vmem:[%s2547_s4 + $0x98] sm:$0xff]  ;;  %v1127_v60 = vld [vmem:[%s2546_s3 + $0xc0] sm:$0xff] }
 0x2cb   : > { %v1091_v51 = vmul.f32 %v2211_v62, %v2116_v12  ;;  %v1151_v24 = vmul.f32 %v1119_v18, %v1087_v40  ;;  %v1211_v22 = vadd.f32 %v1179_v59, %v1147_v56  ;;  %v1239_v7 = vmax.f32 %v1207_v30, 0.0  ;;  %1267 = vst.msk [vmem:[%s2306_s8 + $0x20] sm:$0xff] %vm727_vm0, %v1235_v29  ;;  %v1187_v6 = vld [vmem:[%s2547_s4 + $0xa0] sm:$0xff]  ;;  %v1128_v30 = vld [vmem:[%s2546_s3 + $0xc8] sm:$0xff] }
 0x2cc   : > { %v1092_v58 = vmul.f32 %v2211_v62, %v2143_v54  ;;  %v1152_v45 = vmul.f32 %v1120_v26, %v1088_v11  ;;  %v1212_v49 = vadd.f32 %v1180_v17, %v1148_v14  ;;  %v1240_v12 = vmax.f32 %v1208_v36, 0.0  ;;  %1268 = vst.msk [vmem:[%s2306_s8 + $0x28] sm:$0xff] %vm727_vm0, %v1236_v47  ;;  %v1188_v29 = vld [vmem:[%s2547_s4 + $0xa8] sm:$0xff]  ;;  %v1129_v14 = vld [vmem:[%s2546_s3 + $0xd0] sm:$0xff] }
 0x2cd   : > { %v1093_v20 = vmul.f32 %v2211_v62, %v2133_v38  ;;  %v1153_v10 = vmul.f32 %v1121_v1, %v1089_v35  ;;  %v1213_v3 = vadd.f32 %v1181_v0, %v1149_v57  ;;  %v1241_v54 = vmax.f32 %v1209_v39, 0.0  ;;  %1269 = vst.msk [vmem:[%s2306_s8 + $0x30] sm:$0xff] %vm727_vm0, %v1237_v32  ;;  %v1189_v36 = vld [vmem:[%s2547_s4 + $0xb0] sm:$0xff]  ;;  %v1130_v35 = vld [vmem:[%s2546_s3 + $0xd8] sm:$0xff]  ;;  %v1131_v0 = vld [vmem:[%s2546_s3 + $0xe0] sm:$0xff] }
 0x2ce   : > { %v1094_v31 = vmul.f32 %v2211_v62, %v2137_v16  ;;  %v1154_v43 = vmul.f32 %v1122_v21, %v1090_v63  ;;  %v1214_v5 = vadd.f32 %v1182_v42, %v1150_v46  ;;  %v1242_v38 = vmax.f32 %v1210_v4, 0.0  ;;  %1270 = vst.msk [vmem:[%s2306_s8 + $0x38] sm:$0xff] %vm727_vm0, %v1238_v27  ;;  %v1190_v57 = vld [vmem:[%s2547_s4 + $0xb8] sm:$0xff]  ;;  %v1191_v63 = vld [vmem:[%s2547_s4 + $0xc0] sm:$0xff]  ;;  %v1132_v21 = vld [vmem:[%s2546_s3 + $0xe8] sm:$0xff] }
 0x2cf   : > { %v1095_v50 = vmul.f32 %v2211_v62, %v2164_v15  ;;  %v1155_v9 = vmul.f32 %v1123_v34, %v1091_v51  ;;  %v1215_v61 = vadd.f32 %v1183_v48, %v1151_v24  ;;  %v1243_v16 = vmax.f32 %v1211_v22, 0.0  ;;  %1271 = vst.msk [vmem:[%s2306_s8 + $0x40] sm:$0xff] %vm727_vm0, %v1239_v7  ;;  %v1192_v42 = vld [vmem:[%s2547_s4 + $0xc8] sm:$0xff]  ;;  %v1133_v7 = vld [vmem:[%s2546_s3 + $0xf0] sm:$0xff] }
 0x2d0   : > { %v1096_v2 = vmul.f32 %v2211_v62, %v2154_v23  ;;  %v1156_v40 = vmul.f32 %v1124_v33, %v1092_v58  ;;  %v1216_v56 = vadd.f32 %v1184_v55, %v1152_v45  ;;  %v1244_v15 = vmax.f32 %v1212_v49, 0.0  ;;  %1272 = vst.msk [vmem:[%s2306_s8 + $0x48] sm:$0xff] %vm727_vm0, %v1240_v12  ;;  %v1193_v34 = vld [vmem:[%s2547_s4 + $0xd0] sm:$0xff]  ;;  %v1134_v49 = vld [vmem:[%s2546_s3 + $0xf8] sm:$0xff] }
 0x2d1   : > { %v1097_v18 = vmul.f32 %v2211_v62, %v2158_v44  ;;  %v1157_v59 = vmul.f32 %v1125_v53, %v1093_v20  ;;  %v1217_v11 = vadd.f32 %v1185_v19, %v1153_v10  ;;  %v1245_v23 = vmax.f32 %v1213_v3, 0.0  ;;  %1273 = vst.msk [vmem:[%s2306_s8 + $0x50] sm:$0xff] %vm727_vm0, %v1241_v54  ;;  %v1194_v12 = vld [vmem:[%s2547_s4 + $0xd8] sm:$0xff]  ;;  %v1196_v54 = vld [vmem:[%s2547_s4 + $0xe8] sm:$0xff] }
 0x2d2   : > { %v1098_v47 = vmul.f32 %v2211_v62, %v2185_v41  ;;  %v1158_v26 = vmul.f32 %v1126_v8, %v1094_v31  ;;  %v1218_v17 = vadd.f32 %v1186_v52, %v1154_v43  ;;  %v1246_v44 = vmax.f32 %v1214_v5, 0.0  ;;  %1274 = vst.msk [vmem:[%s2306_s8 + $0x58] sm:$0xff] %vm727_vm0, %v1242_v38  ;;  %v1197_v43 = vld [vmem:[%s2547_s4 + $0xf0] sm:$0xff]  ;;  %v1198_v52 = vld [vmem:[%s2547_s4 + $0xf8] sm:$0xff] }
 0x2d3   : > { %v1099_v39 = vmul.f32 %v2211_v62, %v2175_v28  ;;  %v1159_v32 = vmul.f32 %v1127_v60, %v1095_v50  ;;  %v1219_v1 = vadd.f32 %v1187_v6, %v1155_v9  ;;  %v1247_v41 = vmax.f32 %v1215_v61, 0.0  ;;  %1275 = vst.msk [vmem:[%s2306_s8 + $0x60] sm:$0xff] %vm727_vm0, %v1243_v16 }
 0x2d4   : > { %v1100_v46 = vmul.f32 %v2211_v62, %v2179_v37  ;;  %v1160_v4 = vmul.f32 %v1128_v30, %v1096_v2  ;;  %v1220_v27 = vadd.f32 %v1188_v29, %v1156_v40  ;;  %v1248_v28 = vmax.f32 %v1216_v56, 0.0  ;;  %1276 = vst.msk [vmem:[%s2306_s8 + $0x68] sm:$0xff] %vm727_vm0, %v1244_v15 }
 0x2d5   : > { %v1101_v51 = vmul.f32 %v2211_v62, %v2202_v25  ;;  %v1161_v24 = vmul.f32 %v1129_v14, %v1097_v18  ;;  %v1221_v37 = vadd.f32 %v1189_v36, %v1157_v59  ;;  %v1249_v22 = vmax.f32 %v1217_v11, 0.0  ;;  %1277 = vst.msk [vmem:[%s2306_s8 + $0x70] sm:$0xff] %vm727_vm0, %v1245_v23 }
 0x2d6   : > { %v1102_v48 = vmul.f32 %v2211_v62, %v2196_v13  ;;  %v1162_v58 = vmul.f32 %v1130_v35, %v1098_v47  ;;  %v1222_v25 = vadd.f32 %v1190_v57, %v1158_v26  ;;  %v1250_v45 = vmax.f32 %v1218_v17, 0.0  ;;  %1278 = vst.msk [vmem:[%s2306_s8 + $0x78] sm:$0xff] %vm727_vm0, %v1246_v44  ;;  %v1195_v13 = vld [vmem:[%s2547_s4 + $0xe0] sm:$0xff] }
 0x2d7   : > { %v1163_v33 = vmul.f32 %v1131_v0, %v1099_v39  ;;  %v1223_v55 = vadd.f32 %v1191_v63, %v1159_v32  ;;  %v1251_v20 = vmax.f32 %v1219_v1, 0.0  ;;  %1279 = vst.msk [vmem:[%s2306_s8 + $0x80] sm:$0xff] %vm727_vm0, %v1247_v41  ;;  %v1164_v62 = vmul.f32 %v1132_v21, %v1100_v46 }
 0x2d8   : > { %v1224_v10 = vadd.f32 %v1192_v42, %v1160_v4  ;;  %v1252_v3 = vmax.f32 %v1220_v27, 0.0  ;;  %1280 = vst.msk [vmem:[%s2306_s8 + $0x88] sm:$0xff] %vm727_vm0, %v1248_v28  ;;  %v1165_v53 = vmul.f32 %v1133_v7, %v1101_v51  ;;  %v1225_v19 = vadd.f32 %v1193_v34, %v1161_v24 }
 0x2d9   : > { %v1253_v31 = vmax.f32 %v1221_v37, 0.0  ;;  %1281 = vst.msk [vmem:[%s2306_s8 + $0x90] sm:$0xff] %vm727_vm0, %v1249_v22  ;;  %v1166_v5 = vmul.f32 %v1134_v49, %v1102_v48  ;;  %v1226_v38 = vadd.f32 %v1194_v12, %v1162_v58  ;;  %v1254_v8 = vmax.f32 %v1222_v25, 0.0 }
 0x2da   : > { %1282 = vst.msk [vmem:[%s2306_s8 + $0x98] sm:$0xff] %vm727_vm0, %v1250_v45  ;;  %v1227_v50 = vadd.f32 %v1195_v13, %v1163_v33  ;;  %v1255_v9 = vmax.f32 %v1223_v55, 0.0  ;;  %v1228_v61 = vadd.f32 %v1196_v54, %v1164_v62  ;;  %v1256_v16 = vmax.f32 %v1224_v10, 0.0 }
 0x2db   : > { %1283 = vst.msk [vmem:[%s2306_s8 + $0xa0] sm:$0xff] %vm727_vm0, %v1251_v20  ;;  %v1229_v60 = vadd.f32 %v1197_v43, %v1165_v53  ;;  %v1257_v6 = vmax.f32 %v1225_v19, 0.0  ;;  %v1230_v2 = vadd.f32 %v1198_v52, %v1166_v5  ;;  %v1258_v40 = vmax.f32 %v1226_v38, 0.0 }
 0x2dc   : > { %1284 = vst.msk [vmem:[%s2306_s8 + $0xa8] sm:$0xff] %vm727_vm0, %v1252_v3  ;;  %v1259_v56 = vmax.f32 %v1227_v50, 0.0  ;;  %v1260_v15 = vmax.f32 %v1228_v61, 0.0 }
 0x2dd   : > { %1285 = vst.msk [vmem:[%s2306_s8 + $0xb0] sm:$0xff] %vm727_vm0, %v1253_v31  ;;  %v1261_v30 = vmax.f32 %v1229_v60, 0.0  ;;  %v1262_v29 = vmax.f32 %v1230_v2, 0.0 }
 0x2de   : > { %1286 = vst.msk [vmem:[%s2306_s8 + $0xb8] sm:$0xff] %vm727_vm0, %v1254_v8 }
 0x2df   : > { %1287 = vst.msk [vmem:[%s2306_s8 + $0xc0] sm:$0xff] %vm727_vm0, %v1255_v9 }
 0x2e0   : > { %1288 = vst.msk [vmem:[%s2306_s8 + $0xc8] sm:$0xff] %vm727_vm0, %v1256_v16 }
 0x2e1   : > { %1289 = vst.msk [vmem:[%s2306_s8 + $0xd0] sm:$0xff] %vm727_vm0, %v1257_v6 }
 0x2e2   : > { %1290 = vst.msk [vmem:[%s2306_s8 + $0xd8] sm:$0xff] %vm727_vm0, %v1258_v40 }
 0x2e3   : > { %1291 = vst.msk [vmem:[%s2306_s8 + $0xe0] sm:$0xff] %vm727_vm0, %v1259_v56 }
 0x2e4   : > { %1292 = vst.msk [vmem:[%s2306_s8 + $0xe8] sm:$0xff] %vm727_vm0, %v1260_v15 }
 0x2e5   : > { %1293 = vst.msk [vmem:[%s2306_s8 + $0xf0] sm:$0xff] %vm727_vm0, %v1261_v30 }
 0x2e6   : > { %1294 = vst.msk [vmem:[%s2306_s8 + $0xf8] sm:$0xff] %vm727_vm0, %v1262_v29 }
 0x2e7 PF: > { %s15_s18 = sadd.s32 1, %s1636_s18  }
 0x2e8   : > { %p12_p4 = scmp.ge.s32.totalorder %s15_s18, 4  }
 0x2ea   :  { %14 = sbr.rel (!%p12_p4) target bundleno = 1 (0x1), region = 70 }

// kernel: _lambda_.6
= control target key start
LH: loop header
LB: loop body
LE: loop exit
PB: predicated region body
PF: predicated region fallthrough
CT: control target
= control target key end

     0   :  { %s876_s18 = smov 0   ;;  %s1088_s0 = inlined_call_operand.vmem [shape: bf16[2,64,256], index: 0, kind: input, shape index: {}]   ;;  %s1089_s1 = inlined_call_operand.vmem [shape: bf16[256,16], index: 1, kind: input, shape index: {}]   ;;  %s1090_s2 = inlined_call_operand.vmem [shape: f32[1,16], index: 2, kind: input, shape index: {}]   ;;  %s1091_s3 = inlined_call_operand.vmem [shape: f32[64,16], index: 3, kind: input, shape index: {}]   ;;  %s1092_s4 = inlined_call_operand.vmem [shape: f32[64,16], index: 4, kind: input, shape index: {}]   ;;  %s1093_s5 = inlined_call_operand.vmem [shape: f32[2,64,16], index: 5, kind: output, shape index: {}]  }
   0x1 LB: > { %s678_s19 = sadd.s32 4294967295, %s844_s18   ;;  %p682_p0 = scmp.ge.s32.totalorder %s844_s18, 1  ;;  %s844_s18 = sphi %s876_s18, %s15_s18  }
   0x2   : > { %p187_p1 = scmp.lt.s32.totalorder %s844_s18, 3 }
   0x4   : > { %p188_p2 = pnand %p682_p0, %p187_p1 }
   0x5   : > { %p215_p3 = scmp.lt.s32.totalorder (!%p188_p2), %s678_s19, 1 }
   0x6   : > { %191 = sbr.rel (%p188_p2) target bundleno = 530 (0x212), region = 40 }
   0xb   : > { %v802_v0 = vld [vmem:[%s1089_s1 + $0x38] sm:$0xff]  ;;  %v801_v2 = vld [vmem:[%s1089_s1 + $0x30] sm:$0xff]  ;;  %v800_v4 = vld [vmem:[%s1089_s1 + $0x28] sm:$0xff]  ;;  %s1095_s19 = smov (!%p215_p3, %s678_s19), 1  ;;  %vm463_vm0 = vcmask 130048  }
   0xc   : > { %v810_v1 = vld [vmem:[%s1089_s1 + $0x78] sm:$0xff]  ;;  %405 = vmatpush.bf16.msra.mxu0 %v802_v0  ;;  %811 = vmatpush.bf16.msra.mxu2 %v802_v0  ;;  %v809_v3 = vld [vmem:[%s1089_s1 + $0x70] sm:$0xff]  ;;  %v808_v5 = vld [vmem:[%s1089_s1 + $0x68] sm:$0xff]  ;;  %s785_s21 = sshll.u32 %s1095_s19, 6 }
   0xd   : > { %434 = vmatpush.bf16.msra.mxu1 %v810_v1  ;;  %819 = vmatpush.bf16.msra.mxu3 %v810_v1  ;;  %v799_v6 = vld [vmem:[%s1089_s1 + $0x20] sm:$0xff]  ;;  %v798_v8 = vld [vmem:[%s1089_s1 + $0x18] sm:$0xff]  ;;  %v797_v10 = vld [vmem:[%s1089_s1 + $0x10] sm:$0xff]  ;;  %s935_s26 = scalar_lea.vmem %s1088_s0, %s785_s21  ;;  %s224_s25 = scalar_lea.vmem %s1093_s5, %s785_s21 }
   0xe   : > { %v807_v7 = vld [vmem:[%s1089_s1 + $0x60] sm:$0xff]  ;;  %v806_v9 = vld [vmem:[%s1089_s1 + $0x58] sm:$0xff]  ;;  %v805_v11 = vld [vmem:[%s1089_s1 + $0x50] sm:$0xff] }
   0xf   : > { %v796_v12 = vld [vmem:[%s1089_s1 + $0x8] sm:$0xff]  ;;  %v795_v14 = vld [vmem:[%s1089_s1] sm:$0xff]  ;;  %v697_v28 = vld [vmem:[%s935_s26 + $0x10] sm:$0xf] }
  0x10   : > { %406 = vmatpush.bf16.msra.mxu0 %v801_v2  ;;  %812 = vmatpush.bf16.msra.mxu2 %v801_v2  ;;  %v804_v13 = vld [vmem:[%s1089_s1 + $0x48] sm:$0xff]  ;;  %v803_v15 = vld [vmem:[%s1089_s1 + $0x40] sm:$0xff]  ;;  %v790_v29 = vld [vmem:[%s935_s26 + $0x14] sm:$0xf0] }
  0x11   : > { %435 = vmatpush.bf16.msra.mxu1 %v809_v3  ;;  %820 = vmatpush.bf16.msra.mxu3 %v809_v3  ;;  %v689_v16 = vld [vmem:[%s935_s26] sm:$0xf]  ;;  %v788_v17 = vld [vmem:[%s935_s26 + $0x4] sm:$0xf0]  ;;  %v787_v20 = vld [vmem:[%s935_s26 + $0x4] sm:$0xf]  ;;  %v698_v36 = vor.u32 %v790_v29, %v697_v28 }
  0x12   : > { %v705_v18 = vld [vmem:[%s935_s26 + $0x20] sm:$0xf]  ;;  %v792_v19 = vld [vmem:[%s935_s26 + $0x24] sm:$0xf0]  ;;  %v691_v21 = vld [vmem:[%s935_s26 + $0x8] sm:$0xf0]  ;;  %v690_v24 = vor.u32 %v788_v17, %v689_v16 }
  0x13   : > { %v791_v22 = vld [vmem:[%s935_s26 + $0x24] sm:$0xf]  ;;  %v707_v23 = vld [vmem:[%s935_s26 + $0x28] sm:$0xf0]  ;;  %v706_v25 = vor.u32 %v792_v19, %v705_v18  ;;  %v694_v26 = vor.u32 %v787_v20, %v691_v21  ;;  %v713_v30 = vld [vmem:[%s935_s26 + $0x30] sm:$0xf] }
  0x14   : > { %407 = vmatpush.bf16.msra.mxu0 %v800_v4  ;;  %813 = vmatpush.bf16.msra.mxu2 %v800_v4  ;;  %v710_v27 = vor.u32 %v791_v22, %v707_v23  ;;  %v794_v31 = vld [vmem:[%s935_s26 + $0x34] sm:$0xf0]  ;;  %v789_v32 = vld [vmem:[%s935_s26 + $0x14] sm:$0xf]  ;;  %v699_v33 = vld [vmem:[%s935_s26 + $0x18] sm:$0xf0] }
  0x15   : > { %436 = vmatpush.bf16.msra.mxu1 %v808_v5  ;;  %821 = vmatpush.bf16.msra.mxu3 %v808_v5  ;;  %v793_v34 = vld [vmem:[%s935_s26 + $0x34] sm:$0xf]  ;;  %v715_v35 = vld [vmem:[%s935_s26 + $0x38] sm:$0xf0]  ;;  %v714_v37 = vor.u32 %v794_v31, %v713_v30  ;;  %v702_v38 = vor.u32 %v789_v32, %v699_v33  ;;  %v835_v40 = vld [vmem:[%s1090_s2] ss:$0 sm:$0xff] }
  0x16   : > { %v718_v39 = vor.u32 %v793_v34, %v715_v35 }
  0x18   : > { %408 = vmatpush.bf16.msra.mxu0 %v799_v6  ;;  %814 = vmatpush.bf16.msra.mxu2 %v799_v6 }
  0x19   : > { %437 = vmatpush.bf16.msra.mxu1 %v807_v7  ;;  %822 = vmatpush.bf16.msra.mxu3 %v807_v7 }
  0x1c   : > { %409 = vmatpush.bf16.msra.mxu0 %v798_v8  ;;  %815 = vmatpush.bf16.msra.mxu2 %v798_v8 }
  0x1d   : > { %438 = vmatpush.bf16.msra.mxu1 %v806_v9  ;;  %823 = vmatpush.bf16.msra.mxu3 %v806_v9 }
  0x20   : > { %410 = vmatpush.bf16.msra.mxu0 %v797_v10  ;;  %816 = vmatpush.bf16.msra.mxu2 %v797_v10 }
  0x21   : > { %439 = vmatpush.bf16.msra.mxu1 %v805_v11  ;;  %824 = vmatpush.bf16.msra.mxu3 %v805_v11 }
  0x24   : > { %411 = vmatpush.bf16.msra.mxu0 %v796_v12  ;;  %817 = vmatpush.bf16.msra.mxu2 %v796_v12 }
  0x25   : > { %440 = vmatpush.bf16.msra.mxu1 %v804_v13  ;;  %825 = vmatpush.bf16.msra.mxu3 %v804_v13 }
  0x28   : > { %412 = vmatpush.bf16.msra.mxu0 %v795_v14  ;;  %818 = vmatpush.bf16.msra.mxu2 %v795_v14 }
  0x29   : > { %441 = vmatpush.bf16.msra.mxu1 %v803_v15  ;;  %826 = vmatpush.bf16.msra.mxu3 %v803_v15 }
  0x2b   : > { %413 = vmatmul.bf16.vlgmr.msra.gmra.mxu0 %v690_v24  ;;  %423 = vmatmul.bf16.vlgmr.msra.gmra.mxu2 %v706_v25 }
  0x2c   : > { %442 = vmatmul.bf16.vlgmr.msra.gmra.mxu1 %v694_v26  ;;  %452 = vmatmul.bf16.vlgmr.msra.gmra.mxu3 %v710_v27 }
  0x3b   : > { %418 = vmatmul.bf16.gmra.mxu0 %v698_v36  ;;  %428 = vmatmul.bf16.gmra.mxu2 %v714_v37 }
  0x3c   : > { %447 = vmatmul.bf16.gmra.mxu1 %v702_v38  ;;  %457 = vmatmul.bf16.gmra.mxu3 %v718_v39 }
  0xa8   : > { %v414_v41 = vpop.f32.mrf.mxu0 }
  0xa9   : > { %v415_v42 = vadd.f32 %v835_v40, %v414_v41  ;;  %v443_v43 = vpop.f32.mrf.mxu1 }
  0xab   : > { %v965_v44 = vadd.f32 %v443_v43, %v415_v42 }
  0xad   : > { %v464_v45 = vsel %vm463_vm0, %v965_v44, 0.0 }
  0xae   : > { %v424_v46 = vpop.f32.mrf.mxu2  ;;  %465 = vadd.xlane.f32.xlu0 %v464_v45 }
  0xaf   : > { %v425_v47 = vadd.f32 %v835_v40, %v424_v46  ;;  %v453_v48 = vpop.f32.mrf.mxu3 }
  0xb0   : > { %v416_v49 = vpop.f32.mrf.mxu0 }
  0xb1   : > { %v969_v50 = vadd.f32 %v453_v48, %v425_v47  ;;  %v417_v51 = vadd.f32 %v835_v40, %v416_v49  ;;  %v445_v52 = vpop.f32.mrf.mxu1 }
  0xb3   : > { %v446_v53 = vadd.f32 %v445_v52, %v417_v51  ;;  %v476_v54 = vsel %vm463_vm0, %v969_v50, 0.0 }
  0xb4   : > { %477 = vadd.xlane.f32.xlu2 %v476_v54 }
  0xb5   : > { %v467_v55 = vsel %vm463_vm0, %v446_v53, 0.0 }
  0xb6   : > { %v426_v56 = vpop.f32.mrf.mxu2  ;;  %468 = vadd.xlane.f32.xlu0 %v467_v55 }
  0xb7   : > { %v427_v57 = vadd.f32 %v835_v40, %v426_v56  ;;  %v455_v58 = vpop.f32.mrf.mxu3 }
  0xb8   : > { %v419_v59 = vpop.f32.mrf.mxu0 }
  0xb9   : > { %v456_v60 = vadd.f32 %v455_v58, %v427_v57  ;;  %v420_v61 = vadd.f32 %v835_v40, %v419_v59  ;;  %v448_v62 = vpop.f32.mrf.mxu1 }
  0xbb   : > { %v449_v63 = vadd.f32 %v448_v62, %v420_v61  ;;  %v479_v0 = vsel %vm463_vm0, %v456_v60, 0.0 }
  0xbc   : > { %480 = vadd.xlane.f32.xlu2 %v479_v0 }
  0xbd   : > { %v470_v1 = vsel %vm463_vm0, %v449_v63, 0.0 }
  0xbe   : > { %v429_v2 = vpop.f32.mrf.mxu2  ;;  %471 = vadd.xlane.f32.xlu1 %v470_v1 }
  0xbf   : > { %v430_v3 = vadd.f32 %v835_v40, %v429_v2  ;;  %v458_v4 = vpop.f32.mrf.mxu3 }
  0xc0   : > { %v421_v5 = vpop.f32.mrf.mxu0 }
  0xc1   : > { %v459_v6 = vadd.f32 %v458_v4, %v430_v3  ;;  %v422_v7 = vadd.f32 %v835_v40, %v421_v5  ;;  %v450_v8 = vpop.f32.mrf.mxu1 }
  0xc3   : > { %v451_v9 = vadd.f32 %v450_v8, %v422_v7  ;;  %v482_v10 = vsel %vm463_vm0, %v459_v6, 0.0 }
  0xc4   : > { %483 = vadd.xlane.f32.xlu0 %v482_v10 }
  0xc5   : > { %v473_v11 = vsel %vm463_vm0, %v451_v9, 0.0 }
  0xc6   : > { %v431_v12 = vpop.f32.mrf.mxu2  ;;  %474 = vadd.xlane.f32.xlu1 %v473_v11 }
  0xc7   : > { %v432_v13 = vadd.f32 %v835_v40, %v431_v12  ;;  %v460_v14 = vpop.f32.mrf.mxu3 }
  0xc9   : > { %v461_v15 = vadd.f32 %v460_v14, %v432_v13 }
  0xcb   : > { %v485_v16 = vsel %vm463_vm0, %v461_v15, 0.0 }
  0xce   : > { %486 = vadd.xlane.f32.xlu1 %v485_v16 }
 0x121   : > { %v466_v17 = vpop.xlane.xlu0 %465 }
 0x127   : > { %v478_v19 = vpop.xlane.xlu2 %477 }
 0x129   : > { %v469_v20 = vpop.xlane.xlu0 %468 }
 0x12a   : > { %v488_v21 = vadd.f32 %v469_v20, %v466_v17 }
 0x12f   : > { %v481_v26 = vpop.xlane.xlu2 %480 }
 0x131   : > { %v472_v18 = vpop.xlane.xlu1 %471 }
 0x132   : > { %v489_v22 = vadd.f32 %v488_v21, %v472_v18 }
 0x137   : > { %v484_v28 = vpop.xlane.xlu0 %483 }
 0x139   : > { %v475_v23 = vpop.xlane.xlu1 %474 }
 0x13a   : > { %v490_v24 = vadd.f32 %v489_v22, %v475_v23 }
 0x13c   : > { %v491_v25 = vadd.f32 %v490_v24, %v478_v19 }
 0x13e   : > { %v492_v27 = vadd.f32 %v491_v25, %v481_v26 }
 0x140   : > { %v493_v29 = vadd.f32 %v492_v27, %v484_v28  ;;  %v575_v27 = vld [vmem:[%s1091_s3] sm:$0xff] }
 0x141   : > { %v487_v30 = vpop.xlane.xlu1 %486 }
 0x142   : > { %v494_v31 = vadd.f32 %v493_v29, %v487_v30  ;;  %v576_v29 = vld [vmem:[%s1091_s3 + $0x8] sm:$0xff]  ;;  %v577_v30 = vld [vmem:[%s1091_s3 + $0x10] sm:$0xff] }
 0x144   : > { %v495_v32 = vrot.slane %v494_v31, 4 }
 0x146   : > { %v496_v33 = vadd.f32 %v495_v32, %v494_v31  ;;  %v578_v31 = vld [vmem:[%s1091_s3 + $0x18] sm:$0xff]  ;;  %v579_v32 = vld [vmem:[%s1091_s3 + $0x20] sm:$0xff] }
 0x148   : > { %v497_v34 = vrot.slane %v496_v33, 2 }
 0x14a   : > { %v498_v35 = vadd.f32 %v497_v34, %v496_v33  ;;  %v580_v33 = vld [vmem:[%s1091_s3 + $0x28] sm:$0xff] }
 0x14c   : > { %v499_v36 = vrot.slane %v498_v35, 1 }
 0x14e   : > { %v500_v37 = vadd.f32 %v499_v36, %v498_v35  ;;  %v581_v35 = vld [vmem:[%s1091_s3 + $0x30] sm:$0xff]  ;;  %v582_v36 = vld [vmem:[%s1091_s3 + $0x38] sm:$0xff] }
 0x150   : > { %v501_v38 = vmul.f32 0.0009765625, %v500_v37  ;;  %v591_v37 = vld [vmem:[%s1092_s4] sm:$0xff] }
 0x152   : > { %v979_v39 = vsub.f32 %v449_v63, %v501_v38  ;;  %v981_v40 = vsub.f32 %v446_v53, %v501_v38  ;;  %v984_v41 = vsub.f32 %v965_v44, %v501_v38  ;;  %v992_v46 = vsub.f32 %v456_v60, %v501_v38 }
 0x153   : > { %v998_v44 = vsub.f32 %v969_v50, %v501_v38  ;;  %v1000_v51 = vsub.f32 %v451_v9, %v501_v38  ;;  %v1010_v50 = vsub.f32 %v461_v15, %v501_v38  ;;  %v508_v58 = vsub.f32 %v459_v6, %v501_v38 }
 0x154   : > { %v512_v42 = vmul.f32 %v979_v39, %v979_v39  ;;  %v511_v43 = vmul.f32 %v981_v40, %v981_v40  ;;  %v510_v45 = vmul.f32 %v984_v41, %v984_v41  ;;  %v515_v52 = vmul.f32 %v992_v46, %v992_v46 }
 0x155   : > { %v514_v53 = vmul.f32 %v998_v44, %v998_v44  ;;  %v513_v54 = vmul.f32 %v1000_v51, %v1000_v51  ;;  %v517_v59 = vmul.f32 %v1010_v50, %v1010_v50  ;;  %v516_v60 = vmul.f32 %v508_v58, %v508_v58 }
 0x156   : > { %v524_v47 = vsel %vm463_vm0, %v512_v42, 0.0  ;;  %v521_v48 = vsel %vm463_vm0, %v511_v43, 0.0  ;;  %v518_v49 = vsel %vm463_vm0, %v510_v45, 0.0  ;;  %v533_v55 = vsel %vm463_vm0, %v515_v52, 0.0 }
 0x157   : > { %525 = vadd.xlane.f32.xlu1 %v524_v47  ;;  %522 = vadd.xlane.f32.xlu0 %v521_v48  ;;  %v530_v56 = vsel %vm463_vm0, %v514_v53, 0.0  ;;  %v527_v57 = vsel %vm463_vm0, %v513_v54, 0.0  ;;  %v539_v61 = vsel %vm463_vm0, %v517_v59, 0.0  ;;  %v536_v62 = vsel %vm463_vm0, %v516_v60, 0.0  ;;  %v592_v47 = vld [vmem:[%s1092_s4 + $0x8] sm:$0xff]  ;;  %v593_v48 = vld [vmem:[%s1092_s4 + $0x10] sm:$0xff] }
 0x158   : > { %519 = vadd.xlane.f32.xlu2 %v518_v49  ;;  %v594_v49 = vld [vmem:[%s1092_s4 + $0x18] sm:$0xff]  ;;  %v596_v53 = vld [vmem:[%s1092_s4 + $0x28] sm:$0xff] }
 0x159   : > { %v598_v60 = vld [vmem:[%s1092_s4 + $0x38] sm:$0xff] }
 0x15f   : > { %534 = vadd.xlane.f32.xlu1 %v533_v55  ;;  %531 = vadd.xlane.f32.xlu0 %v530_v56 }
 0x160   : > { %528 = vadd.xlane.f32.xlu2 %v527_v57 }
 0x167   : > { %540 = vadd.xlane.f32.xlu0 %v539_v61 }
 0x168   : > { %537 = vadd.xlane.f32.xlu2 %v536_v62 }
 0x1ca   : > { %v523_v63 = vpop.xlane.xlu0 %522  ;;  %v526_v2 = vpop.xlane.xlu1 %525 }
 0x1cb   : > { %v520_v0 = vpop.xlane.xlu2 %519 }
 0x1cc   : > { %v542_v1 = vadd.f32 %v523_v63, %v520_v0 }
 0x1ce   : > { %v543_v3 = vadd.f32 %v542_v1, %v526_v2 }
 0x1d2   : > { %v532_v4 = vpop.xlane.xlu0 %531  ;;  %v535_v8 = vpop.xlane.xlu1 %534 }
 0x1d3   : > { %v529_v5 = vpop.xlane.xlu2 %528 }
 0x1d4   : > { %v544_v7 = vadd.f32 %v543_v3, %v529_v5 }
 0x1d6   : > { %v545_v6 = vadd.f32 %v544_v7, %v532_v4 }
 0x1d8   : > { %v546_v9 = vadd.f32 %v545_v6, %v535_v8 }
 0x1da   : > { %v541_v12 = vpop.xlane.xlu0 %540 }
 0x1db   : > { %v538_v10 = vpop.xlane.xlu2 %537 }
 0x1dc   : > { %v547_v11 = vadd.f32 %v546_v9, %v538_v10 }
 0x1de   : > { %v548_v13 = vadd.f32 %v547_v11, %v541_v12 }
 0x1e0   : > { %v549_v14 = vrot.slane %v548_v13, 4 }
 0x1e2   : > { %v550_v15 = vadd.f32 %v549_v14, %v548_v13 }
 0x1e4   : > { %v551_v16 = vrot.slane %v550_v15, 2 }
 0x1e6   : > { %v552_v17 = vadd.f32 %v551_v16, %v550_v15 }
 0x1e8   : > { %v553_v18 = vrot.slane %v552_v17, 1 }
 0x1ea   : > { %v554_v19 = vadd.f32 %v553_v18, %v552_v17 }
 0x1ec   : > { %v555_v20 = vmul.f32 0.0009765625, %v554_v19 }
 0x1ee   : > { %v556_v21 = vadd.f32 1e-05, %v555_v20 }
 0x1f0   : > { %836 = vrsqrt.f32 %v556_v21  ;;  %vm563_vm2 = vweird.f32 %v556_v21 }
 0x1f6   : > { %v837_v22 = vpop.eup %836 }
 0x1f7   : > { %v558_v23 = vmul.f32 %v837_v22, %v556_v21  ;;  %vm564_vm1 = vweird.f32 %v837_v22 }
 0x1f8   : > { %vm565_vm3 = vmor %vm563_vm2, %vm564_vm1 }
 0x1f9   : > { %v559_v24 = vmul.f32 %v837_v22, %v558_v23 }
 0x1fb   : > { %v560_v25 = vmul.f32 0.5, %v559_v24 }
 0x1fd   : > { %v561_v26 = vsub.f32 1.5, %v560_v25 }
 0x1ff   : > { %v562_v28 = vmul.f32 %v837_v22, %v561_v26 }
 0x201   : > { %v566_v34 = vsel %vm565_vm3, %v837_v22, %v562_v28 }
 0x202   : > { %v567_v38 = vmul.f32 %v566_v34, %v984_v41  ;;  %v568_v42 = vmul.f32 %v566_v34, %v981_v40  ;;  %v569_v43 = vmul.f32 %v566_v34, %v979_v39  ;;  %v570_v45 = vmul.f32 %v566_v34, %v1000_v51  ;;  %v595_v51 = vld [vmem:[%s1092_s4 + $0x20] sm:$0xff] }
 0x203   : > { %v571_v41 = vmul.f32 %v566_v34, %v998_v44  ;;  %v572_v40 = vmul.f32 %v566_v34, %v992_v46  ;;  %v573_v52 = vmul.f32 %v566_v34, %v508_v58  ;;  %v574_v39 = vmul.f32 %v566_v34, %v1010_v50  ;;  %v597_v46 = vld [vmem:[%s1092_s4 + $0x30] sm:$0xff] }
 0x204   : > { %v583_v54 = vmul.f32 %v575_v27, %v567_v38  ;;  %v584_v55 = vmul.f32 %v576_v29, %v568_v42  ;;  %v585_v56 = vmul.f32 %v577_v30, %v569_v43  ;;  %v586_v57 = vmul.f32 %v578_v31, %v570_v45 }
 0x205   : > { %v587_v44 = vmul.f32 %v579_v32, %v571_v41  ;;  %v588_v58 = vmul.f32 %v580_v33, %v572_v40  ;;  %v589_v50 = vmul.f32 %v581_v35, %v573_v52  ;;  %v590_v59 = vmul.f32 %v582_v36, %v574_v39 }
 0x206   : > { %v599_v61 = vadd.f32 %v591_v37, %v583_v54  ;;  %v600_v62 = vadd.f32 %v592_v47, %v584_v55  ;;  %v601_v63 = vadd.f32 %v593_v48, %v585_v56  ;;  %v602_v0 = vadd.f32 %v594_v49, %v586_v57 }
 0x207   : > { %v603_v1 = vadd.f32 %v595_v51, %v587_v44  ;;  %v604_v2 = vadd.f32 %v596_v53, %v588_v58  ;;  %v605_v3 = vadd.f32 %v597_v46, %v589_v50  ;;  %v606_v6 = vadd.f32 %v598_v60, %v590_v59 }
 0x208   : > { %v607_v4 = vmax.f32 %v599_v61, 0.0  ;;  %v608_v5 = vmax.f32 %v600_v62, 0.0  ;;  %v609_v7 = vmax.f32 %v601_v63, 0.0  ;;  %v610_v8 = vmax.f32 %v602_v0, 0.0 }
 0x209   : > { %v611_v9 = vmax.f32 %v603_v1, 0.0  ;;  %v612_v10 = vmax.f32 %v604_v2, 0.0  ;;  %v613_v11 = vmax.f32 %v605_v3, 0.0  ;;  %v614_v12 = vmax.f32 %v606_v6, 0.0 }
 0x20a   : > { %615 = vst.msk [vmem:[%s224_s25] sm:$0xff] %vm463_vm0, %v607_v4 }
 0x20b   : > { %616 = vst.msk [vmem:[%s224_s25 + $0x8] sm:$0xff] %vm463_vm0, %v608_v5 }
 0x20c   : > { %617 = vst.msk [vmem:[%s224_s25 + $0x10] sm:$0xff] %vm463_vm0, %v609_v7 }
 0x20d   : > { %618 = vst.msk [vmem:[%s224_s25 + $0x18] sm:$0xff] %vm463_vm0, %v610_v8 }
 0x20e   : > { %619 = vst.msk [vmem:[%s224_s25 + $0x20] sm:$0xff] %vm463_vm0, %v611_v9 }
 0x20f   : > { %620 = vst.msk [vmem:[%s224_s25 + $0x28] sm:$0xff] %vm463_vm0, %v612_v10 }
 0x210   : > { %621 = vst.msk [vmem:[%s224_s25 + $0x30] sm:$0xff] %vm463_vm0, %v613_v11 }
 0x211   : > { %622 = vst.msk [vmem:[%s224_s25 + $0x38] sm:$0xff] %vm463_vm0, %v614_v12 }
 0x212 PF: > { %s15_s18 = sadd.s32 1, %s844_s18  }
 0x213   : > { %p12_p4 = scmp.ge.s32.totalorder %s15_s18, 4  }
 0x215   :  { %14 = sbr.rel (!%p12_p4) target bundleno = 1 (0x1), region = 70 }

// kernel: _lambda_.7
= control target key start
LH: loop header
LB: loop body
LE: loop exit
PB: predicated region body
PF: predicated region fallthrough
CT: control target
= control target key end

     0   :  { %s920_s18 = smov 0   ;;  %s1062_s0 = inlined_call_operand.vmem [shape: bf16[2,16,512], index: 0, kind: input, shape index: {}]   ;;  %s1063_s1 = inlined_call_operand.vmem [shape: bf16[512,32], index: 1, kind: input, shape index: {}]   ;;  %s1064_s2 = inlined_call_operand.vmem [shape: f32[1,32], index: 2, kind: input, shape index: {}]   ;;  %s1065_s3 = inlined_call_operand.vmem [shape: f32[16,32], index: 3, kind: input, shape index: {}]   ;;  %s1066_s4 = inlined_call_operand.vmem [shape: f32[16,32], index: 4, kind: input, shape index: {}]   ;;  %s1067_s5 = inlined_call_operand.vmem [shape: f32[2,16,32], index: 5, kind: output, shape index: {}]  }
   0x1 LB: > { %s678_s19 = sadd.s32 4294967295, %s888_s18   ;;  %p682_p0 = scmp.ge.s32.totalorder %s888_s18, 1  ;;  %s888_s18 = sphi %s920_s18, %s15_s18  }
   0x2   : > { %p187_p1 = scmp.lt.s32.totalorder %s888_s18, 3 }
   0x4   : > { %p188_p2 = pnand %p682_p0, %p187_p1 }
   0x5   : > { %p215_p3 = scmp.lt.s32.totalorder (!%p188_p2), %s678_s19, 1 }
   0x6   : > { %191 = sbr.rel (%p188_p2) target bundleno = 497 (0x1f1), region = 40 }
   0xb   : > { %v846_v0 = vld [vmem:[%s1063_s1 + $0x38] sm:$0xff]  ;;  %v845_v4 = vld [vmem:[%s1063_s1 + $0x30] sm:$0xff]  ;;  %v844_v8 = vld [vmem:[%s1063_s1 + $0x28] sm:$0xff]  ;;  %s1069_s19 = smov (!%p215_p3, %s678_s19), 1  ;;  %vm565_vm0 = vcmask 261120  }
   0xc   : > { %v854_v1 = vld [vmem:[%s1063_s1 + $0x78] sm:$0xff]  ;;  %509 = vmatpush.bf16.msra.mxu0 %v846_v0  ;;  %v853_v5 = vld [vmem:[%s1063_s1 + $0x70] sm:$0xff]  ;;  %v852_v9 = vld [vmem:[%s1063_s1 + $0x68] sm:$0xff]  ;;  %s833_s22 = sshll.u32 %s1069_s19, 5 }
   0xd   : > { %v862_v2 = vld [vmem:[%s1063_s1 + $0xb8] sm:$0xff]  ;;  %523 = vmatpush.bf16.msra.mxu1 %v854_v1  ;;  %v861_v6 = vld [vmem:[%s1063_s1 + $0xb0] sm:$0xff]  ;;  %v860_v10 = vld [vmem:[%s1063_s1 + $0xa8] sm:$0xff]  ;;  %s219_s29 = scalar_lea.vmem %s1062_s0, %s833_s22 }
   0xe   : > { %v870_v3 = vld [vmem:[%s1063_s1 + $0xf8] sm:$0xff]  ;;  %537 = vmatpush.bf16.msra.mxu2 %v862_v2  ;;  %v869_v7 = vld [vmem:[%s1063_s1 + $0xf0] sm:$0xff]  ;;  %v868_v11 = vld [vmem:[%s1063_s1 + $0xe8] sm:$0xff] }
   0xf   : > { %551 = vmatpush.bf16.msra.mxu3 %v870_v3  ;;  %v843_v12 = vld [vmem:[%s1063_s1 + $0x20] sm:$0xff]  ;;  %v842_v16 = vld [vmem:[%s1063_s1 + $0x18] sm:$0xff]  ;;  %v841_v20 = vld [vmem:[%s1063_s1 + $0x10] sm:$0xff] }
  0x10   : > { %510 = vmatpush.bf16.msra.mxu0 %v845_v4  ;;  %v851_v13 = vld [vmem:[%s1063_s1 + $0x60] sm:$0xff]  ;;  %v850_v17 = vld [vmem:[%s1063_s1 + $0x58] sm:$0xff]  ;;  %v849_v21 = vld [vmem:[%s1063_s1 + $0x50] sm:$0xff] }
  0x11   : > { %524 = vmatpush.bf16.msra.mxu1 %v853_v5  ;;  %v859_v14 = vld [vmem:[%s1063_s1 + $0xa0] sm:$0xff]  ;;  %v858_v18 = vld [vmem:[%s1063_s1 + $0x98] sm:$0xff]  ;;  %v857_v22 = vld [vmem:[%s1063_s1 + $0x90] sm:$0xff] }
  0x12   : > { %538 = vmatpush.bf16.msra.mxu2 %v861_v6  ;;  %v867_v15 = vld [vmem:[%s1063_s1 + $0xe0] sm:$0xff]  ;;  %v866_v19 = vld [vmem:[%s1063_s1 + $0xd8] sm:$0xff]  ;;  %v865_v23 = vld [vmem:[%s1063_s1 + $0xd0] sm:$0xff] }
  0x13   : > { %552 = vmatpush.bf16.msra.mxu3 %v869_v7  ;;  %v840_v24 = vld [vmem:[%s1063_s1 + $0x8] sm:$0xff]  ;;  %v839_v28 = vld [vmem:[%s1063_s1] sm:$0xff]  ;;  %v837_v33 = vld [vmem:[%s219_s29 + $0xc] sm:$0xf0] }
  0x14   : > { %511 = vmatpush.bf16.msra.mxu0 %v844_v8  ;;  %v848_v25 = vld [vmem:[%s1063_s1 + $0x48] sm:$0xff]  ;;  %v847_v29 = vld [vmem:[%s1063_s1 + $0x40] sm:$0xff]  ;;  %v691_v35 = vld [vmem:[%s219_s29 + $0x10] sm:$0xf0] }
  0x15   : > { %525 = vmatpush.bf16.msra.mxu1 %v852_v9  ;;  %v856_v26 = vld [vmem:[%s1063_s1 + $0x88] sm:$0xff]  ;;  %v855_v30 = vld [vmem:[%s1063_s1 + $0x80] sm:$0xff]  ;;  %v838_v37 = vld [vmem:[%s219_s29 + $0x14] sm:$0xf0] }
  0x16   : > { %539 = vmatpush.bf16.msra.mxu2 %v860_v10  ;;  %v864_v27 = vld [vmem:[%s1063_s1 + $0xc8] sm:$0xff]  ;;  %v863_v31 = vld [vmem:[%s1063_s1 + $0xc0] sm:$0xff]  ;;  %v699_v39 = vld [vmem:[%s219_s29 + $0x18] sm:$0xf0] }
  0x17   : > { %553 = vmatpush.bf16.msra.mxu3 %v868_v11  ;;  %v689_v32 = vld [vmem:[%s219_s29] sm:$0xf]  ;;  %v835_v34 = vld [vmem:[%s219_s29 + $0x4] sm:$0xf]  ;;  %v697_v36 = vld [vmem:[%s219_s29 + $0x8] sm:$0xf] }
  0x18   : > { %512 = vmatpush.bf16.msra.mxu0 %v843_v12  ;;  %v836_v38 = vld [vmem:[%s219_s29 + $0xc] sm:$0xf]  ;;  %v690_v40 = vor.u32 %v837_v33, %v689_v32  ;;  %v694_v41 = vor.u32 %v835_v34, %v691_v35  ;;  %v698_v42 = vor.u32 %v838_v37, %v697_v36  ;;  %v879_v44 = vld [vmem:[%s1064_s2] ss:$0 sm:$0xff]  ;;  %s834_s29 = sshll.u32 %s1069_s19, 4 }
  0x19   : > { %526 = vmatpush.bf16.msra.mxu1 %v851_v13  ;;  %v702_v43 = vor.u32 %v836_v38, %v699_v39  ;;  %v611_v32 = vld [vmem:[%s1065_s3] sm:$0xff]  ;;  %v612_v33 = vld [vmem:[%s1065_s3 + $0x8] sm:$0xff]  ;;  %s224_s7 = scalar_lea.vmem %s1067_s5, %s834_s29 }
  0x1a   : > { %540 = vmatpush.bf16.msra.mxu2 %v859_v14  ;;  %v615_v37 = vld [vmem:[%s1066_s4] sm:$0xff]  ;;  %v616_v38 = vld [vmem:[%s1066_s4 + $0x8] sm:$0xff] }
  0x1b   : > { %554 = vmatpush.bf16.msra.mxu3 %v867_v15 }
  0x1c   : > { %513 = vmatpush.bf16.msra.mxu0 %v842_v16 }
  0x1d   : > { %527 = vmatpush.bf16.msra.mxu1 %v850_v17 }
  0x1e   : > { %541 = vmatpush.bf16.msra.mxu2 %v858_v18 }
  0x1f   : > { %555 = vmatpush.bf16.msra.mxu3 %v866_v19 }
  0x20   : > { %514 = vmatpush.bf16.msra.mxu0 %v841_v20 }
  0x21   : > { %528 = vmatpush.bf16.msra.mxu1 %v849_v21 }
  0x22   : > { %542 = vmatpush.bf16.msra.mxu2 %v857_v22 }
  0x23   : > { %556 = vmatpush.bf16.msra.mxu3 %v865_v23 }
  0x24   : > { %515 = vmatpush.bf16.msra.mxu0 %v840_v24 }
  0x25   : > { %529 = vmatpush.bf16.msra.mxu1 %v848_v25 }
  0x26   : > { %543 = vmatpush.bf16.msra.mxu2 %v856_v26 }
  0x27   : > { %557 = vmatpush.bf16.msra.mxu3 %v864_v27 }
  0x28   : > { %516 = vmatpush.bf16.msra.mxu0 %v839_v28 }
  0x29   : > { %530 = vmatpush.bf16.msra.mxu1 %v847_v29 }
  0x2a   : > { %544 = vmatpush.bf16.msra.mxu2 %v855_v30 }
  0x2b   : > { %558 = vmatpush.bf16.msra.mxu3 %v863_v31  ;;  %517 = vmatmul.bf16.vlgmr.msra.gmra.mxu0 %v690_v40 }
  0x2c   : > { %531 = vmatmul.bf16.vlgmr.msra.gmra.mxu1 %v694_v41 }
  0x2d   : > { %545 = vmatmul.bf16.vlgmr.msra.gmra.mxu2 %v698_v42 }
  0x2e   : > { %559 = vmatmul.bf16.vlgmr.msra.gmra.mxu3 %v702_v43 }
  0xa8   : > { %v518_v45 = vpop.f32.mrf.mxu0 }
  0xa9   : > { %v519_v46 = vadd.f32 %v879_v44, %v518_v45  ;;  %v532_v47 = vpop.f32.mrf.mxu1 }
  0xab   : > { %v533_v48 = vadd.f32 %v532_v47, %v519_v46 }
  0xb0   : > { %v546_v49 = vpop.f32.mrf.mxu2  ;;  %v520_v52 = vpop.f32.mrf.mxu0 }
  0xb1   : > { %v560_v50 = vpop.f32.mrf.mxu3  ;;  %v547_v51 = vadd.f32 %v546_v49, %v533_v48  ;;  %v521_v54 = vadd.f32 %v879_v44, %v520_v52  ;;  %v534_v56 = vpop.f32.mrf.mxu1 }
  0xb3   : > { %v561_v53 = vadd.f32 %v560_v50, %v547_v51  ;;  %v535_v57 = vadd.f32 %v534_v56, %v521_v54 }
  0xb5   : > { %v566_v55 = vsel %vm565_vm0, %v561_v53, 0.0 }
  0xb6   : > { %567 = vadd.xlane.f32.xlu0 %v566_v55 }
  0xb8   : > { %v548_v58 = vpop.f32.mrf.mxu2 }
  0xb9   : > { %v549_v59 = vadd.f32 %v548_v58, %v535_v57  ;;  %v562_v60 = vpop.f32.mrf.mxu3 }
  0xbb   : > { %v563_v61 = vadd.f32 %v562_v60, %v549_v59 }
  0xbd   : > { %v569_v62 = vsel %vm565_vm0, %v563_v61, 0.0 }
  0xbe   : > { %570 = vadd.xlane.f32.xlu0 %v569_v62 }
 0x129   : > { %v568_v63 = vpop.xlane.xlu0 %567 }
 0x131   : > { %v571_v0 = vpop.xlane.xlu0 %570 }
 0x132   : > { %v572_v1 = vadd.f32 %v571_v0, %v568_v63 }
 0x134   : > { %v573_v2 = vrot.slane %v572_v1, 4 }
 0x136   : > { %v574_v3 = vadd.f32 %v573_v2, %v572_v1 }
 0x138   : > { %v575_v4 = vrot.slane %v574_v3, 2 }
 0x13a   : > { %v576_v5 = vadd.f32 %v575_v4, %v574_v3 }
 0x13c   : > { %v577_v6 = vrot.slane %v576_v5, 1 }
 0x13e   : > { %v578_v7 = vadd.f32 %v577_v6, %v576_v5 }
 0x140   : > { %v579_v8 = vmul.f32 0.001953125, %v578_v7 }
 0x142   : > { %v580_v9 = vsub.f32 %v561_v53, %v579_v8  ;;  %v581_v12 = vsub.f32 %v563_v61, %v579_v8 }
 0x144   : > { %v582_v10 = vmul.f32 %v580_v9, %v580_v9  ;;  %v583_v13 = vmul.f32 %v581_v12, %v581_v12 }
 0x146   : > { %v584_v11 = vsel %vm565_vm0, %v582_v10, 0.0  ;;  %v587_v14 = vsel %vm565_vm0, %v583_v13, 0.0 }
 0x147   : > { %585 = vadd.xlane.f32.xlu1 %v584_v11 }
 0x14f   : > { %588 = vadd.xlane.f32.xlu1 %v587_v14 }
 0x1ba   : > { %v586_v15 = vpop.xlane.xlu1 %585 }
 0x1c2   : > { %v589_v16 = vpop.xlane.xlu1 %588 }
 0x1c3   : > { %v590_v17 = vadd.f32 %v589_v16, %v586_v15 }
 0x1c5   : > { %v591_v18 = vrot.slane %v590_v17, 4 }
 0x1c7   : > { %v592_v19 = vadd.f32 %v591_v18, %v590_v17 }
 0x1c9   : > { %v593_v20 = vrot.slane %v592_v19, 2 }
 0x1cb   : > { %v594_v21 = vadd.f32 %v593_v20, %v592_v19 }
 0x1cd   : > { %v595_v22 = vrot.slane %v594_v21, 1 }
 0x1cf   : > { %v596_v23 = vadd.f32 %v595_v22, %v594_v21 }
 0x1d1   : > { %v597_v24 = vmul.f32 0.001953125, %v596_v23 }
 0x1d3   : > { %v598_v25 = vadd.f32 1e-05, %v597_v24 }
 0x1d5   : > { %880 = vrsqrt.f32 %v598_v25  ;;  %vm605_vm2 = vweird.f32 %v598_v25 }
 0x1db   : > { %v881_v26 = vpop.eup %880 }
 0x1dc   : > { %v600_v27 = vmul.f32 %v881_v26, %v598_v25  ;;  %vm606_vm1 = vweird.f32 %v881_v26 }
 0x1dd   : > { %vm607_vm3 = vmor %vm605_vm2, %vm606_vm1 }
 0x1de   : > { %v601_v28 = vmul.f32 %v881_v26, %v600_v27 }
 0x1e0   : > { %v602_v29 = vmul.f32 0.5, %v601_v28 }
 0x1e2   : > { %v603_v30 = vsub.f32 1.5, %v602_v29 }
 0x1e4   : > { %v604_v31 = vmul.f32 %v881_v26, %v603_v30 }
 0x1e6   : > { %v608_v34 = vsel %vm607_vm3, %v881_v26, %v604_v31 }
 0x1e7   : > { %v609_v35 = vmul.f32 %v608_v34, %v580_v9  ;;  %v610_v36 = vmul.f32 %v608_v34, %v581_v12 }
 0x1e9   : > { %v613_v39 = vmul.f32 %v611_v32, %v609_v35  ;;  %v614_v40 = vmul.f32 %v612_v33, %v610_v36 }
 0x1eb   : > { %v617_v41 = vadd.f32 %v615_v37, %v613_v39  ;;  %v618_v42 = vadd.f32 %v616_v38, %v614_v40 }
 0x1ed   : > { %v619_v43 = vmax.f32 %v617_v41, 0.0  ;;  %v620_v44 = vmax.f32 %v618_v42, 0.0 }
 0x1ef   : > { %621 = vst.msk [vmem:[%s224_s7] sm:$0xff] %vm565_vm0, %v619_v43 }
 0x1f0   : > { %622 = vst.msk [vmem:[%s224_s7 + $0x8] sm:$0xff] %vm565_vm0, %v620_v44 }
 0x1f1 PF: > { %s15_s18 = sadd.s32 1, %s888_s18  }
 0x1f2   : > { %p12_p4 = scmp.ge.s32.totalorder %s15_s18, 4  }
 0x1f4   :  { %14 = sbr.rel (!%p12_p4) target bundleno = 1 (0x1), region = 70 }

// kernel: _lambda_.8
= control target key start
LH: loop header
LB: loop body
LE: loop exit
PB: predicated region body
PF: predicated region fallthrough
CT: control target
= control target key end

     0   :  { %s1223_s18 = smov 0   ;;  %s1428_s0 = inlined_call_operand.vmem [shape: bf16[2,4,896], index: 0, kind: input, shape index: {}]   ;;  %s1429_s1 = inlined_call_operand.vmem [shape: bf16[896,64], index: 1, kind: input, shape index: {}]   ;;  %s1430_s2 = inlined_call_operand.vmem [shape: f32[1,64], index: 2, kind: input, shape index: {}]   ;;  %s1431_s3 = inlined_call_operand.vmem [shape: f32[4,64], index: 3, kind: input, shape index: {}]   ;;  %s1432_s4 = inlined_call_operand.vmem [shape: f32[4,64], index: 4, kind: input, shape index: {}]   ;;  %s1433_s5 = inlined_call_operand.vmem [shape: f32[2,4,64], index: 5, kind: output, shape index: {}]  }
   0x1 LB: > { %s884_s19 = sadd.s32 4294967295, %s1191_s18   ;;  %p888_p0 = scmp.ge.s32.totalorder %s1191_s18, 1  ;;  %s1191_s18 = sphi %s1223_s18, %s15_s18  }
   0x2   : > { %p187_p1 = scmp.lt.s32.totalorder %s1191_s18, 3 }
   0x4   : > { %p188_p2 = pnand %p888_p0, %p187_p1 }
   0x5   : > { %p214_p3 = scmp.lt.s32.totalorder (!%p188_p2), %s884_s19, 1 }
   0x6   : > { %191 = sbr.rel (%p188_p2) target bundleno = 508 (0x1fc), region = 40 }
   0xb   : > { %v1124_v0 = vld [vmem:[%s1429_s1 + $0x38] sm:$0xff]  ;;  %v1123_v3 = vld [vmem:[%s1429_s1 + $0x30] sm:$0xff]  ;;  %s1435_s19 = smov (!%p214_p3, %s884_s19), 1  ;;  %v1122_v7 = vld [vmem:[%s1429_s1 + $0x28] sm:$0xff]  ;;  %vm787_vm0 = vcmask 519168   ;;  %vm791_vm1 = vcmask 1043456  }
   0xc   : > { %v1132_v1 = vld [vmem:[%s1429_s1 + $0x78] sm:$0xff]  ;;  %696 = vmatpush.bf16.msra.mxu0 %v1124_v0  ;;  %v1131_v4 = vld [vmem:[%s1429_s1 + $0x70] sm:$0xff]  ;;  %s1173_s9 = smul.u32 14, %s1435_s19  ;;  %v1130_v8 = vld [vmem:[%s1429_s1 + $0x68] sm:$0xff]  ;;  %s890_s28 = sshll.u32 %s1435_s19, 2 }
   0xd   : > { %v1140_v2 = vld [vmem:[%s1429_s1 + $0xb8] sm:$0xff]  ;;  %709 = vmatpush.bf16.msra.mxu1 %v1132_v1  ;;  %v1139_v5 = vld [vmem:[%s1429_s1 + $0xb0] sm:$0xff]  ;;  %v1138_v9 = vld [vmem:[%s1429_s1 + $0xa8] sm:$0xff]  ;;  %s222_s6 = scalar_lea.vmem %s1433_s5, %s890_s28 }
   0xe   : > { %722 = vmatpush.bf16.msra.mxu2 %v1140_v2  ;;  %v1148_v6 = vld [vmem:[%s1429_s1 + $0xf8] sm:$0xff]  ;;  %v1147_v10 = vld [vmem:[%s1429_s1 + $0xf0] sm:$0xff]  ;;  %s1270_s22 = scalar_lea.vmem %s1428_s0, %s1173_s9  ;;  %v1121_v11 = vld [vmem:[%s1429_s1 + $0x20] sm:$0xff] }
   0xf   : > { %735 = vmatpush.bf16.msra.mxu3 %v1148_v6  ;;  %v1129_v12 = vld [vmem:[%s1429_s1 + $0x60] sm:$0xff]  ;;  %v1146_v14 = vld [vmem:[%s1429_s1 + $0xe8] sm:$0xff]  ;;  %v1120_v16 = vld [vmem:[%s1429_s1 + $0x18] sm:$0xff] }
  0x10   : > { %697 = vmatpush.bf16.msra.mxu0 %v1123_v3  ;;  %v1137_v13 = vld [vmem:[%s1429_s1 + $0xa0] sm:$0xff]  ;;  %v1128_v17 = vld [vmem:[%s1429_s1 + $0x58] sm:$0xff]  ;;  %v1119_v20 = vld [vmem:[%s1429_s1 + $0x10] sm:$0xff] }
  0x11   : > { %710 = vmatpush.bf16.msra.mxu1 %v1131_v4  ;;  %v223_v15 = vld [vmem:[%s1270_s22] sm:$0xff]  ;;  %v1136_v18 = vld [vmem:[%s1429_s1 + $0x98] sm:$0xff]  ;;  %v1127_v21 = vld [vmem:[%s1429_s1 + $0x50] sm:$0xff] }
  0x12   : > { %723 = vmatpush.bf16.msra.mxu2 %v1139_v5  ;;  %342 = vst [vmem:[#allocation1] ss:$4 sm:$0xff] %v223_v15  ;;  %v1145_v19 = vld [vmem:[%s1429_s1 + $0xe0] sm:$0xff]  ;;  %v1135_v22 = vld [vmem:[%s1429_s1 + $0x90] sm:$0xff]  ;;  %v1144_v23 = vld [vmem:[%s1429_s1 + $0xd8] sm:$0xff] }
  0x13   : > { %736 = vmatpush.bf16.msra.mxu3 %v1147_v10  ;;  %v1118_v24 = vld [vmem:[%s1429_s1 + $0x8] sm:$0xff]  ;;  %v1143_v27 = vld [vmem:[%s1429_s1 + $0xd0] sm:$0xff]  ;;  %v1117_v29 = vld [vmem:[%s1429_s1] sm:$0xff] }
  0x14   : > { %698 = vmatpush.bf16.msra.mxu0 %v1122_v7  ;;  %v1126_v25 = vld [vmem:[%s1429_s1 + $0x48] sm:$0xff]  ;;  %v1125_v30 = vld [vmem:[%s1429_s1 + $0x40] sm:$0xff]  ;;  %v1156_v32 = vld [vmem:[%s1429_s1 + $0x138] sm:$0xff] }
  0x15   : > { %711 = vmatpush.bf16.msra.mxu1 %v1130_v8  ;;  %v1134_v26 = vld [vmem:[%s1429_s1 + $0x88] sm:$0xff]  ;;  %v1133_v31 = vld [vmem:[%s1429_s1 + $0x80] sm:$0xff]  ;;  %v1164_v33 = vld [vmem:[%s1429_s1 + $0x178] sm:$0xff] }
  0x16   : > { %724 = vmatpush.bf16.msra.mxu2 %v1138_v9  ;;  %v224_v28 = vld [vmem:[%s1270_s22 + $0x8] sm:$0x3f]  ;;  %v1172_v34 = vld [vmem:[%s1429_s1 + $0x1b8] sm:$0xff]  ;;  %v1155_v36 = vld [vmem:[%s1429_s1 + $0x130] sm:$0xff] }
  0x17   : > { %737 = vmatpush.bf16.msra.mxu3 %v1146_v14  ;;  %345 = vst [vmem:[#allocation1 + $0x20] ss:$4 sm:$0xff] %v224_v28  ;;  %v1142_v35 = vld [vmem:[%s1429_s1 + $0xc8] sm:$0xff]  ;;  %v1163_v40 = vld [vmem:[%s1429_s1 + $0x170] sm:$0xff]  ;;  %v1141_v42 = vld [vmem:[%s1429_s1 + $0xc0] sm:$0xff] }
  0x18   : > { %699 = vmatpush.bf16.msra.mxu0 %v1121_v11  ;;  %v1171_v41 = vld [vmem:[%s1429_s1 + $0x1b0] sm:$0xff]  ;;  %v1154_v43 = vld [vmem:[%s1429_s1 + $0x128] sm:$0xff]  ;;  %v1153_v47 = vld [vmem:[%s1429_s1 + $0x120] sm:$0xff] }
  0x19   : > { %712 = vmatpush.bf16.msra.mxu1 %v1129_v12  ;;  %v346_v37 = vld.sshfl [vmem:[#allocation1] sm:$0xff pattern:$0x73625140]  ;;  %v348_v38 = vld.sshfl [vmem:[#allocation1 + $0x10] sm:$0xff pattern:$0x73625140] }
  0x1a   : > { %725 = vmatpush.bf16.msra.mxu2 %v1137_v13  ;;  %v347_v39 = vld.sshfl [vmem:[#allocation1 + $0x8] sm:$0xff pattern:$0x73625140]  ;;  %v349_v46 = vld.sshfl [vmem:[#allocation1 + $0x18] sm:$0xff pattern:$0x73625140] }
  0x1b   : > { %738 = vmatpush.bf16.msra.mxu3 %v1145_v19  ;;  %v1162_v44 = vld [vmem:[%s1429_s1 + $0x168] sm:$0xff]  ;;  %v1161_v48 = vld [vmem:[%s1429_s1 + $0x160] sm:$0xff]  ;;  %v1152_v50 = vld [vmem:[%s1429_s1 + $0x118] sm:$0xff] }
  0x1c   : > { %700 = vmatpush.bf16.msra.mxu0 %v1120_v16  ;;  %v1170_v45 = vld [vmem:[%s1429_s1 + $0x1a8] sm:$0xff]  ;;  %v1169_v49 = vld [vmem:[%s1429_s1 + $0x1a0] sm:$0xff]  ;;  %v1160_v51 = vld [vmem:[%s1429_s1 + $0x158] sm:$0xff] }
  0x1d   : > { %713 = vmatpush.bf16.msra.mxu1 %v1128_v17  ;;  %v1168_v52 = vld [vmem:[%s1429_s1 + $0x198] sm:$0xff]  ;;  %v1151_v53 = vld [vmem:[%s1429_s1 + $0x110] sm:$0xff]  ;;  %v1150_v56 = vld [vmem:[%s1429_s1 + $0x108] sm:$0xff] }
  0x1e   : > { %726 = vmatpush.bf16.msra.mxu2 %v1136_v18  ;;  %v1159_v54 = vld [vmem:[%s1429_s1 + $0x150] sm:$0xff]  ;;  %v1158_v57 = vld [vmem:[%s1429_s1 + $0x148] sm:$0xff]  ;;  %v1149_v59 = vld [vmem:[%s1429_s1 + $0x100] sm:$0xff] }
  0x1f   : > { %739 = vmatpush.bf16.msra.mxu3 %v1144_v23  ;;  %v1167_v55 = vld [vmem:[%s1429_s1 + $0x190] sm:$0xff]  ;;  %v1166_v58 = vld [vmem:[%s1429_s1 + $0x188] sm:$0xff]  ;;  %v1157_v60 = vld [vmem:[%s1429_s1 + $0x140] sm:$0xff] }
  0x20   : > { %701 = vmatpush.bf16.msra.mxu0 %v1119_v20  ;;  %v1165_v61 = vld [vmem:[%s1429_s1 + $0x180] sm:$0xff]  ;;  %v351_v63 = vld.sshfl [vmem:[#allocation1 + $0x28] sm:$0xff pattern:$0x73625140] }
  0x21   : > { %714 = vmatpush.bf16.msra.mxu1 %v1127_v21  ;;  %v350_v62 = vld.sshfl [vmem:[#allocation1 + $0x20] sm:$0xff pattern:$0x73625140]  ;;  %v352_v0 = vld.sshfl [vmem:[#allocation1 + $0x30] sm:$0xff pattern:$0x73625140] }
  0x22   : > { %727 = vmatpush.bf16.msra.mxu2 %v1135_v22  ;;  %v1182_v6 = vld [vmem:[%s1430_s2] ss:$0 sm:$0xff] }
  0x23   : > { %740 = vmatpush.bf16.msra.mxu3 %v1143_v27 }
  0x24   : > { %702 = vmatpush.bf16.msra.mxu0 %v1118_v24 }
  0x25   : > { %715 = vmatpush.bf16.msra.mxu1 %v1126_v25 }
  0x26   : > { %728 = vmatpush.bf16.msra.mxu2 %v1134_v26 }
  0x27   : > { %741 = vmatpush.bf16.msra.mxu3 %v1142_v35 }
  0x28   : > { %703 = vmatpush.bf16.msra.mxu0 %v1117_v29 }
  0x29   : > { %716 = vmatpush.bf16.msra.mxu1 %v1125_v30 }
  0x2a   : > { %729 = vmatpush.bf16.msra.mxu2 %v1133_v31 }
  0x2b   : > { %704 = vmatmul.bf16.vlgmr.msra.gmra.mxu0 %v346_v37  ;;  %742 = vmatpush.bf16.msra.mxu3 %v1141_v42 }
  0x2c   : > { %748 = vmatpush.bf16.msrb.mxu0 %v1156_v32  ;;  %717 = vmatmul.bf16.vlgmr.msra.gmra.mxu1 %v347_v39 }
  0x2d   : > { %761 = vmatpush.bf16.msrb.mxu1 %v1164_v33  ;;  %730 = vmatmul.bf16.vlgmr.msra.gmra.mxu2 %v348_v38 }
  0x2e   : > { %774 = vmatpush.bf16.msrb.mxu2 %v1172_v34  ;;  %743 = vmatmul.bf16.vlgmr.msra.gmra.mxu3 %v349_v46 }
  0x30   : > { %749 = vmatpush.bf16.msrb.mxu0 %v1155_v36 }
  0x31   : > { %762 = vmatpush.bf16.msrb.mxu1 %v1163_v40 }
  0x32   : > { %775 = vmatpush.bf16.msrb.mxu2 %v1171_v41 }
  0x34   : > { %750 = vmatpush.bf16.msrb.mxu0 %v1154_v43 }
  0x35   : > { %763 = vmatpush.bf16.msrb.mxu1 %v1162_v44 }
  0x36   : > { %776 = vmatpush.bf16.msrb.mxu2 %v1170_v45 }
  0x38   : > { %751 = vmatpush.bf16.msrb.mxu0 %v1153_v47 }
  0x39   : > { %764 = vmatpush.bf16.msrb.mxu1 %v1161_v48 }
  0x3a   : > { %777 = vmatpush.bf16.msrb.mxu2 %v1169_v49 }
  0x3c   : > { %752 = vmatpush.bf16.msrb.mxu0 %v1152_v50 }
  0x3d   : > { %765 = vmatpush.bf16.msrb.mxu1 %v1160_v51 }
  0x3e   : > { %778 = vmatpush.bf16.msrb.mxu2 %v1168_v52  ;;  %v825_v52 = vld [vmem:[%s1431_s3] sm:$0xf] }
  0x40   : > { %753 = vmatpush.bf16.msrb.mxu0 %v1151_v53 }
  0x41   : > { %766 = vmatpush.bf16.msrb.mxu1 %v1159_v54 }
  0x42   : > { %779 = vmatpush.bf16.msrb.mxu2 %v1167_v55  ;;  %v827_v55 = vld [vmem:[%s1432_s4] sm:$0xf] }
  0x44   : > { %754 = vmatpush.bf16.msrb.mxu0 %v1150_v56 }
  0x45   : > { %767 = vmatpush.bf16.msrb.mxu1 %v1158_v57 }
  0x46   : > { %780 = vmatpush.bf16.msrb.mxu2 %v1166_v58 }
  0x48   : > { %755 = vmatpush.bf16.msrb.mxu0 %v1149_v59 }
  0x49   : > { %768 = vmatpush.bf16.msrb.mxu1 %v1157_v60 }
  0x4a   : > { %781 = vmatpush.bf16.msrb.mxu2 %v1165_v61 }
  0x4b   : > { %756 = vmatmul.bf16.vlgmr.msrb.gmra.mxu0 %v350_v62 }
  0x4c   : > { %769 = vmatmul.bf16.vlgmr.msrb.gmra.mxu1 %v351_v63 }
  0x4d   : > { %782 = vmatmul.bf16.vlgmr.msrb.gmra.mxu2 %v352_v0 }
  0xa8   : > { %v705_v1 = vpop.f32.mrf.mxu0 }
  0xa9   : > { %v718_v2 = vpop.f32.mrf.mxu1  ;;  %v706_v9 = vadd.f32 %v1182_v6, %v705_v1 }
  0xab   : > { %v719_v10 = vadd.f32 %v718_v2, %v706_v9 }
  0xb0   : > { %v731_v3 = vpop.f32.mrf.mxu2  ;;  %v707_v4 = vpop.f32.mrf.mxu0 }
  0xb1   : > { %v720_v5 = vpop.f32.mrf.mxu1  ;;  %v744_v7 = vpop.f32.mrf.mxu3  ;;  %v732_v12 = vadd.f32 %v731_v3, %v719_v10 }
  0xb3   : > { %v745_v13 = vadd.f32 %v744_v7, %v732_v12 }
  0xb8   : > { %v733_v8 = vpop.f32.mrf.mxu2 }
  0xb9   : > { %v746_v11 = vpop.f32.mrf.mxu3 }
  0xc8   : > { %v757_v14 = vpop.f32.mrf.mxu0 }
  0xc9   : > { %v770_v15 = vpop.f32.mrf.mxu1  ;;  %v758_v16 = vadd.f32 %v757_v14, %v745_v13 }
  0xcb   : > { %v771_v17 = vadd.f32 %v770_v15, %v758_v16 }
  0xd0   : > { %v783_v18 = vpop.f32.mrf.mxu2  ;;  %v759_v20 = vpop.f32.mrf.mxu0 }
  0xd1   : > { %v784_v19 = vadd.f32 %v783_v18, %v771_v17  ;;  %v772_v21 = vpop.f32.mrf.mxu1 }
  0xd3   : > { %v788_v22 = vsel %vm787_vm0, %v784_v19, 0.0 }
  0xd4   : > { %789 = vadd.xlane.f32.xlu0 %v788_v22 }
  0xd8   : > { %v785_v23 = vpop.f32.mrf.mxu2 }
 0x147   : > { %v790_v24 = vpop.xlane.xlu0 %789 }
 0x148   : > { %v792_v25 = vsel %vm791_vm1, %v790_v24, 0.0 }
 0x149   : > { %v793_v26 = vrot.slane %v792_v25, 4 }
 0x14b   : > { %v794_v27 = vadd.f32 %v793_v26, %v792_v25 }
 0x14d   : > { %v795_v28 = vrot.slane %v794_v27, 2 }
 0x14f   : > { %v796_v29 = vadd.f32 %v795_v28, %v794_v27 }
 0x151   : > { %v797_v30 = vrot.slane %v796_v29, 1 }
 0x153   : > { %v798_v31 = vadd.f32 %v797_v30, %v796_v29 }
 0x155   : > { %v799_v32 = vmul.f32 0.00390625, %v798_v31 }
 0x157   : > { %v800_v33 = vsub.f32 %v784_v19, %v799_v32 }
 0x159   : > { %v801_v34 = vmul.f32 %v800_v33, %v800_v33 }
 0x15b   : > { %v802_v35 = vsel %vm787_vm0, %v801_v34, 0.0 }
 0x15c   : > { %803 = vadd.xlane.f32.xlu0 %v802_v35 }
 0x1cf   : > { %v804_v36 = vpop.xlane.xlu0 %803 }
 0x1d0   : > { %v805_v37 = vsel %vm791_vm1, %v804_v36, 0.0 }
 0x1d1   : > { %v806_v38 = vrot.slane %v805_v37, 4 }
 0x1d3   : > { %v807_v39 = vadd.f32 %v806_v38, %v805_v37 }
 0x1d5   : > { %v808_v40 = vrot.slane %v807_v39, 2 }
 0x1d7   : > { %v809_v41 = vadd.f32 %v808_v40, %v807_v39 }
 0x1d9   : > { %v810_v42 = vrot.slane %v809_v41, 1 }
 0x1db   : > { %v811_v43 = vadd.f32 %v810_v42, %v809_v41 }
 0x1dd   : > { %v812_v44 = vmul.f32 0.00390625, %v811_v43 }
 0x1df   : > { %v813_v45 = vadd.f32 1e-05, %v812_v44 }
 0x1e1   : > { %1183 = vrsqrt.f32 %v813_v45  ;;  %vm820_vm3 = vweird.f32 %v813_v45 }
 0x1e7   : > { %v1184_v46 = vpop.eup %1183 }
 0x1e8   : > { %v815_v47 = vmul.f32 %v1184_v46, %v813_v45  ;;  %vm821_vm2 = vweird.f32 %v1184_v46 }
 0x1e9   : > { %vm822_vm4 = vmor %vm820_vm3, %vm821_vm2 }
 0x1ea   : > { %v816_v48 = vmul.f32 %v1184_v46, %v815_v47 }
 0x1ec   : > { %v817_v49 = vmul.f32 0.5, %v816_v48 }
 0x1ee   : > { %v818_v50 = vsub.f32 1.5, %v817_v49 }
 0x1f0   : > { %v819_v51 = vmul.f32 %v1184_v46, %v818_v50 }
 0x1f2   : > { %v823_v53 = vsel %vm822_vm4, %v1184_v46, %v819_v51 }
 0x1f3   : > { %v824_v54 = vmul.f32 %v823_v53, %v800_v33 }
 0x1f5   : > { %v826_v56 = vmul.f32 %v825_v52, %v824_v54 }
 0x1f7   : > { %v828_v57 = vadd.f32 %v827_v55, %v826_v56 }
 0x1f9   : > { %v829_v58 = vmax.f32 %v828_v57, 0.0 }
 0x1fb   : > { %830 = vst.msk [vmem:[%s222_s6] sm:$0xf] %vm787_vm0, %v829_v58 }
 0x1fc PF: > { %s15_s18 = sadd.s32 1, %s1191_s18  }
 0x1fd   : > { %p12_p4 = scmp.ge.s32.totalorder %s15_s18, 4  }
 0x1ff   :  { %14 = sbr.rel (!%p12_p4) target bundleno = 1 (0x1), region = 71 }

// kernel: _lambda_.9
= control target key start
LH: loop header
LB: loop body
LE: loop exit
PB: predicated region body
PF: predicated region fallthrough
CT: control target
= control target key end

     0   :  { %10 = vsyncpa [#allocation3], 0  ;;  %s1273_s0 = inlined_call_operand.vmem [shape: bf16[2,1,640], index: 0, kind: input, shape index: {}]   ;;  %s1274_s1 = inlined_call_operand.vmem [shape: bf16[640,128], index: 1, kind: input, shape index: {}]   ;;  %s1275_s2 = inlined_call_operand.vmem [shape: f32[1,128], index: 2, kind: input, shape index: {}]   ;;  %s1276_s3 = inlined_call_operand.vmem [shape: f32[1,128], index: 3, kind: input, shape index: {}]   ;;  %s1277_s4 = inlined_call_operand.vmem [shape: f32[1,128], index: 4, kind: input, shape index: {}]   ;;  %s1278_s5 = inlined_call_operand.hbm [shape: f32[2,1,128], index: 5, kind: output, shape index: {}]  }
   0x1   :  { %12 = vsyncpa [#allocation3 + $0x1], 0  ;;  %s1059_s18 = smov 0   ;;  %s1061_s19 = smov 0  }
   0x2   :  { %s1063_s20 = smov 0   ;;  %s1065_s21 = smov 0  }
   0x3 LB: > { %s1080_s22 = sadd.s32 4294967295, %s1027_s21   ;;  %s717_s23 = sadd.s32 4294967294, %s1027_s21   ;;  %s1027_s21 = sphi %s1065_s21, %s1284_s21   ;;  %s1023_s20 = sphi %s1063_s20, %s1283_s20   ;;  %s1019_s19 = sphi %s1061_s19, %s1282_s19   ;;  %s1015_s18 = sphi %s1059_s18, %s1281_s18  }
   0x4   : > { %s1084_s24 = sadd.s32 1, %s1027_s21   ;;  %s135_s25 = sadd.s32 1, %s1023_s20 }
   0x5   : > { %s132_s26 = ssub.s32 %s1027_s21, %s1084_s24  ;;  %p145_p0 = scmp.ne.s32.totalorder %s1023_s20, %s1019_s19 }
   0x6   : > { %p133_p1 = scmp.eq.s32.totalorder %s132_s26, 0  ;;  %p146_p2 = scmp.eq.s32.totalorder %s1080_s22, 1 }
   0x7   : > { %p151_p3 = scmp.ne.s32.totalorder %s1019_s19, %s1015_s18  ;;  %p152_p4 = scmp.eq.s32.totalorder %s717_s23, 1 }
   0x8   : > { %s1095_s27 = scalar_select %p133_p1, %s1023_s20, %s135_s25  }
   0x9   : > { %p1097_p5 = por %p146_p2, %p145_p0  ;;  %p1101_p6 = por %p152_p4, %p151_p3 }
   0xa   : > { %p720_p7 = scmp.ge.s32.totalorder %s1027_s21, 1  ;;  %p189_p8 = scmp.lt.s32.totalorder %s1027_s21, 3 }
   0xc   : > { %p190_p9 = pnand %p720_p7, %p189_p8 }
   0xd   : > { %p215_p10 = scmp.lt.s32.totalorder (!%p190_p9), %s1080_s22, 1  ;;  %s213_s12 = sand.u32 (!%p190_p9), 1, %s1019_s19  }
   0xe   : > { %193 = sbr.rel (%p190_p9) target bundleno = 484 (0x1e4), region = 40  ;;  %s658_s17 = scalar_lea.hbm (!%p190_p9), %s1278_s5, %s1080_s22 }
   0xf   : > { %s214_s26 = scalar_lea.vmem (!%p190_p9), [#allocation2], %s213_s12  ;;  %s650_s7 = scalar_lea.sflag (!%p190_p9), [#allocation3], %s213_s12 }
  0x10   : > { %s660_s30 = sshll.u32 (!%p190_p9), %s214_s26, 4  ;;  %s661_s30 = int_to_ptr.vmem [resolvable:$true] %s660_s30 }
  0x13   : > { %v890_v0 = vld [vmem:[%s1274_s1 + $0x38] sm:$0xff]  ;;  %v889_v3 = vld [vmem:[%s1274_s1 + $0x30] sm:$0xff]  ;;  %s216_s15 = scalar_select %p215_p10, %s1080_s22, 1  ;;  %v888_v8 = vld [vmem:[%s1274_s1 + $0x28] sm:$0xff]  ;;  %vm618_vm0 = vcmask 1040384  }
  0x14   : > { %v906_v1 = vld [vmem:[%s1274_s1 + $0xb8] sm:$0xff]  ;;  %553 = vmatpush.bf16.msra.mxu0 %v890_v0  ;;  %v905_v5 = vld [vmem:[%s1274_s1 + $0xb0] sm:$0xff]  ;;  %v904_v9 = vld [vmem:[%s1274_s1 + $0xa8] sm:$0xff] }
  0x15   : > { %v914_v2 = vld [vmem:[%s1274_s1 + $0xf8] sm:$0xff]  ;;  %579 = vmatpush.bf16.msra.mxu2 %v906_v1  ;;  %v913_v6 = vld [vmem:[%s1274_s1 + $0xf0] sm:$0xff]  ;;  %s923_s6 = smul.u32 5, %s216_s15  ;;  %v912_v10 = vld [vmem:[%s1274_s1 + $0xe8] sm:$0xff] }
  0x16   : > { %v898_v4 = vld [vmem:[%s1274_s1 + $0x78] sm:$0xff]  ;;  %592 = vmatpush.bf16.msra.mxu3 %v914_v2  ;;  %v897_v7 = vld [vmem:[%s1274_s1 + $0x70] sm:$0xff]  ;;  %v896_v11 = vld [vmem:[%s1274_s1 + $0x68] sm:$0xff] }
  0x17   : > { %566 = vmatpush.bf16.msra.mxu1 %v898_v4  ;;  %s218_s11 = scalar_lea.vmem %s1273_s0, %s923_s6  ;;  %v887_v13 = vld [vmem:[%s1274_s1 + $0x20] sm:$0xff]  ;;  %v886_v17 = vld [vmem:[%s1274_s1 + $0x18] sm:$0xff]  ;;  %v885_v21 = vld [vmem:[%s1274_s1 + $0x10] sm:$0xff]  ;;  %s662_s6 = sshll.u32 %s658_s17, 4  ;;  %s663_s6 = int_to_ptr.hbm [resolvable:$true] %s662_s6 }
  0x18   : > { %554 = vmatpush.bf16.msra.mxu0 %v889_v3  ;;  %v219_v12 = vld [vmem:[%s218_s11] sm:$0x1f]  ;;  %v902_v18 = vld [vmem:[%s1274_s1 + $0x98] sm:$0xff]  ;;  %v901_v22 = vld [vmem:[%s1274_s1 + $0x90] sm:$0xff]  ;;  %s979_s8 = sshra.s32 %s663_s6, 4  ;;  %s985_s11 = scalar_lea.hbm %s1278_s5, 2  ;;  %s980_s8 = int_to_ptr.hbm [resolvable:$true] %s979_s8 }
  0x19   : > { %580 = vmatpush.bf16.msra.mxu2 %v905_v5  ;;  %302 = vst [vmem:[#allocation1] ss:$9 sm:$0xff] %v219_v12  ;;  %v903_v14 = vld [vmem:[%s1274_s1 + $0xa0] sm:$0xff]  ;;  %v910_v19 = vld [vmem:[%s1274_s1 + $0xd8] sm:$0xff]  ;;  %v909_v23 = vld [vmem:[%s1274_s1 + $0xd0] sm:$0xff]  ;;  %s981_s9 = scalar_lea.hbm %s980_s8, 1  ;;  %p986_p0 = scmp.lt.s32.totalorder %s980_s8, %s1278_s5 }
  0x1a   : > { %593 = vmatpush.bf16.msra.mxu3 %v913_v6  ;;  %v911_v15 = vld [vmem:[%s1274_s1 + $0xe0] sm:$0xff]  ;;  %v894_v20 = vld [vmem:[%s1274_s1 + $0x58] sm:$0xff]  ;;  %v893_v24 = vld [vmem:[%s1274_s1 + $0x50] sm:$0xff]  ;;  %p982_p11 = scmp.ne.s32.totalorder %s980_s8, %s981_s9  ;;  %p987_p1 = scmp.lt.s32.totalorder %s985_s11, %s981_s9 }
  0x1b   : > { %567 = vmatpush.bf16.msra.mxu1 %v897_v7  ;;  %v895_v16 = vld [vmem:[%s1274_s1 + $0x60] sm:$0xff]  ;;  %v884_v25 = vld [vmem:[%s1274_s1 + $0x8] sm:$0xff]  ;;  %v922_v30 = vld [vmem:[%s1274_s1 + $0x138] sm:$0xff] }
  0x1c   : > { %555 = vmatpush.bf16.msra.mxu0 %v888_v8  ;;  %v900_v26 = vld [vmem:[%s1274_s1 + $0x88] sm:$0xff]  ;;  %v883_v29 = vld [vmem:[%s1274_s1] sm:$0xff]  ;;  %v921_v35 = vld [vmem:[%s1274_s1 + $0x130] sm:$0xff]  ;;  %p983_p12 = pnand %p982_p11, %p1097_p5  ;;  %p988_p2 = por %p987_p1, %p986_p0 }
  0x1d   : > { %581 = vmatpush.bf16.msra.mxu2 %v904_v9  ;;  %v908_v27 = vld [vmem:[%s1274_s1 + $0xc8] sm:$0xff]  ;;  %v899_v31 = vld [vmem:[%s1274_s1 + $0x80] sm:$0xff]  ;;  %v918_v41 = vld [vmem:[%s1274_s1 + $0x118] sm:$0xff] }
  0x1e   : > { %594 = vmatpush.bf16.msra.mxu3 %v912_v10  ;;  %v892_v28 = vld [vmem:[%s1274_s1 + $0x48] sm:$0xff]  ;;  %v907_v32 = vld [vmem:[%s1274_s1 + $0xc0] sm:$0xff]  ;;  %v917_v42 = vld [vmem:[%s1274_s1 + $0x110] sm:$0xff]  ;;  %p984_p13 = pneg %p983_p12 }
  0x1f   : > { %568 = vmatpush.bf16.msra.mxu1 %v896_v11  ;;  %v891_v33 = vld [vmem:[%s1274_s1 + $0x40] sm:$0xff]  ;;  %v920_v39 = vld [vmem:[%s1274_s1 + $0x128] sm:$0xff] }
  0x20   : > { %556 = vmatpush.bf16.msra.mxu0 %v887_v13  ;;  %v303_v34 = vld [vmem:[#allocation1] sm:$0xff]  ;;  %v305_v36 = vld [vmem:[#allocation1 + $0x12] sm:$0xff]  ;;  %v304_v38 = vld [vmem:[#allocation1 + $0x9] sm:$0xff]  ;;  %p989_p3 = pnand %p988_p2, %p984_p13 }
  0x21   : > { %582 = vmatpush.bf16.msra.mxu2 %v903_v14  ;;  %v306_v37 = vld [vmem:[#allocation1 + $0x1b] sm:$0xff]  ;;  %v916_v43 = vld [vmem:[%s1274_s1 + $0x108] sm:$0xff] }
  0x22   : > { %595 = vmatpush.bf16.msra.mxu3 %v911_v15  ;;  %v919_v40 = vld [vmem:[%s1274_s1 + $0x120] sm:$0xff] }
  0x23   : > { %569 = vmatpush.bf16.msra.mxu1 %v895_v16  ;;  %v915_v44 = vld [vmem:[%s1274_s1 + $0x100] sm:$0xff] }
  0x24   : > { %557 = vmatpush.bf16.msra.mxu0 %v886_v17  ;;  %v307_v45 = vld [vmem:[#allocation1 + $0x24] sm:$0xff]  ;;  %v300_v52 = vld [vmem:[%s1275_s2] sm:$0x1] }
  0x25   : > { %583 = vmatpush.bf16.msra.mxu2 %v902_v18  ;;  %v643_v14 = vld [vmem:[%s1276_s3] sm:$0x1] }
  0x26   : > { %596 = vmatpush.bf16.msra.mxu3 %v910_v19  ;;  %v645_v16 = vld [vmem:[%s1277_s4] sm:$0x1] }
  0x27   : > { %570 = vmatpush.bf16.msra.mxu1 %v894_v20 }
  0x28   : > { %558 = vmatpush.bf16.msra.mxu0 %v885_v21 }
  0x29   : > { %584 = vmatpush.bf16.msra.mxu2 %v901_v22 }
  0x2a   : > { %597 = vmatpush.bf16.msra.mxu3 %v909_v23 }
  0x2b   : > { %571 = vmatpush.bf16.msra.mxu1 %v893_v24 }
  0x2c   : > { %559 = vmatpush.bf16.msra.mxu0 %v884_v25 }
  0x2d   : > { %585 = vmatpush.bf16.msra.mxu2 %v900_v26 }
  0x2e   : > { %598 = vmatpush.bf16.msra.mxu3 %v908_v27 }
  0x2f   : > { %572 = vmatpush.bf16.msra.mxu1 %v892_v28 }
  0x30   : > { %560 = vmatpush.bf16.msra.mxu0 %v883_v29 }
  0x31   : > { %586 = vmatpush.bf16.msra.mxu2 %v899_v31 }
  0x32   : > { %599 = vmatpush.bf16.msra.mxu3 %v907_v32 }
  0x33   : > { %573 = vmatpush.bf16.msra.mxu1 %v891_v33  ;;  %561 = vmatmul.bf16.vlgmr.msra.gmra.mxu0 %v303_v34 }
  0x34   : > { %605 = vmatpush.bf16.msrb.mxu0 %v922_v30  ;;  %587 = vmatmul.bf16.vlgmr.msra.gmra.mxu2 %v305_v36 }
  0x35   : > { %600 = vmatmul.bf16.vlgmr.msra.gmra.mxu3 %v306_v37 }
  0x36   : > { %574 = vmatmul.bf16.vlgmr.msra.gmra.mxu1 %v304_v38 }
  0x38   : > { %606 = vmatpush.bf16.msrb.mxu0 %v921_v35 }
  0x3c   : > { %607 = vmatpush.bf16.msrb.mxu0 %v920_v39 }
  0x40   : > { %608 = vmatpush.bf16.msrb.mxu0 %v919_v40 }
  0x44   : > { %609 = vmatpush.bf16.msrb.mxu0 %v918_v41 }
  0x48   : > { %610 = vmatpush.bf16.msrb.mxu0 %v917_v42 }
  0x4c   : > { %611 = vmatpush.bf16.msrb.mxu0 %v916_v43 }
  0x50   : > { %612 = vmatpush.bf16.msrb.mxu0 %v915_v44 }
  0x53   : > { %613 = vmatmul.bf16.vlgmr.msrb.gmra.mxu0 %v307_v45 }
  0xb0   : > { %v562_v46 = vpop.f32.mrf.mxu0 }
  0xb1   : > { %v563_v54 = vadd.f32 %v562_v46, %v300_v52 }
  0xb3   : > { %v575_v47 = vpop.f32.mrf.mxu1 }
  0xb4   : > { %v576_v56 = vadd.f32 %v575_v47, %v563_v54 }
  0xb7   : > { %v588_v48 = vpop.f32.mrf.mxu2 }
  0xb8   : > { %v564_v49 = vpop.f32.mrf.mxu0  ;;  %v601_v50 = vpop.f32.mrf.mxu3  ;;  %v589_v57 = vadd.f32 %v588_v48, %v576_v56 }
  0xba   : > { %v602_v58 = vadd.f32 %v601_v50, %v589_v57 }
  0xbb   : > { %v577_v51 = vpop.f32.mrf.mxu1 }
  0xbf   : > { %v590_v53 = vpop.f32.mrf.mxu2 }
  0xc0   : > { %v603_v55 = vpop.f32.mrf.mxu3 }
  0xd0   : > { %v614_v59 = vpop.f32.mrf.mxu0 }
  0xd1   : > { %v615_v60 = vadd.f32 %v614_v59, %v602_v58 }
  0xd3   : > { %v619_v61 = vsel %vm618_vm0, %v615_v60, 0.0 }
  0xd4   : > { %620 = vadd.xlane.f32.xlu0 %v619_v61 }
  0xd8   : > { %v616_v62 = vpop.f32.mrf.mxu0 }
 0x147   : > { %v621_v63 = vpop.xlane.xlu0 %620 }
 0x148   : > { %v623_v0 = vmul.f32 0.0078125, %v621_v63 }
 0x14a   : > { %v624_v1 = vsub.f32 %v615_v60, %v623_v0 }
 0x14c   : > { %v625_v2 = vmul.f32 %v624_v1, %v624_v1 }
 0x14e   : > { %v626_v3 = vsel %vm618_vm0, %v625_v2, 0.0 }
 0x14f   : > { %627 = vadd.xlane.f32.xlu0 %v626_v3 }
 0x1c2   : > { %v628_v4 = vpop.xlane.xlu0 %627 }
 0x1c3   : > { %v630_v5 = vmul.f32 0.0078125, %v628_v4 }
 0x1c5   : > { %v631_v6 = vadd.f32 1e-05, %v630_v5 }
 0x1c7   : > { %963 = vrsqrt.f32 %v631_v6  ;;  %vm638_vm2 = vweird.f32 %v631_v6 }
 0x1cd   : > { %v964_v7 = vpop.eup %963 }
 0x1ce   : > { %v633_v8 = vmul.f32 %v964_v7, %v631_v6  ;;  %vm639_vm1 = vweird.f32 %v964_v7 }
 0x1cf   : > { %vm640_vm3 = vmor %vm638_vm2, %vm639_vm1 }
 0x1d0   : > { %v634_v9 = vmul.f32 %v964_v7, %v633_v8 }
 0x1d2   : > { %v635_v10 = vmul.f32 0.5, %v634_v9 }
 0x1d4   : > { %v636_v11 = vsub.f32 1.5, %v635_v10 }
 0x1d6   : > { %v637_v12 = vmul.f32 %v964_v7, %v636_v11 }
 0x1d8   : > { %v641_v13 = vsel %vm640_vm3, %v964_v7, %v637_v12 }
 0x1d9   : > { %v642_v15 = vmul.f32 %v641_v13, %v624_v1 }
 0x1db   : > { %v644_v17 = vmul.f32 %v643_v14, %v642_v15 }
 0x1dd   : > { %v646_v18 = vadd.f32 %v645_v16, %v644_v17 }
 0x1df   : > { %v647_v19 = vmax.f32 %v646_v18, 0.0 }
 0x1e1   : > { %648 = vst [vmem:[%s214_s26] sm:$0x1] %v647_v19 }
 0x1e2   : > { %992 = shalt.err (!%p989_p3)
}
 0x1e3   : > { %924 = dma.vmem_to_hbm [thread:$0]  (%p1097_p5), %s661_s30, 16, %s663_s6, %s650_s7  }
 0x1e4 PF: > { %p930_p4 = scmp.ge.s32.totalorder %s1027_s21, 2  ;;  %s674_s12 = sand.u32 1, %s1015_s18  }
 0x1e5   : > { %s675_s16 = scalar_lea.sflag [#allocation3], %s674_s12 }
 0x1e6   : > { %p927_p7 = pnand %p930_p4, %p1101_p6 }
 0x1e8   : > { %p928_p8 = pneg %p927_p7 }
 0x1ea   : > { %1010 = dma.done.wait (%p928_p8), %s675_s16, 16  }
 0x1eb   : > { %1012 = vsyncadd (%p928_p8), %s675_s16, 4294967280  ;;  %p15_p9 = scmp.ge.s32.totalorder %s1084_s24, 4   ;;  %s1281_s18 = smov %s1019_s19 }
 0x1ec   : > { %s1282_s19 = smov %s1023_s20  ;;  %s1283_s20 = smov %s1095_s27 }
 0x1ed   : > { %s1284_s21 = smov %s1084_s24  ;;  %17 = sbr.rel (!%p15_p9) target bundleno = 3 (0x3), region = 75 }
 0x1f2   :  { %680 = vsyncpa [#allocation3], 1 }
 0x1f3   :  { %682 = vsyncpa [#allocation3 + $0x1], 1 }

</bundles_post_ra>
